<compile_context>
chip_gen: v6e
topology: v6e:2x2x1
jax: 0.10.0
libtpu: 0.0.40
codegen_flags: <defaults>
</compile_context>

<pallas_src>
import math

import jax
import jax.numpy as jnp
import numpy as np
from jax.experimental import pallas as pl
from jax.experimental.pallas import tpu as pltpu

C_IN = 1280        # channels out of the MobileNetV2 trunk (classifier in_features)
LABEL_DIM = 527    # classifier out_features


def _round_up(x, m):
    return ((x + m - 1) // m) * m


def _mbnet_head_kernel(feat_ref, w_ref, b_ref, out_ref):
    """One batch tile (Bt examples) per grid step.

    feat_ref : (Bt, HW, C_in)  bf16  backbone features, channels-last
    w_ref    : (C_in, N_pad)   bf16  classifier weight (transposed vs. PyTorch)
    b_ref    : (1, N_pad)      f32   classifier bias (zero-padded)
    out_ref  : (Bt, N_pad)     f32   sigmoid(logits)
    """
    # Global average pool over the spatial axis (f32 accumulation for accuracy).
    pooled = jnp.mean(feat_ref[...].astype(jnp.float32), axis=1)      # (Bt, C_in)

    # Linear(1280 -> N) as a single MXU matmul; bf16 inputs, f32 accumulate.
    logits = jnp.dot(pooled.astype(jnp.bfloat16), w_ref[...],
                     preferred_element_type=jnp.float32) + b_ref[...]  # (Bt, N_pad)

    # Final sigmoid of MBNet.forward (EUP).
    out_ref[...] = jax.nn.sigmoid(logits)


def mbnet_head(features_nchw, weight, bias, *, block_b=128):
    """features_nchw: (B, 1280, H, W) — MobileNetV2 trunk output.
    weight: (1280, 527) (= PyTorch Linear weight transposed), bias: (527,).
    Returns (B, 527), matching `out` of MBNet.forward."""
    B, C, H, W = features_nchw.shape
    assert C == C_IN
    N = weight.shape[1]
    HW = H * W

    N_pad = _round_up(N, 128)                      # 527 -> 640: lane-dense output
    Bt = min(block_b, _round_up(B, 8))             # batch rows per grid step
    B_pad = _round_up(B, Bt)

    # Layout glue: NCHW -> channels-last (B, H*W, C) so C rides the lanes.
    feat = jnp.transpose(features_nchw, (0, 2, 3, 1)).reshape(B, HW, C)
    feat = feat.astype(jnp.bfloat16)
    if B_pad != B:
        feat = jnp.pad(feat, ((0, B_pad - B), (0, 0), (0, 0)))

    w_pad = jnp.pad(weight.astype(jnp.bfloat16), ((0, 0), (0, N_pad - N)))
    b_pad = jnp.pad(bias.astype(jnp.float32), ((0, N_pad - N),)).reshape(1, N_pad)

    out = pl.pallas_call(
        _mbnet_head_kernel,
        out_shape=jax.ShapeDtypeStruct((B_pad, N_pad), jnp.float32),
        grid_spec=pltpu.PrefetchScalarGridSpec(
            num_scalar_prefetch=0,
            grid=(B_pad // Bt,),
            in_specs=[
                pl.BlockSpec((Bt, HW, C), lambda i: (i, 0, 0)),
                pl.BlockSpec((C, N_pad), lambda i: (0, 0)),
                pl.BlockSpec((1, N_pad), lambda i: (0, 0)),
            ],
            out_specs=pl.BlockSpec((Bt, N_pad), lambda i: (i, 0)),
        ),
        compiler_params=pltpu.CompilerParams(
            dimension_semantics=("parallel",),
        ),
    )(feat, w_pad, b_pad)

    # Drop batch padding and the zero-padded output channels.
    return out[:B, :N]


def _ref_forward(features_nchw, weight, bias):
    """Pure-JAX f32 reference mirroring the PyTorch post-backbone forward:
    global average pool -> Linear(1280, 527) -> sigmoid."""
    pooled = jnp.mean(features_nchw, axis=(2, 3))          # (B, 1280)
    return jax.nn.sigmoid(pooled @ weight + bias)          # (B, 527)


if __name__ == "__main__":
    key = jax.random.PRNGKey(0)
    k_w, k_b, k_feat = jax.random.split(key, 3)

    batch, H, W = 2, 4, 4

    # Synthetic MobileNetV2 trunk output (what self.model.features(x) produces).
    features = 0.1 * jax.random.normal(k_feat, (batch, C_IN, H, W),
                                       dtype=jnp.float32)

    # Classifier params (nn.Linear default-style uniform init), stored as
    # (in, out) i.e. the transpose of PyTorch's (out, in) weight.
    bound = 1.0 / math.sqrt(C_IN)
    weight = jax.random.uniform(k_w, (C_IN, LABEL_DIM), jnp.float32,
                                minval=-bound, maxval=bound)
    bias = jax.random.uniform(k_b, (LABEL_DIM,), jnp.float32,
                              minval=-bound, maxval=bound)

    out = jax.block_until_ready(mbnet_head(features, weight, bias))
    ref = jax.block_until_ready(_ref_forward(features, weight, bias))

    assert out.shape == (batch, LABEL_DIM)
    # bf16 feature/weight inputs (f32 accumulation) -> relaxed tolerance.
    np.testing.assert_allclose(np.asarray(out), np.asarray(ref),
                               rtol=2e-2, atol=2e-2)

    print("KERNEL_OK")
</pallas_src>

<mosaic_0001>
module attributes {stable_mosaic.version = 11 : i64} {
  func.func @_mbnet_head_kernel(%arg0: i32, %arg1: memref<8x16x1280xbf16, #tpu.memory_space<vmem>>, %arg2: memref<1280x640xbf16, #tpu.memory_space<vmem>>, %arg3: memref<1x640xf32, #tpu.memory_space<vmem>>, %arg4: memref<8x640xf32, #tpu.memory_space<vmem>>) attributes {dimension_semantics = [#tpu.dimension_semantics<parallel>], iteration_bounds = array<i64: 1>, scalar_prefetch = 0 : i64, scratch_operands = 0 : i64, tpu.core_type = #tpu.core_type<tc>, window_params = [{transform_indices = @transform_0, window_bounds = array<i64: 8, 16, 1280>}, {pipeline_mode = #tpu.pipeline_mode<synchronous>, transform_indices = @transform_1, window_bounds = array<i64: 1280, 640>}, {pipeline_mode = #tpu.pipeline_mode<synchronous>, transform_indices = @transform_2, window_bounds = array<i64: 1, 640>}, {transform_indices = @transform_3, window_bounds = array<i64: 8, 640>}]} {
    %c0 = arith.constant 0 : index
    %c0_0 = arith.constant 0 : index
    %c0_1 = arith.constant 0 : index
    %0 = vector.load %arg1[%c0, %c0_0, %c0_1] : memref<8x16x1280xbf16, #tpu.memory_space<vmem>>, vector<8x16x1280xbf16>
    %1 = arith.extf %0 : vector<8x16x1280xbf16> to vector<8x16x1280xf32>
    %cst = arith.constant dense<0.000000e+00> : vector<8x1280xf32>
    %2 = vector.multi_reduction <add>, %1, %cst [1] : vector<8x16x1280xf32> to vector<8x1280xf32>
    %cst_2 = arith.constant 1.600000e+01 : f32
    %3 = vector.broadcast %cst_2 : f32 to vector<8x1280xf32>
    %4 = arith.divf %2, %3 : vector<8x1280xf32>
    %5 = arith.truncf %4 : vector<8x1280xf32> to vector<8x1280xbf16>
    %c0_3 = arith.constant 0 : index
    %c0_4 = arith.constant 0 : index
    %6 = vector.load %arg2[%c0_3, %c0_4] : memref<1280x640xbf16, #tpu.memory_space<vmem>>, vector<1280x640xbf16>
    %cst_5 = arith.constant dense<0.000000e+00> : vector<8x640xf32>
    %7 = tpu.matmul %5, %6, %cst_5 {dimension_numbers = #tpu.dot_dimension_numbers<[1], [0], [0], [1], [0, 0, 1, 1], [], []>} : vector<8x1280xbf16>, vector<1280x640xbf16>, vector<8x640xf32> -> vector<8x640xf32>
    %c0_6 = arith.constant 0 : index
    %c0_7 = arith.constant 0 : index
    %8 = vector.load %arg3[%c0_6, %c0_7] : memref<1x640xf32, #tpu.memory_space<vmem>>, vector<1x640xf32>
    %9 = vector.broadcast %8 : vector<1x640xf32> to vector<8x640xf32>
    %10 = arith.addf %7, %9 : vector<8x640xf32>
    %11 = arith.negf %10 : vector<8x640xf32>
    %12 = math.exp %11 : vector<8x640xf32>
    %cst_8 = arith.constant 1.000000e+00 : f32
    %13 = vector.broadcast %cst_8 : f32 to vector<8x640xf32>
    %14 = arith.addf %13, %12 : vector<8x640xf32>
    %15 = arith.divf %13, %14 : vector<8x640xf32>
    %c0_9 = arith.constant 0 : index
    %c0_10 = arith.constant 0 : index
    %16 = vector.load %arg4[%c0_9, %c0_10] : memref<8x640xf32, #tpu.memory_space<vmem>>, vector<8x640xf32>
    tpu.vector_store %arg4[%c0_9, %c0_10], %15 {strides = array<i32>} : memref<8x640xf32, #tpu.memory_space<vmem>>, vector<8x640xf32>,
    return
  }
  func.func @transform_0(%arg0: i32) -> (i32, i32, i32) {
    %c0_i32 = arith.constant 0 : i32
    %c0_i32_0 = arith.constant 0 : i32
    %c0_i32_1 = arith.constant 0 : i32
    return %arg0, %c0_i32, %c0_i32_0 : i32, i32, i32
  }
  func.func @transform_1(%arg0: i32) -> (i32, i32) {
    %c0_i32 = arith.constant 0 : i32
    %c0_i32_0 = arith.constant 0 : i32
    %c0_i32_1 = arith.constant 0 : i32
    return %c0_i32, %c0_i32_0 : i32, i32
  }
  func.func @transform_2(%arg0: i32) -> (i32, i32) {
    %c0_i32 = arith.constant 0 : i32
    %c0_i32_0 = arith.constant 0 : i32
    %c0_i32_1 = arith.constant 0 : i32
    return %c0_i32, %c0_i32_0 : i32, i32
  }
  func.func @transform_3(%arg0: i32) -> (i32, i32) {
    %c0_i32 = arith.constant 0 : i32
    %c0_i32_0 = arith.constant 0 : i32
    return %arg0, %c0_i32 : i32, i32
  }
}

</mosaic_0001>

<bundles_post_ra>
// kernel: tpu_custom_call.1
= control target key start
LH: loop header
LB: loop body
LE: loop exit
PB: predicated region body
PF: predicated region fallthrough
CT: control target
= control target key end

     0   :  { %8 = vsyncpa [#allocation3], 0  ;;  %s6340_s0 = inlined_call_operand.hbm [shape: bf16[8,16,1280], index: 0, kind: input, shape index: {}]   ;;  %s6341_s1 = inlined_call_operand.hbm [shape: bf16[1280,640], index: 1, kind: input, shape index: {}]   ;;  %s6342_s2 = inlined_call_operand.hbm [shape: f32[1,640], index: 2, kind: input, shape index: {}]   ;;  %s6343_s3 = inlined_call_operand.hbm [shape: f32[8,640], index: 3, kind: output, shape index: {}]  }
   0x1   :  { %9 = vsyncpa [#allocation6], 0 }
   0x2   :  { %10 = vsyncpa [#allocation4], 0  ;;  %s5710_s12 = smov [#allocation5]  }
   0x3   :  { %s28_s13 = sshll.u32 %s5710_s12, 4  ;;  %s29_s13 = int_to_ptr.vmem [resolvable:$true] %s28_s13 }
   0x4   :  { %s5632_s14 = scalar_lea.vmem %s29_s13, 51200  ;;  %p5637_p1 = scmp.lt.s32.totalorder %s29_s13, %s29_s13 }
   0x5   :  { %p5633_p0 = scmp.ne.s32.totalorder %s29_s13, %s5632_s14  ;;  %p5638_p2 = scmp.lt.s32.totalorder %s5632_s14, %s5632_s14 }
   0x7   :  { %p5639_p3 = por %p5638_p2, %p5637_p1 }
   0x9   :  { %p5640_p4 = pnand %p5639_p3, %p5633_p0 }
   0xb   :  { %5643 = shalt.err (!%p5640_p4)
}
   0xc   :  { %s5711_s15 = smov 320   ;;  %s5712_s16 = smov 20  }
   0xd   :  { %34 = dma.hbm_to_vmem [thread:$0]  %s6341_s1, 51200, %s29_s13, [#allocation6], %s5711_s15, %s5711_s15, %s5712_s16  }
   0xe   :  { %s5713_s19 = smov [#allocation2]  }
   0xf   :  { %s16_s20 = sshll.u32 %s5713_s19, 4  ;;  %s17_s20 = int_to_ptr.vmem [resolvable:$true] %s16_s20 }
  0x10   :  { %s5652_s21 = scalar_lea.vmem %s17_s20, 10240  ;;  %p5657_p6 = scmp.lt.s32.totalorder %s17_s20, %s17_s20 }
  0x11   :  { %p5653_p5 = scmp.ne.s32.totalorder %s17_s20, %s5652_s21  ;;  %p5658_p7 = scmp.lt.s32.totalorder %s5652_s21, %s5652_s21 }
  0x13   :  { %p5659_p8 = por %p5658_p7, %p5657_p6 }
  0x15   :  { %p5660_p9 = pnand %p5659_p8, %p5653_p5 }
  0x17   :  { %5663 = shalt.err (!%p5660_p9)
}
  0x18   :  { %s5714_s22 = smov 640   ;;  %s5715_s23 = smov 40  }
  0x19   :  { %22 = dma.hbm_to_vmem [thread:$0]  %s6340_s0, 10240, %s17_s20, [#allocation3], %s5714_s22, %s5714_s22, %s5715_s23  }
  0x1a   :  { %s5716_s26 = smov [#allocation7]  }
  0x1b   :  { %s41_s27 = sshll.u32 %s5716_s26, 4  ;;  %s42_s27 = int_to_ptr.vmem [resolvable:$true] %s41_s27 }
  0x1c   :  { %s5672_s1 = scalar_lea.vmem %s42_s27, 80  ;;  %s5676_s28 = scalar_lea.vmem %s42_s27, 96 }
  0x1d   :  { %p5673_p10 = scmp.ne.s32.totalorder %s42_s27, %s5672_s1  ;;  %p5677_p11 = scmp.lt.s32.totalorder %s42_s27, %s42_s27 }
  0x1e   :  { %p5678_p12 = scmp.lt.s32.totalorder %s5676_s28, %s5672_s1 }
  0x20   :  { %p5679_p13 = por %p5678_p12, %p5677_p11 }
  0x22   :  { %p5680_p0 = pnand %p5679_p13, %p5673_p10 }
  0x24   :  { %5683 = shalt.err (!%p5680_p0)
}
  0x25   :  { %44 = dma.hbm_to_vmem [thread:$0]  %s6342_s2, 80, %s42_s27, [#allocation6]  }
  0x26   :  { %5704 = dma.done.wait [#allocation3], 10240  }
  0x27   :  { %5705 = vsyncadd [#allocation3], 4294957056 }
  0x28   :  { %5706 = dma.done.wait [#allocation6], 51280  }
  0x29   :  { %5707 = vsyncadd [#allocation6], 4294916016  ;;  %v5044_v0 = vld [vmem:[#allocation5 + $0x11c] ss:$20 sps:$4 sm:$0xff]   ;;  %v5046_v1 = vld [vmem:[#allocation5 + $0x118] ss:$20 sps:$4 sm:$0xff]  }
  0x2a   :  { %3860 = vmatprep.subr.bf16.mxu0 %v5044_v0  ;;  %v5047_v2 = vld [vmem:[#allocation5 + $0x39c] ss:$20 sps:$4 sm:$0xff]   ;;  %v5049_v3 = vld [vmem:[#allocation5 + $0x398] ss:$20 sps:$4 sm:$0xff]   ;;  %v5050_v4 = vld [vmem:[#allocation5 + $0xf4] ss:$20 sps:$4 sm:$0xff]  }
  0x2b   :  { %3861 = vmatpush1.bf16.msra.mxu0 %v5046_v1  ;;  %v5052_v5 = vld [vmem:[#allocation5 + $0xf0] ss:$20 sps:$4 sm:$0xff]   ;;  %3901 = vmatprep.subr.bf16.mxu1 %v5047_v2  ;;  %v5053_v6 = vld [vmem:[#allocation5 + $0x374] ss:$20 sps:$4 sm:$0xff]   ;;  %v5056_v8 = vld [vmem:[#allocation5 + $0xcc] ss:$20 sps:$4 sm:$0xff]  }
  0x2c   :  { %3902 = vmatpush1.bf16.msra.mxu1 %v5049_v3  ;;  %3862 = vmatprep.subr.bf16.mxu0 %v5050_v4  ;;  %v5055_v7 = vld [vmem:[#allocation5 + $0x370] ss:$20 sps:$4 sm:$0xff]   ;;  %v5058_v9 = vld [vmem:[#allocation5 + $0xc8] ss:$20 sps:$4 sm:$0xff]   ;;  %v5059_v10 = vld [vmem:[#allocation5 + $0x34c] ss:$20 sps:$4 sm:$0xff]  }
  0x2d   :  { %3903 = vmatprep.subr.bf16.mxu1 %v5053_v6  ;;  %v5062_v11 = vld [vmem:[#allocation5 + $0xa4] ss:$20 sps:$4 sm:$0xff]   ;;  %v5061_v12 = vld [vmem:[#allocation5 + $0x348] ss:$20 sps:$4 sm:$0xff]   ;;  %v5064_v14 = vld [vmem:[#allocation5 + $0xa0] ss:$20 sps:$4 sm:$0xff]  }
  0x2e   :  { %v5065_v13 = vld [vmem:[#allocation5 + $0x324] ss:$20 sps:$4 sm:$0xff]   ;;  %v5068_v15 = vld [vmem:[#allocation5 + $0x7c] ss:$20 sps:$4 sm:$0xff]   ;;  %v5067_v16 = vld [vmem:[#allocation5 + $0x320] ss:$20 sps:$4 sm:$0xff]  }
  0x2f   :  { %3863 = vmatpush1.bf16.msra.mxu0 %v5052_v5  ;;  %v5071_v17 = vld [vmem:[#allocation5 + $0x2fc] ss:$20 sps:$4 sm:$0xff]   ;;  %v5070_v18 = vld [vmem:[#allocation5 + $0x78] ss:$20 sps:$4 sm:$0xff]   ;;  %v5074_v19 = vld [vmem:[#allocation5 + $0x54] ss:$20 sps:$4 sm:$0xff]  }
  0x30   :  { %3864 = vmatprep.subr.bf16.mxu0 %v5056_v8  ;;  %3904 = vmatpush1.bf16.msra.mxu1 %v5055_v7  ;;  %v5073_v20 = vld [vmem:[#allocation5 + $0x2f8] ss:$20 sps:$4 sm:$0xff]   ;;  %v5077_v21 = vld [vmem:[#allocation5 + $0x2d4] ss:$20 sps:$4 sm:$0xff]   ;;  %v5076_v22 = vld [vmem:[#allocation5 + $0x50] ss:$20 sps:$4 sm:$0xff]  }
  0x31   :  { %3905 = vmatprep.subr.bf16.mxu1 %v5059_v10  ;;  %v5080_v23 = vld [vmem:[#allocation5 + $0x2c] ss:$20 sps:$4 sm:$0xff]   ;;  %v5079_v24 = vld [vmem:[#allocation5 + $0x2d0] ss:$20 sps:$4 sm:$0xff]   ;;  %v5082_v26 = vld [vmem:[#allocation5 + $0x28] ss:$20 sps:$4 sm:$0xff]  }
  0x32   :  { %v5083_v25 = vld [vmem:[#allocation5 + $0x2ac] ss:$20 sps:$4 sm:$0xff]   ;;  %v5086_v27 = vld [vmem:[#allocation5 + $0x4] ss:$20 sps:$4 sm:$0xff]   ;;  %v5085_v28 = vld [vmem:[#allocation5 + $0x2a8] ss:$20 sps:$4 sm:$0xff]  }
  0x33   :  { %3865 = vmatpush1.bf16.msra.mxu0 %v5058_v9  ;;  %v5089_v29 = vld [vmem:[#allocation5 + $0x284] ss:$20 sps:$4 sm:$0xff]   ;;  %v5088_v30 = vld [vmem:[#allocation5] ss:$20 sps:$4 sm:$0xff]   ;;  %v5092_v31 = vld [vmem:[#allocation5 + $0x25c] ss:$20 sps:$4 sm:$0xff]  }
  0x34   :  { %3866 = vmatprep.subr.bf16.mxu0 %v5062_v11  ;;  %3906 = vmatpush1.bf16.msra.mxu1 %v5061_v12  ;;  %v5091_v32 = vld [vmem:[#allocation5 + $0x280] ss:$20 sps:$4 sm:$0xff]   ;;  %v5095_v33 = vld [vmem:[#allocation5 + $0x4dc] ss:$20 sps:$4 sm:$0xff]   ;;  %v5094_v34 = vld [vmem:[#allocation5 + $0x258] ss:$20 sps:$4 sm:$0xff]  }
  0x35   :  { %3907 = vmatprep.subr.bf16.mxu1 %v5065_v13  ;;  %v5098_v35 = vld [vmem:[#allocation5 + $0x234] ss:$20 sps:$4 sm:$0xff]   ;;  %v5097_v36 = vld [vmem:[#allocation5 + $0x4d8] ss:$20 sps:$4 sm:$0xff]   ;;  %v5100_v38 = vld [vmem:[#allocation5 + $0x230] ss:$20 sps:$4 sm:$0xff]  }
  0x36   :  { %v5101_v37 = vld [vmem:[#allocation5 + $0x4b4] ss:$20 sps:$4 sm:$0xff]   ;;  %v5104_v39 = vld [vmem:[#allocation5 + $0x20c] ss:$20 sps:$4 sm:$0xff]   ;;  %v5103_v40 = vld [vmem:[#allocation5 + $0x4b0] ss:$20 sps:$4 sm:$0xff]  }
  0x37   :  { %3867 = vmatpush1.bf16.msra.mxu0 %v5064_v14  ;;  %v5107_v41 = vld [vmem:[#allocation5 + $0x48c] ss:$20 sps:$4 sm:$0xff]   ;;  %v5106_v42 = vld [vmem:[#allocation5 + $0x208] ss:$20 sps:$4 sm:$0xff]   ;;  %v5110_v44 = vld [vmem:[#allocation5 + $0x1e4] ss:$20 sps:$4 sm:$0xff]  }
  0x38   :  { %3868 = vmatprep.subr.bf16.mxu0 %v5068_v15  ;;  %3908 = vmatpush1.bf16.msra.mxu1 %v5067_v16  ;;  %v5109_v43 = vld [vmem:[#allocation5 + $0x488] ss:$20 sps:$4 sm:$0xff]   ;;  %v5112_v45 = vld [vmem:[#allocation5 + $0x1e0] ss:$20 sps:$4 sm:$0xff]   ;;  %v5113_v46 = vld [vmem:[#allocation5 + $0x464] ss:$20 sps:$4 sm:$0xff]  }
  0x39   :  { %3909 = vmatprep.subr.bf16.mxu1 %v5071_v17  ;;  %v5116_v47 = vld [vmem:[#allocation5 + $0x1bc] ss:$20 sps:$4 sm:$0xff]   ;;  %v5747_v48 = vld [vmem:[#allocation2] sm:$0xff]  ;;  %v5749_v49 = vld [vmem:[#allocation2 + $0x28] sm:$0xff]  ;;  %vm1683_vm0 = vcmask 1041409   ;;  %vm1685_vm1 = vcmask 1042434  }
  0x3a   :  { %v5115_v50 = vld [vmem:[#allocation5 + $0x460] ss:$20 sps:$4 sm:$0xff]   ;;  %v5753_v52 = vld [vmem:[#allocation2 + $0x78] sm:$0xff]  ;;  %v136_v54 = vunpack.c.h.bf16 %v5747_v48  ;;  %v146_v55 = vunpack.c.h.bf16 %v5749_v49  ;;  %v135_v56 = vunpack.c.l.bf16 %v5747_v48  ;;  %v145_v57 = vunpack.c.l.bf16 %v5749_v49  ;;  %v5761_v59 = vld [vmem:[#allocation2 + $0xc8] sm:$0xff]  ;;  %s5717_s0 = smov [#allocation8]  }
  0x3b   :  { %3869 = vmatpush1.bf16.msra.mxu0 %v5070_v18  ;;  %v5751_v51 = vld [vmem:[#allocation2 + $0x50] sm:$0xff]  ;;  %v5755_v53 = vld [vmem:[#allocation2 + $0xa0] sm:$0xff]  ;;  %v5765_v61 = vld [vmem:[#allocation2 + $0x118] sm:$0xff]  ;;  %v166_v63 = vunpack.c.h.bf16 %v5753_v52  ;;  %v186_v5 = vunpack.c.h.bf16 %v5761_v59  ;;  %vm1687_vm2 = vcmask 1043459   ;;  %vm1689_vm3 = vcmask 1044484   ;;  %s4511_s2 = sshll.u32 %s5717_s0, 4  ;;  %s4512_s2 = int_to_ptr.vmem [resolvable:$true] %s4511_s2 }
  0x3c   :  { %3870 = vmatprep.subr.bf16.mxu0 %v5074_v19  ;;  %3910 = vmatpush1.bf16.msra.mxu1 %v5073_v20  ;;  %v5119_v58 = vld [vmem:[#allocation5 + $0x43c] ss:$20 sps:$4 sm:$0xff]   ;;  %v156_v62 = vunpack.c.h.bf16 %v5751_v51  ;;  %v176_v0 = vunpack.c.h.bf16 %v5755_v53  ;;  %v155_v1 = vunpack.c.l.bf16 %v5751_v51  ;;  %v5771_v2 = vld [vmem:[#allocation2 + $0x140] sm:$0xff]  ;;  %v5773_v3 = vld [vmem:[#allocation2 + $0x168] sm:$0xff]  ;;  %v206_v7 = vunpack.c.h.bf16 %v5765_v61  ;;  %s5684_s4 = scalar_lea.vmem %s4512_s2, 640  ;;  %p5689_p2 = scmp.lt.s32.totalorder %s4512_s2, %s4512_s2 }
  0x3d   :  { %3911 = vmatprep.subr.bf16.mxu1 %v5077_v21  ;;  %v5763_v60 = vld [vmem:[#allocation2 + $0xf0] sm:$0xff]  ;;  %v302_v8 = vadd.f32 %v146_v55, %v136_v54  ;;  %v5780_v9 = vld [vmem:[#allocation2 + $0x1b8] sm:$0xff]  ;;  %v5782_v10 = vld [vmem:[#allocation2 + $0x1e0] sm:$0xff]  ;;  %v216_v12 = vunpack.c.h.bf16 %v5771_v2  ;;  %v226_v13 = vunpack.c.h.bf16 %v5773_v3  ;;  %vm1691_vm4 = vcmask 1045509   ;;  %p5685_p1 = scmp.ne.s32.totalorder %s4512_s2, %s5684_s4  ;;  %p5690_p3 = scmp.lt.s32.totalorder %s5684_s4, %s5684_s4 }
  0x3e   :  { %v5775_v4 = vld [vmem:[#allocation2 + $0x190] sm:$0xff]  ;;  %v196_v6 = vunpack.c.h.bf16 %v5763_v60  ;;  %v5784_v11 = vld [vmem:[#allocation2 + $0x208] sm:$0xff]  ;;  %v372_v15 = vadd.f32 %v166_v63, %v156_v62  ;;  %v5791_v18 = vld [vmem:[#allocation2 + $0x258] sm:$0xff]  ;;  %v246_v19 = vunpack.c.h.bf16 %v5780_v9  ;;  %v256_v20 = vunpack.c.h.bf16 %v5782_v10 }
  0x3f   :  { %3871 = vmatpush1.bf16.msra.mxu0 %v5076_v22  ;;  %v236_v14 = vunpack.c.h.bf16 %v5775_v4  ;;  %v5118_v16 = vld [vmem:[#allocation5 + $0x1b8] ss:$20 sps:$4 sm:$0xff]   ;;  %v5789_v17 = vld [vmem:[#allocation2 + $0x230] sm:$0xff]  ;;  %v266_v21 = vunpack.c.h.bf16 %v5784_v11  ;;  %v303_v22 = vrot.slane %v302_v8, 4  ;;  %v5130_v63 = vld [vmem:[#allocation5 + $0x168] ss:$20 sps:$4 sm:$0xff]   ;;  %p5691_p4 = por %p5690_p3, %p5689_p2 }
  0x40   :  { %3872 = vmatprep.subr.bf16.mxu0 %v5080_v23  ;;  %3912 = vmatpush1.bf16.msra.mxu1 %v5079_v24  ;;  %v5122_v23 = vld [vmem:[#allocation5 + $0x194] ss:$20 sps:$4 sm:$0xff]   ;;  %v276_v24 = vunpack.c.h.bf16 %v5789_v17  ;;  %vm1693_vm5 = vcmask 1046534   ;;  %vm1695_vm6 = vcmask 1047559  }
  0x41   :  { %3913 = vmatprep.subr.bf16.mxu1 %v5083_v25  ;;  %v286_v25 = vunpack.c.h.bf16 %v5791_v18  ;;  %p5692_p5 = pnand %p5691_p4, %p5685_p1 }
  0x43   :  { %3873 = vmatpush1.bf16.msra.mxu0 %v5082_v26  ;;  %v373_v26 = vrot.slane %v372_v15, 4 }
  0x44   :  { %3874 = vmatprep.subr.bf16.mxu0 %v5086_v27  ;;  %3914 = vmatpush1.bf16.msra.mxu1 %v5085_v28  ;;  %v442_v27 = vadd.f32 %v186_v5, %v176_v0  ;;  %v5121_v28 = vld [vmem:[#allocation5 + $0x438] ss:$20 sps:$4 sm:$0xff]  }
  0x45   :  { %3915 = vmatprep.subr.bf16.mxu1 %v5089_v29  ;;  %v304_v29 = vadd.f32 %v303_v22, %v302_v8  ;;  %v5131_v0 = vld [vmem:[#allocation5 + $0x3ec] ss:$20 sps:$4 sm:$0xff]  }
  0x47   :  { %3875 = vmatpush1.bf16.msra.mxu0 %v5088_v30  ;;  %v512_v30 = vadd.f32 %v206_v7, %v196_v6 }
  0x48   :  { %3876 = vmatprep.subr.bf16.mxu0 %v5092_v31  ;;  %3916 = vmatpush1.bf16.msra.mxu1 %v5091_v32  ;;  %v582_v31 = vadd.f32 %v226_v13, %v216_v12  ;;  %v652_v32 = vadd.f32 %v246_v19, %v236_v14 }
  0x49   :  { %3917 = vmatprep.subr.bf16.mxu1 %v5095_v33  ;;  %v5125_v33 = vld [vmem:[#allocation5 + $0x414] ss:$20 sps:$4 sm:$0xff]  }
  0x4b   :  { %3877 = vmatpush2.bf16.msra.mxu0 %v5094_v34  ;;  %v374_v34 = vadd.f32 %v373_v26, %v372_v15 }
  0x4c   :  { %3878 = vmatprep.subr.bf16.mxu0 %v5098_v35  ;;  %3918 = vmatpush2.bf16.msra.mxu1 %v5097_v36  ;;  %v443_v35 = vrot.slane %v442_v27, 4  ;;  %v722_v36 = vadd.f32 %v266_v21, %v256_v20 }
  0x4d   :  { %3919 = vmatprep.subr.bf16.mxu1 %v5101_v37  ;;  %v792_v37 = vadd.f32 %v286_v25, %v276_v24 }
  0x4f   :  { %3879 = vmatpush2.bf16.msra.mxu0 %v5100_v38  ;;  %v5124_v38 = vld [vmem:[#allocation5 + $0x190] ss:$20 sps:$4 sm:$0xff]  }
  0x50   :  { %3880 = vmatprep.subr.bf16.mxu0 %v5104_v39  ;;  %3920 = vmatpush2.bf16.msra.mxu1 %v5103_v40  ;;  %v305_v39 = vrot.slane %v304_v29, 2  ;;  %v513_v40 = vrot.slane %v512_v30, 4 }
  0x51   :  { %3921 = vmatprep.subr.bf16.mxu1 %v5107_v41  ;;  %v583_v41 = vrot.slane %v582_v31, 4 }
  0x52   :  { %v306_v54 = vadd.f32 %v305_v39, %v304_v29  ;;  %v514_v55 = vadd.f32 %v513_v40, %v512_v30 }
  0x53   :  { %3881 = vmatpush2.bf16.msra.mxu0 %v5106_v42  ;;  %v653_v42 = vrot.slane %v652_v32, 4 }
  0x54   :  { %3882 = vmatprep.subr.bf16.mxu0 %v5110_v44  ;;  %3922 = vmatpush2.bf16.msra.mxu1 %v5109_v43  ;;  %v5128_v43 = vld [vmem:[#allocation5 + $0x16c] ss:$20 sps:$4 sm:$0xff]   ;;  %v375_v44 = vrot.slane %v374_v34, 2  ;;  %v307_v12 = vrot.slane %v306_v54, 1  ;;  %v515_v13 = vrot.slane %v514_v55, 2 }
  0x55   :  { %3923 = vmatprep.subr.bf16.mxu1 %v5113_v46  ;;  %v723_v46 = vrot.slane %v722_v36, 4  ;;  %v654_v62 = vadd.f32 %v653_v42, %v652_v32  ;;  %v5142_v42 = vld [vmem:[#allocation5 + $0x61c] ss:$20 sps:$4 sm:$0xff]  }
  0x56   :  { %v376_v5 = vadd.f32 %v375_v44, %v374_v34  ;;  %v308_v24 = vadd.f32 %v307_v12, %v306_v54  ;;  %v516_v25 = vadd.f32 %v515_v13, %v514_v55 }
  0x57   :  { %3883 = vmatpush2.bf16.msra.mxu0 %v5112_v45  ;;  %v444_v45 = vadd.f32 %v443_v35, %v442_v27  ;;  %v724_v7 = vadd.f32 %v723_v46, %v722_v36  ;;  %v655_v15 = vrot.slane %v654_v62, 2 }
  0x58   :  { %3884 = vmatprep.subr.bf16.mxu0 %v5116_v47  ;;  %3924 = vmatpush2.bf16.msra.mxu1 %v5115_v50  ;;  %v793_v47 = vrot.slane %v792_v37, 4  ;;  %v5127_v50 = vld [vmem:[#allocation5 + $0x410] ss:$20 sps:$4 sm:$0xff]   ;;  %v377_v19 = vrot.slane %v376_v5, 1  ;;  %v517_v34 = vrot.slane %v516_v25, 1 }
  0x59   :  { %3925 = vmatprep.subr.bf16.mxu1 %v5119_v58  ;;  %v584_v58 = vadd.f32 %v583_v41, %v582_v31  ;;  %v445_v6 = vrot.slane %v444_v45, 2  ;;  %v725_v21 = vrot.slane %v724_v7, 2  ;;  %v656_v27 = vadd.f32 %v655_v15, %v654_v62  ;;  %v5145_v62 = vld [vmem:[#allocation5 + $0x89c] ss:$20 sps:$4 sm:$0xff]  }
  0x5a   :  { %v794_v8 = vadd.f32 %v793_v47, %v792_v37  ;;  %v378_v29 = vadd.f32 %v377_v19, %v376_v5  ;;  %v857_v37 = vmul.f32 0.0625, %v308_v24  ;;  %v5139_v47 = vld [vmem:[#allocation5 + $0x3c0] ss:$20 sps:$4 sm:$0xff]   ;;  %v165_v19 = vunpack.c.l.bf16 %v5753_v52 }
  0x5b   :  { %3885 = vmatpush2.bf16.msra.mxu0 %v5118_v16  ;;  %v585_v14 = vrot.slane %v584_v58, 2  ;;  %v5134_v16 = vld [vmem:[#allocation5 + $0x144] ss:$20 sps:$4 sm:$0xff]   ;;  %v446_v20 = vadd.f32 %v445_v6, %v444_v45  ;;  %v726_v31 = vadd.f32 %v725_v21, %v724_v7  ;;  %v657_v36 = vrot.slane %v656_v27, 1 }
  0x5c   :  { %3886 = vmatprep.subr.bf16.mxu0 %v5122_v23  ;;  %3926 = vmatpush2.bf16.msra.mxu1 %v5121_v28  ;;  %v795_v22 = vrot.slane %v794_v8, 2  ;;  %v5133_v23 = vld [vmem:[#allocation5 + $0x3e8] ss:$20 sps:$4 sm:$0xff]   ;;  %v5137_v28 = vld [vmem:[#allocation5 + $0x3c4] ss:$20 sps:$4 sm:$0xff]   ;;  %v867_v41 = vmul.f32 0.0625, %v378_v29  ;;  %v937_v46 = vpack.c.bf16 %v857_v37, %v857_v37  ;;  %v195_v52 = vunpack.c.l.bf16 %v5763_v60 }
  0x5d   :  { %3927 = vmatprep.subr.bf16.mxu1 %v5125_v33  ;;  %v586_v26 = vadd.f32 %v585_v14, %v584_v58  ;;  %v447_v30 = vrot.slane %v446_v20, 1  ;;  %v5136_v33 = vld [vmem:[#allocation5 + $0x140] ss:$20 sps:$4 sm:$0xff]   ;;  %v727_v39 = vrot.slane %v726_v31, 1  ;;  %v658_v45 = vadd.f32 %v657_v36, %v656_v27 }
  0x5e   :  { %v796_v32 = vadd.f32 %v795_v22, %v794_v8  ;;  %v947_v58 = vpack.c.bf16 %v867_v41, %v867_v41  ;;  %v1604_v6 = vunpack.c.l.b16 %v937_v46  ;;  %v175_v27 = vunpack.c.l.bf16 %v5755_v53 }
  0x5f   :  { %3887 = vmatpush2.bf16.msra.mxu0 %v5124_v38  ;;  %v587_v35 = vrot.slane %v586_v26, 1  ;;  %v448_v38 = vadd.f32 %v447_v30, %v446_v20  ;;  %v907_v5 = vmul.f32 0.0625, %v658_v45  ;;  %v225_v36 = vunpack.c.l.bf16 %v5773_v3 }
  0x60   :  { %3888 = vmatprep.subr.bf16.mxu0 %v5128_v43  ;;  %3928 = vmatpush2.bf16.msra.mxu1 %v5127_v50  ;;  %v797_v40 = vrot.slane %v796_v32, 1  ;;  %v518_v43 = vadd.f32 %v517_v34, %v516_v25  ;;  %v728_v50 = vadd.f32 %v727_v39, %v726_v31  ;;  %v1614_v13 = vunpack.c.l.b16 %v947_v58 }
  0x61   :  { %3929 = vmatprep.subr.bf16.mxu1 %v5131_v0  ;;  %v588_v44 = vadd.f32 %v587_v35, %v586_v26  ;;  %v877_v55 = vmul.f32 0.0625, %v448_v38  ;;  %v185_v31 = vunpack.c.l.bf16 %v5761_v59  ;;  %v215_v34 = vunpack.c.l.bf16 %v5771_v2 }
  0x62   :  { %v798_v54 = vadd.f32 %v797_v40, %v796_v32  ;;  %v917_v7 = vmul.f32 0.0625, %v728_v50  ;;  %v235_v53 = vunpack.c.l.bf16 %v5775_v4  ;;  %v245_v37 = vunpack.c.l.bf16 %v5780_v9 }
  0x63   :  { %3889 = vmatpush2.bf16.msra.mxu0 %v5130_v63  ;;  %v887_v63 = vmul.f32 0.0625, %v518_v43  ;;  %v897_v0 = vmul.f32 0.0625, %v588_v44  ;;  %v957_v12 = vpack.c.bf16 %v877_v55, %v877_v55  ;;  %v255_v59 = vunpack.c.l.bf16 %v5782_v10 }
  0x64   :  { %3890 = vmatprep.subr.bf16.mxu0 %v5134_v16  ;;  %3930 = vmatpush2.bf16.msra.mxu1 %v5133_v23  ;;  %v927_v8 = vmul.f32 0.0625, %v798_v54  ;;  %v987_v16 = vpack.c.bf16 %v907_v5, %v907_v5  ;;  %v997_v20 = vpack.c.bf16 %v917_v7, %v917_v7  ;;  %v1697_v23 = vsel %vm1683_vm0, %v1614_v13, %v1604_v6 }
  0x65   :  { %3931 = vmatprep.subr.bf16.mxu1 %v5137_v28  ;;  %v967_v14 = vpack.c.bf16 %v887_v63, %v887_v63  ;;  %v977_v15 = vpack.c.bf16 %v897_v0, %v897_v0  ;;  %v1624_v22 = vunpack.c.l.b16 %v957_v12  ;;  %v265_v39 = vunpack.c.l.bf16 %v5784_v11 }
  0x66   :  { %v1007_v21 = vpack.c.bf16 %v927_v8, %v927_v8  ;;  %v1654_v26 = vunpack.c.l.b16 %v987_v16  ;;  %v1664_v28 = vunpack.c.l.b16 %v997_v20  ;;  %v275_v60 = vunpack.c.l.bf16 %v5789_v17 }
  0x67   :  { %3891 = vmatpush2.bf16.msra.mxu0 %v5136_v33  ;;  %v1634_v24 = vunpack.c.l.b16 %v967_v14  ;;  %v1644_v25 = vunpack.c.l.b16 %v977_v15  ;;  %v1698_v30 = vsel %vm1685_vm1, %v1624_v22, %v1697_v23  ;;  %v205_v33 = vunpack.c.l.bf16 %v5765_v61 }
  0x68   :  { %3942 = vmatprep.subr.bf16.mxu0 %v5142_v42  ;;  %3932 = vmatpush2.bf16.msra.mxu1 %v5139_v47  ;;  %v1674_v29 = vunpack.c.l.b16 %v1007_v21  ;;  %v285_v2 = vunpack.c.l.bf16 %v5791_v18  ;;  %v295_v3 = vadd.f32 %v145_v57, %v135_v56  ;;  %v365_v4 = vadd.f32 %v165_v19, %v155_v1 }
  0x69   :  { %3983 = vmatprep.subr.bf16.mxu1 %v5145_v62  ;;  %v1699_v32 = vsel %vm1687_vm2, %v1634_v24, %v1698_v30  ;;  %v435_v40 = vadd.f32 %v185_v31, %v175_v27  ;;  %v505_v10 = vadd.f32 %v205_v33, %v195_v52  ;;  %v575_v41 = vadd.f32 %v225_v36, %v215_v34 }
  0x6a   :  { %v1700_v35 = vsel %vm1689_vm3, %v1644_v25, %v1699_v32  ;;  %v296_v17 = vrot.slane %v295_v3, 4  ;;  %v366_v42 = vrot.slane %v365_v4, 4  ;;  %v645_v43 = vadd.f32 %v245_v37, %v235_v53 }
  0x6b   :  { %v1701_v38 = vsel %vm1691_vm4, %v1654_v26, %v1700_v35  ;;  %v436_v44 = vrot.slane %v435_v40, 4  ;;  %v506_v18 = vrot.slane %v505_v10, 4  ;;  %v576_v45 = vrot.slane %v575_v41, 4 }
  0x6c   :  { %v1702_v61 = vsel %vm1693_vm5, %v1664_v28, %v1701_v38  ;;  %v715_v48 = vadd.f32 %v265_v39, %v255_v59  ;;  %v297_v49 = vadd.f32 %v296_v17, %v295_v3  ;;  %v367_v56 = vadd.f32 %v366_v42, %v365_v4 }
  0x6d   :  { %v1703_v9 = vsel %vm1695_vm6, %v1674_v29, %v1702_v61  ;;  %v646_v51 = vrot.slane %v645_v43, 4  ;;  %v785_v57 = vadd.f32 %v285_v2, %v275_v60  ;;  %v437_v1 = vadd.f32 %v436_v44, %v435_v40  ;;  %v5827_v61 = vld [vmem:[#allocation2 + $0x8] sm:$0xff]  ;;  %v5829_v40 = vld [vmem:[#allocation2 + $0x30] sm:$0xff]  ;;  %v5833_v44 = vld [vmem:[#allocation2 + $0x80] sm:$0xff] }
  0x6e   :  { %v5824_v11 = vpack.c.b16 %v1703_v9, %v1703_v9  ;;  %v507_v46 = vadd.f32 %v506_v18, %v505_v10  ;;  %v577_v47 = vadd.f32 %v576_v45, %v575_v41  ;;  %v716_v50 = vrot.slane %v715_v48, 4  ;;  %v5831_v10 = vld [vmem:[#allocation2 + $0x58] sm:$0xff]  ;;  %v5835_v18 = vld [vmem:[#allocation2 + $0xa8] sm:$0xff] }
  0x6f   :  { %v298_v54 = vrot.slane %v297_v49, 2  ;;  %v368_v55 = vrot.slane %v367_v56, 2  ;;  %v647_v58 = vadd.f32 %v646_v51, %v645_v43  ;;  %v786_v62 = vrot.slane %v785_v57, 4  ;;  %v5837_v51 = vld [vmem:[#allocation2 + $0xd0] sm:$0xff] }
  0x70   :  { %3892 = vmatprep.mubr.bf16.mxu0 %v5824_v11  ;;  %v438_v63 = vrot.slane %v437_v1, 2  ;;  %v508_v0 = vrot.slane %v507_v46, 2  ;;  %v578_v5 = vrot.slane %v577_v47, 2  ;;  %v717_v6 = vadd.f32 %v716_v50, %v715_v48 }
  0x71   :  { %v299_v7 = vadd.f32 %v298_v54, %v297_v49  ;;  %v369_v8 = vadd.f32 %v368_v55, %v367_v56  ;;  %v648_v12 = vrot.slane %v647_v58, 2  ;;  %v787_v13 = vadd.f32 %v786_v62, %v785_v57  ;;  %v5839_v57 = vld [vmem:[#allocation2 + $0xf8] sm:$0xff]  ;;  %v5843_v55 = vld [vmem:[#allocation2 + $0x148] sm:$0xff] }
  0x72   :  { %v439_v14 = vadd.f32 %v438_v63, %v437_v1  ;;  %v509_v15 = vadd.f32 %v508_v0, %v507_v46  ;;  %v579_v16 = vadd.f32 %v578_v5, %v577_v47  ;;  %v718_v19 = vrot.slane %v717_v6, 2  ;;  %v5841_v1 = vld [vmem:[#allocation2 + $0x120] sm:$0xff]  ;;  %v5848_v5 = vld [vmem:[#allocation2 + $0x198] sm:$0xff] }
  0x73   :  { %v300_v20 = vrot.slane %v299_v7, 1  ;;  %v370_v21 = vrot.slane %v369_v8, 1  ;;  %v649_v22 = vadd.f32 %v648_v12, %v647_v58  ;;  %v788_v23 = vrot.slane %v787_v13, 2  ;;  %v5845_v58 = vld [vmem:[#allocation2 + $0x170] sm:$0xff]  ;;  %v5852_v12 = vld [vmem:[#allocation2 + $0x1c0] sm:$0xff] }
  0x74   :  { %v440_v24 = vrot.slane %v439_v14, 1  ;;  %v510_v25 = vrot.slane %v509_v15, 1  ;;  %v580_v26 = vrot.slane %v579_v16, 1  ;;  %v719_v27 = vadd.f32 %v718_v19, %v717_v6 }
  0x75   :  { %v301_v28 = vadd.f32 %v300_v20, %v299_v7  ;;  %v371_v29 = vadd.f32 %v370_v21, %v369_v8  ;;  %v650_v30 = vrot.slane %v649_v22, 1  ;;  %v789_v31 = vadd.f32 %v788_v23, %v787_v13  ;;  %v5854_v13 = vld [vmem:[#allocation2 + $0x1e8] sm:$0xff]  ;;  %v5859_v20 = vld [vmem:[#allocation2 + $0x210] sm:$0xff]  ;;  %v5861_v21 = vld [vmem:[#allocation2 + $0x238] sm:$0xff] }
  0x76   :  { %v441_v32 = vadd.f32 %v440_v24, %v439_v14  ;;  %v511_v52 = vadd.f32 %v510_v25, %v509_v15  ;;  %v581_v33 = vadd.f32 %v580_v26, %v579_v16  ;;  %v720_v34 = vrot.slane %v719_v27, 1  ;;  %v5866_v25 = vld [vmem:[#allocation2 + $0x260] sm:$0xff] }
  0x77   :  { %v651_v35 = vadd.f32 %v650_v30, %v649_v22  ;;  %v790_v36 = vrot.slane %v789_v31, 1  ;;  %v856_v53 = vmul.f32 0.0625, %v301_v28  ;;  %v866_v37 = vmul.f32 0.0625, %v371_v29 }
  0x78   :  { %v721_v38 = vadd.f32 %v720_v34, %v719_v27  ;;  %v876_v59 = vmul.f32 0.0625, %v441_v32  ;;  %v886_v39 = vmul.f32 0.0625, %v511_v52  ;;  %v896_v60 = vmul.f32 0.0625, %v581_v33 }
  0x79   :  { %v791_v2 = vadd.f32 %v790_v36, %v789_v31  ;;  %v906_v3 = vmul.f32 0.0625, %v651_v35  ;;  %v936_v4 = vpack.c.bf16 %v856_v53, %v856_v53  ;;  %v946_v9 = vpack.c.bf16 %v866_v37, %v866_v37  ;;  %v5140_v53 = vld [vmem:[#allocation5 + $0x618] ss:$20 sps:$4 sm:$0xff]  }
  0x7a   :  { %v916_v41 = vmul.f32 0.0625, %v721_v38  ;;  %v956_v17 = vpack.c.bf16 %v876_v59, %v876_v59  ;;  %v966_v42 = vpack.c.bf16 %v886_v39, %v886_v39  ;;  %v976_v43 = vpack.c.bf16 %v896_v60, %v896_v60 }
  0x7b   :  { %v926_v45 = vmul.f32 0.0625, %v791_v2  ;;  %v986_v48 = vpack.c.bf16 %v906_v3, %v906_v3  ;;  %v1603_v49 = vunpack.c.l.b16 %v936_v4  ;;  %v1613_v56 = vunpack.c.l.b16 %v946_v9  ;;  %v5148_v4 = vld [vmem:[#allocation5 + $0x5f4] ss:$20 sps:$4 sm:$0xff]  }
  0x7c   :  { %v996_v46 = vpack.c.bf16 %v916_v41, %v916_v41  ;;  %v1623_v47 = vunpack.c.l.b16 %v956_v17  ;;  %v1633_v50 = vunpack.c.l.b16 %v966_v42  ;;  %v1643_v54 = vunpack.c.l.b16 %v976_v43 }
  0x7d   :  { %v1006_v62 = vpack.c.bf16 %v926_v45, %v926_v45  ;;  %v1653_v63 = vunpack.c.l.b16 %v986_v48  ;;  %v1684_v0 = vsel %vm1683_vm0, %v1613_v56, %v1603_v49  ;;  %v138_v6 = vunpack.c.h.bf16 %v5827_v61 }
  0x7e   :  { %v1663_v7 = vunpack.c.l.b16 %v996_v46  ;;  %v1686_v8 = vsel %vm1685_vm1, %v1623_v47, %v1684_v0  ;;  %v148_v14 = vunpack.c.h.bf16 %v5829_v40  ;;  %v158_v15 = vunpack.c.h.bf16 %v5831_v10 }
  0x7f   :  { %v1673_v16 = vunpack.c.l.b16 %v1006_v62  ;;  %v1688_v19 = vsel %vm1687_vm2, %v1633_v50, %v1686_v8  ;;  %v168_v22 = vunpack.c.h.bf16 %v5833_v44  ;;  %v178_v23 = vunpack.c.h.bf16 %v5835_v18 }
  0x80   :  { %v1690_v24 = vsel %vm1689_vm3, %v1643_v54, %v1688_v19  ;;  %v188_v26 = vunpack.c.h.bf16 %v5837_v51  ;;  %v198_v27 = vunpack.c.h.bf16 %v5839_v57  ;;  %v208_v28 = vunpack.c.h.bf16 %v5841_v1  ;;  %v5146_v54 = vld [vmem:[#allocation5 + $0x5f0] ss:$20 sps:$4 sm:$0xff]  }
  0x81   :  { %v1692_v29 = vsel %vm1691_vm4, %v1653_v63, %v1690_v24  ;;  %v218_v30 = vunpack.c.h.bf16 %v5843_v55  ;;  %v228_v31 = vunpack.c.h.bf16 %v5845_v58  ;;  %v238_v32 = vunpack.c.h.bf16 %v5848_v5 }
  0x82   :  { %v1694_v52 = vsel %vm1693_vm5, %v1663_v7, %v1692_v29  ;;  %v248_v33 = vunpack.c.h.bf16 %v5852_v12  ;;  %v258_v34 = vunpack.c.h.bf16 %v5854_v13  ;;  %v268_v35 = vunpack.c.h.bf16 %v5859_v20  ;;  %v5154_v7 = vld [vmem:[#allocation5 + $0x5cc] ss:$20 sps:$4 sm:$0xff]  }
  0x83   :  { %v1696_v36 = vsel %vm1695_vm6, %v1673_v16, %v1694_v52  ;;  %v278_v37 = vunpack.c.h.bf16 %v5861_v21  ;;  %v288_v38 = vunpack.c.h.bf16 %v5866_v25  ;;  %v316_v59 = vadd.f32 %v148_v14, %v138_v6 }
  0x84   :  { %v5882_v39 = vpack.c.b16 %v1696_v36, %v1696_v36  ;;  %v386_v60 = vadd.f32 %v168_v22, %v158_v15  ;;  %v456_v2 = vadd.f32 %v188_v26, %v178_v23  ;;  %v526_v3 = vadd.f32 %v208_v28, %v198_v27 }
  0x85   :  { %v317_v9 = vrot.slane %v316_v59, 4  ;;  %v596_v41 = vadd.f32 %v228_v31, %v218_v30  ;;  %v666_v17 = vadd.f32 %v248_v33, %v238_v32  ;;  %v736_v42 = vadd.f32 %v268_v35, %v258_v34  ;;  %v5152_v30 = vld [vmem:[#allocation5 + $0x5c8] ss:$20 sps:$4 sm:$0xff]   ;;  %v5160_v34 = vld [vmem:[#allocation5 + $0x5a4] ss:$20 sps:$4 sm:$0xff]  }
  0x86   :  { %3893 = vmatmul.mubr.bf16.vlgmr.msra.gmra.mxu0 %v5882_v39  ;;  %v387_v43 = vrot.slane %v386_v60, 4  ;;  %v457_v45 = vrot.slane %v456_v2, 4  ;;  %v527_v48 = vrot.slane %v526_v3, 4  ;;  %v806_v49 = vadd.f32 %v288_v38, %v278_v37 }
  0x87   :  { %v318_v56 = vadd.f32 %v317_v9, %v316_v59  ;;  %v597_v46 = vrot.slane %v596_v41, 4  ;;  %v667_v47 = vrot.slane %v666_v17, 4  ;;  %v737_v50 = vrot.slane %v736_v42, 4  ;;  %3943 = vmatpush1.bf16.msra.mxu0 %v5140_v53 }
  0x88   :  { %v388_v62 = vadd.f32 %v387_v43, %v386_v60  ;;  %v458_v63 = vadd.f32 %v457_v45, %v456_v2  ;;  %v528_v0 = vadd.f32 %v527_v48, %v526_v3  ;;  %v807_v6 = vrot.slane %v806_v49, 4  ;;  %3944 = vmatprep.subr.bf16.mxu0 %v5148_v4 }
  0x89   :  { %v319_v8 = vrot.slane %v318_v56, 2  ;;  %v598_v14 = vadd.f32 %v597_v46, %v596_v41  ;;  %v668_v15 = vadd.f32 %v667_v47, %v666_v17  ;;  %v738_v16 = vadd.f32 %v737_v50, %v736_v42  ;;  %v5158_v17 = vld [vmem:[#allocation5 + $0x5a0] ss:$20 sps:$4 sm:$0xff]  }
  0x8a   :  { %v389_v19 = vrot.slane %v388_v62, 2  ;;  %v459_v22 = vrot.slane %v458_v63, 2  ;;  %v529_v23 = vrot.slane %v528_v0, 2  ;;  %v808_v24 = vadd.f32 %v807_v6, %v806_v49  ;;  %v5166_v49 = vld [vmem:[#allocation5 + $0x57c] ss:$20 sps:$4 sm:$0xff]  }
  0x8b   :  { %v320_v26 = vadd.f32 %v319_v8, %v318_v56  ;;  %v599_v27 = vrot.slane %v598_v14, 2  ;;  %v669_v28 = vrot.slane %v668_v15, 2  ;;  %v739_v29 = vrot.slane %v738_v16, 2  ;;  %3945 = vmatpush1.bf16.msra.mxu0 %v5146_v54  ;;  %v5164_v54 = vld [vmem:[#allocation5 + $0x578] ss:$20 sps:$4 sm:$0xff]  }
  0x8c   :  { %v390_v31 = vadd.f32 %v389_v19, %v388_v62  ;;  %v460_v32 = vadd.f32 %v459_v22, %v458_v63  ;;  %v530_v52 = vadd.f32 %v529_v23, %v528_v0  ;;  %v809_v33 = vrot.slane %v808_v24, 2  ;;  %3946 = vmatprep.subr.bf16.mxu0 %v5154_v7  ;;  %v5172_v7 = vld [vmem:[#allocation5 + $0x554] ss:$20 sps:$4 sm:$0xff]  }
  0x8d   :  { %v321_v35 = vrot.slane %v320_v26, 1  ;;  %v600_v36 = vadd.f32 %v599_v27, %v598_v14  ;;  %v670_v53 = vadd.f32 %v669_v28, %v668_v15  ;;  %v740_v37 = vadd.f32 %v739_v29, %v738_v16 }
  0x8e   :  { %v391_v38 = vrot.slane %v390_v31, 1  ;;  %v461_v59 = vrot.slane %v460_v32, 1  ;;  %v531_v60 = vrot.slane %v530_v52, 1  ;;  %v810_v2 = vadd.f32 %v809_v33, %v808_v24 }
  0x8f   :  { %v322_v3 = vadd.f32 %v321_v35, %v320_v26  ;;  %v601_v4 = vrot.slane %v600_v36, 1  ;;  %v671_v9 = vrot.slane %v670_v53, 1  ;;  %v741_v41 = vrot.slane %v740_v37, 1  ;;  %3947 = vmatpush1.bf16.msra.mxu0 %v5152_v30  ;;  %v5170_v30 = vld [vmem:[#allocation5 + $0x550] ss:$20 sps:$4 sm:$0xff]  }
  0x90   :  { %v392_v42 = vadd.f32 %v391_v38, %v390_v31  ;;  %v462_v43 = vadd.f32 %v461_v59, %v460_v32  ;;  %v532_v45 = vadd.f32 %v531_v60, %v530_v52  ;;  %v811_v48 = vrot.slane %v810_v2, 1  ;;  %3948 = vmatprep.subr.bf16.mxu0 %v5160_v34  ;;  %v5178_v34 = vld [vmem:[#allocation5 + $0x52c] ss:$20 sps:$4 sm:$0xff]  }
  0x91   :  { %v602_v56 = vadd.f32 %v601_v4, %v600_v36  ;;  %v672_v46 = vadd.f32 %v671_v9, %v670_v53  ;;  %v742_v47 = vadd.f32 %v741_v41, %v740_v37  ;;  %v859_v50 = vmul.f32 0.0625, %v322_v3 }
  0x92   :  { %v812_v62 = vadd.f32 %v811_v48, %v810_v2  ;;  %v869_v63 = vmul.f32 0.0625, %v392_v42  ;;  %v879_v0 = vmul.f32 0.0625, %v462_v43  ;;  %v889_v6 = vmul.f32 0.0625, %v532_v45  ;;  %v5184_v45 = vld [vmem:[#allocation5 + $0x504] ss:$20 sps:$4 sm:$0xff]  }
  0x93   :  { %v899_v8 = vmul.f32 0.0625, %v602_v56  ;;  %v909_v14 = vmul.f32 0.0625, %v672_v46  ;;  %v919_v15 = vmul.f32 0.0625, %v742_v47  ;;  %v939_v16 = vpack.c.bf16 %v859_v50, %v859_v50  ;;  %3949 = vmatpush1.bf16.msra.mxu0 %v5158_v17  ;;  %v5176_v17 = vld [vmem:[#allocation5 + $0x528] ss:$20 sps:$4 sm:$0xff]  }
  0x94   :  { %v929_v19 = vmul.f32 0.0625, %v812_v62  ;;  %v949_v22 = vpack.c.bf16 %v869_v63, %v869_v63  ;;  %v959_v23 = vpack.c.bf16 %v879_v0, %v879_v0  ;;  %v969_v24 = vpack.c.bf16 %v889_v6, %v889_v6  ;;  %3950 = vmatprep.subr.bf16.mxu0 %v5166_v49  ;;  %v5182_v47 = vld [vmem:[#allocation5 + $0x500] ss:$20 sps:$4 sm:$0xff]   ;;  %v5190_v62 = vld [vmem:[#allocation5 + $0x75c] ss:$20 sps:$4 sm:$0xff]  }
  0x95   :  { %v979_v26 = vpack.c.bf16 %v899_v8, %v899_v8  ;;  %v989_v27 = vpack.c.bf16 %v909_v14, %v909_v14  ;;  %v999_v28 = vpack.c.bf16 %v919_v15, %v919_v15  ;;  %v1606_v29 = vunpack.c.l.b16 %v939_v16 }
  0x96   :  { %v1009_v31 = vpack.c.bf16 %v929_v19, %v929_v19  ;;  %v1616_v32 = vunpack.c.l.b16 %v949_v22  ;;  %v1626_v52 = vunpack.c.l.b16 %v959_v23  ;;  %v1636_v33 = vunpack.c.l.b16 %v969_v24 }
  0x97   :  { %v1646_v35 = vunpack.c.l.b16 %v979_v26  ;;  %v1656_v36 = vunpack.c.l.b16 %v989_v27  ;;  %v1666_v53 = vunpack.c.l.b16 %v999_v28  ;;  %v137_v37 = vunpack.c.l.bf16 %v5827_v61  ;;  %3951 = vmatpush1.bf16.msra.mxu0 %v5164_v54 }
  0x98   :  { %v1676_v38 = vunpack.c.l.b16 %v1009_v31  ;;  %v1711_v59 = vsel %vm1683_vm0, %v1616_v32, %v1606_v29  ;;  %v147_v60 = vunpack.c.l.bf16 %v5829_v40  ;;  %v157_v2 = vunpack.c.l.bf16 %v5831_v10  ;;  %3952 = vmatprep.subr.bf16.mxu0 %v5172_v7 }
  0x99   :  { %v1712_v3 = vsel %vm1685_vm1, %v1626_v52, %v1711_v59  ;;  %v167_v4 = vunpack.c.l.bf16 %v5833_v44  ;;  %v177_v9 = vunpack.c.l.bf16 %v5835_v18  ;;  %v187_v41 = vunpack.c.l.bf16 %v5837_v51 }
  0x9a   :  { %v1713_v61 = vsel %vm1687_vm2, %v1636_v33, %v1712_v3  ;;  %v197_v42 = vunpack.c.l.bf16 %v5839_v57  ;;  %v207_v43 = vunpack.c.l.bf16 %v5841_v1  ;;  %v217_v40 = vunpack.c.l.bf16 %v5843_v55  ;;  %v5194_v3 = vld [vmem:[#allocation5 + $0x730] ss:$20 sps:$4 sm:$0xff]  }
  0x9b   :  { %v1714_v10 = vsel %vm1689_vm3, %v1646_v35, %v1713_v61  ;;  %v227_v48 = vunpack.c.l.bf16 %v5845_v58  ;;  %v237_v44 = vunpack.c.l.bf16 %v5848_v5  ;;  %v247_v18 = vunpack.c.l.bf16 %v5852_v12  ;;  %3953 = vmatpush1.bf16.msra.mxu0 %v5170_v30  ;;  %v5188_v30 = vld [vmem:[#allocation5 + $0x758] ss:$20 sps:$4 sm:$0xff]  }
  0x9c   :  { %v1715_v51 = vsel %vm1691_vm4, %v1656_v36, %v1714_v10  ;;  %v257_v49 = vunpack.c.l.bf16 %v5854_v13  ;;  %v267_v57 = vunpack.c.l.bf16 %v5859_v20  ;;  %v277_v1 = vunpack.c.l.bf16 %v5861_v21  ;;  %3954 = vmatprep.subr.bf16.mxu0 %v5178_v34  ;;  %v5196_v34 = vld [vmem:[#allocation5 + $0x734] ss:$20 sps:$4 sm:$0xff]  }
  0x9d   :  { %v1716_v55 = vsel %vm1693_vm5, %v1666_v53, %v1715_v51  ;;  %v287_v56 = vunpack.c.l.bf16 %v5866_v25  ;;  %v309_v46 = vadd.f32 %v147_v60, %v137_v37  ;;  %v379_v58 = vadd.f32 %v167_v4, %v157_v2 }
  0x9e   :  { %v1717_v5 = vsel %vm1695_vm6, %v1676_v38, %v1716_v55  ;;  %v449_v12 = vadd.f32 %v187_v41, %v177_v9  ;;  %v519_v50 = vadd.f32 %v207_v43, %v197_v42  ;;  %v589_v54 = vadd.f32 %v227_v48, %v217_v40  ;;  %v5200_v55 = vld [vmem:[#allocation5 + $0x708] ss:$20 sps:$4 sm:$0xff]  }
  0x9f   :  { %v5908_v63 = vpack.c.b16 %v1717_v5, %v1717_v5  ;;  %v310_v13 = vrot.slane %v309_v46, 4  ;;  %v380_v20 = vrot.slane %v379_v58, 4  ;;  %v659_v0 = vadd.f32 %v247_v18, %v237_v44  ;;  %3955 = vmatpush1.bf16.msra.mxu0 %v5176_v17 }
  0xa0   :  { %v450_v21 = vrot.slane %v449_v12, 4  ;;  %v520_v6 = vrot.slane %v519_v50, 4  ;;  %v590_v7 = vrot.slane %v589_v54, 4  ;;  %v729_v8 = vadd.f32 %v267_v57, %v257_v49  ;;  %3956 = vmatprep.subr.bf16.mxu0 %v5184_v45  ;;  %v5202_v45 = vld [vmem:[#allocation5 + $0x70c] ss:$20 sps:$4 sm:$0xff]  }
  0xa1   :  { %3933 = vmatprep.mubr.bf16.mxu1 %v5908_v63  ;;  %v311_v25 = vadd.f32 %v310_v13, %v309_v46  ;;  %v381_v14 = vadd.f32 %v380_v20, %v379_v58  ;;  %v660_v15 = vrot.slane %v659_v0, 4  ;;  %v799_v16 = vadd.f32 %v287_v56, %v277_v1 }
  0xa2   :  { %v451_v19 = vadd.f32 %v450_v21, %v449_v12  ;;  %v521_v22 = vadd.f32 %v520_v6, %v519_v50  ;;  %v591_v23 = vadd.f32 %v590_v7, %v589_v54  ;;  %v730_v24 = vrot.slane %v729_v8, 4  ;;  %v5206_v6 = vld [vmem:[#allocation5 + $0x6e0] ss:$20 sps:$4 sm:$0xff]  }
  0xa3   :  { %v312_v26 = vrot.slane %v311_v25, 2  ;;  %v382_v27 = vrot.slane %v381_v14, 2  ;;  %v661_v28 = vadd.f32 %v660_v15, %v659_v0  ;;  %v800_v29 = vrot.slane %v799_v16, 4  ;;  %3957 = vmatpush1.bf16.msra.mxu0 %v5182_v47  ;;  %v5911_v7 = vld [vmem:[#allocation2 + $0x10] sm:$0xff] }
  0xa4   :  { %v452_v31 = vrot.slane %v451_v19, 2  ;;  %v522_v32 = vrot.slane %v521_v22, 2  ;;  %v592_v52 = vrot.slane %v591_v23, 2  ;;  %v731_v33 = vadd.f32 %v730_v24, %v729_v8  ;;  %3958 = vmatprep.subr.bf16.mxu0 %v5190_v62  ;;  %v5208_v62 = vld [vmem:[#allocation5 + $0x6e4] ss:$20 sps:$4 sm:$0xff]  }
  0xa5   :  { %v313_v35 = vadd.f32 %v312_v26, %v311_v25  ;;  %v383_v36 = vadd.f32 %v382_v27, %v381_v14  ;;  %v662_v53 = vrot.slane %v661_v28, 2  ;;  %v801_v37 = vadd.f32 %v800_v29, %v799_v16  ;;  %v5913_v8 = vld [vmem:[#allocation2 + $0x38] sm:$0xff] }
  0xa6   :  { %v453_v38 = vadd.f32 %v452_v31, %v451_v19  ;;  %v523_v59 = vadd.f32 %v522_v32, %v521_v22  ;;  %v593_v60 = vadd.f32 %v592_v52, %v591_v23  ;;  %v732_v2 = vrot.slane %v731_v33, 2  ;;  %v5214_v19 = vld [vmem:[#allocation5 + $0x6bc] ss:$20 sps:$4 sm:$0xff]   ;;  %v5915_v22 = vld [vmem:[#allocation2 + $0x60] sm:$0xff]  ;;  %v5917_v32 = vld [vmem:[#allocation2 + $0x88] sm:$0xff] }
  0xa7   :  { %v314_v4 = vrot.slane %v313_v35, 1  ;;  %v384_v9 = vrot.slane %v383_v36, 1  ;;  %v663_v41 = vadd.f32 %v662_v53, %v661_v28  ;;  %v802_v17 = vrot.slane %v801_v37, 2  ;;  %3959 = vmatpush2.bf16.msra.mxu0 %v5188_v30  ;;  %v5922_v53 = vld [vmem:[#allocation2 + $0xd8] sm:$0xff] }
  0xa8   :  { %v454_v61 = vrot.slane %v453_v38, 1  ;;  %v524_v42 = vrot.slane %v523_v59, 1  ;;  %v594_v43 = vrot.slane %v593_v60, 1  ;;  %v733_v40 = vadd.f32 %v732_v2, %v731_v33  ;;  %3960 = vmatprep.subr.bf16.mxu0 %v5196_v34  ;;  %v5220_v2 = vld [vmem:[#allocation5 + $0x694] ss:$20 sps:$4 sm:$0xff]  }
  0xa9   :  { %v315_v10 = vadd.f32 %v314_v4, %v313_v35  ;;  %v385_v48 = vadd.f32 %v384_v9, %v383_v36  ;;  %v664_v44 = vrot.slane %v663_v41, 1  ;;  %v803_v18 = vadd.f32 %v802_v17, %v801_v37  ;;  %v5212_v35 = vld [vmem:[#allocation5 + $0x6b8] ss:$20 sps:$4 sm:$0xff]   ;;  %v5920_v36 = vld [vmem:[#allocation2 + $0xb0] sm:$0xff]  ;;  %v5924_v37 = vld [vmem:[#allocation2 + $0x100] sm:$0xff] }
  0xaa   :  { %v455_v51 = vadd.f32 %v454_v61, %v453_v38  ;;  %v525_v49 = vadd.f32 %v524_v42, %v523_v59  ;;  %v595_v57 = vadd.f32 %v594_v43, %v593_v60  ;;  %v734_v1 = vrot.slane %v733_v40, 1  ;;  %v5930_v4 = vld [vmem:[#allocation2 + $0x150] sm:$0xff]  ;;  %v5935_v42 = vld [vmem:[#allocation2 + $0x178] sm:$0xff] }
  0xab   :  { %v665_v56 = vadd.f32 %v664_v44, %v663_v41  ;;  %v804_v46 = vrot.slane %v803_v18, 1  ;;  %v858_v58 = vmul.f32 0.0625, %v315_v10  ;;  %v868_v47 = vmul.f32 0.0625, %v385_v48  ;;  %3961 = vmatpush2.bf16.msra.mxu0 %v5194_v3  ;;  %v5928_v3 = vld [vmem:[#allocation2 + $0x128] sm:$0xff]  ;;  %v5940_v10 = vld [vmem:[#allocation2 + $0x1a0] sm:$0xff] }
  0xac   :  { %v735_v5 = vadd.f32 %v734_v1, %v733_v40  ;;  %v878_v12 = vmul.f32 0.0625, %v455_v51  ;;  %v888_v50 = vmul.f32 0.0625, %v525_v49  ;;  %v898_v54 = vmul.f32 0.0625, %v595_v57  ;;  %3962 = vmatprep.subr.bf16.mxu0 %v5202_v45  ;;  %v5143_v49 = vld [vmem:[#allocation5 + $0x898] ss:$20 sps:$4 sm:$0xff]  }
  0xad   :  { %v805_v13 = vadd.f32 %v804_v46, %v803_v18  ;;  %v908_v20 = vmul.f32 0.0625, %v665_v56  ;;  %v938_v0 = vpack.c.bf16 %v858_v58, %v858_v58  ;;  %v948_v21 = vpack.c.bf16 %v868_v47, %v868_v47  ;;  %v5218_v57 = vld [vmem:[#allocation5 + $0x690] ss:$20 sps:$4 sm:$0xff]   ;;  %v5946_v1 = vld [vmem:[#allocation2 + $0x1c8] sm:$0xff]  ;;  %v5950_v56 = vld [vmem:[#allocation2 + $0x218] sm:$0xff] }
  0xae   :  { %v918_v25 = vmul.f32 0.0625, %v735_v5  ;;  %v958_v14 = vpack.c.bf16 %v878_v12, %v878_v12  ;;  %v968_v15 = vpack.c.bf16 %v888_v50, %v888_v50  ;;  %v978_v16 = vpack.c.bf16 %v898_v54, %v898_v54  ;;  %v5151_v12 = vld [vmem:[#allocation5 + $0x874] ss:$20 sps:$4 sm:$0xff]   ;;  %v5226_v50 = vld [vmem:[#allocation5 + $0x66c] ss:$20 sps:$4 sm:$0xff]  }
  0xaf   :  { %v928_v23 = vmul.f32 0.0625, %v805_v13  ;;  %v988_v24 = vpack.c.bf16 %v908_v20, %v908_v20  ;;  %v1605_v26 = vunpack.c.l.b16 %v938_v0  ;;  %v1615_v27 = vunpack.c.l.b16 %v948_v21  ;;  %3963 = vmatpush2.bf16.msra.mxu0 %v5200_v55  ;;  %v5948_v55 = vld [vmem:[#allocation2 + $0x1f0] sm:$0xff]  ;;  %v5956_v54 = vld [vmem:[#allocation2 + $0x240] sm:$0xff] }
  0xb0   :  { %v998_v28 = vpack.c.bf16 %v918_v25, %v918_v25  ;;  %v1625_v29 = vunpack.c.l.b16 %v958_v14  ;;  %v1635_v30 = vunpack.c.l.b16 %v968_v15  ;;  %v1645_v31 = vunpack.c.l.b16 %v978_v16  ;;  %3964 = vmatprep.subr.bf16.mxu0 %v5208_v62  ;;  %v5967_v15 = vld [vmem:[#allocation2 + $0x268] sm:$0xff] }
  0xb1   :  { %v1008_v52 = vpack.c.bf16 %v928_v23, %v928_v23  ;;  %v1655_v33 = vunpack.c.l.b16 %v988_v24  ;;  %v1704_v34 = vsel %vm1683_vm0, %v1615_v27, %v1605_v26  ;;  %v139_v38 = vunpack.c.l.bf16 %v5911_v7  ;;  %v5149_v24 = vld [vmem:[#allocation5 + $0x870] ss:$20 sps:$4 sm:$0xff]   ;;  %v5224_v26 = vld [vmem:[#allocation5 + $0x668] ss:$20 sps:$4 sm:$0xff]  }
  0xb2   :  { %v1665_v59 = vunpack.c.l.b16 %v998_v28  ;;  %v1705_v60 = vsel %vm1685_vm1, %v1625_v29, %v1704_v34  ;;  %v140_v9 = vunpack.c.h.bf16 %v5911_v7  ;;  %v149_v41 = vunpack.c.l.bf16 %v5913_v8 }
  0xb3   :  { %v1675_v17 = vunpack.c.l.b16 %v1008_v52  ;;  %v1706_v61 = vsel %vm1687_vm2, %v1635_v30, %v1705_v60  ;;  %3965 = vmatpush2.bf16.msra.mxu0 %v5206_v6  ;;  %v150_v43 = vunpack.c.h.bf16 %v5913_v8  ;;  %v159_v40 = vunpack.c.l.bf16 %v5915_v22  ;;  %v5157_v52 = vld [vmem:[#allocation5 + $0x84c] ss:$20 sps:$4 sm:$0xff]  }
  0xb4   :  { %v1707_v45 = vsel %vm1689_vm3, %v1645_v31, %v1706_v61  ;;  %3966 = vmatprep.subr.bf16.mxu0 %v5214_v19  ;;  %v160_v48 = vunpack.c.h.bf16 %v5915_v22  ;;  %v169_v44 = vunpack.c.l.bf16 %v5917_v32  ;;  %v170_v18 = vunpack.c.h.bf16 %v5917_v32  ;;  %v5976_v31 = vld [vmem:[#allocation2 + $0x18] sm:$0xff] }
  0xb5   :  { %v1708_v51 = vsel %vm1691_vm4, %v1655_v33, %v1707_v45  ;;  %v179_v46 = vunpack.c.l.bf16 %v5920_v36  ;;  %v180_v58 = vunpack.c.h.bf16 %v5920_v36  ;;  %v189_v47 = vunpack.c.l.bf16 %v5922_v53  ;;  %v5232_v45 = vld [vmem:[#allocation5 + $0x644] ss:$20 sps:$4 sm:$0xff]  }
  0xb6   :  { %v1709_v5 = vsel %vm1693_vm5, %v1665_v59, %v1708_v51  ;;  %v190_v62 = vunpack.c.h.bf16 %v5922_v53  ;;  %v200_v20 = vunpack.c.h.bf16 %v5924_v37  ;;  %v210_v6 = vunpack.c.h.bf16 %v5928_v3  ;;  %v5163_v19 = vld [vmem:[#allocation5 + $0x824] ss:$20 sps:$4 sm:$0xff]  }
  0xb7   :  { %v1710_v0 = vsel %vm1695_vm6, %v1675_v17, %v1709_v5  ;;  %3967 = vmatpush2.bf16.msra.mxu0 %v5212_v35  ;;  %v220_v16 = vunpack.c.h.bf16 %v5930_v4  ;;  %v230_v23 = vunpack.c.h.bf16 %v5935_v42  ;;  %v240_v28 = vunpack.c.h.bf16 %v5940_v10 }
  0xb8   :  { %v5965_v14 = vpack.c.b16 %v1710_v0, %v1710_v0  ;;  %3968 = vmatprep.subr.bf16.mxu0 %v5220_v2  ;;  %v250_v30 = vunpack.c.h.bf16 %v5946_v1  ;;  %v260_v34 = vunpack.c.h.bf16 %v5948_v55  ;;  %v270_v59 = vunpack.c.h.bf16 %v5950_v56 }
  0xb9   :  { %v280_v2 = vunpack.c.h.bf16 %v5956_v54  ;;  %v290_v61 = vunpack.c.h.bf16 %v5967_v15  ;;  %v330_v51 = vadd.f32 %v150_v43, %v140_v9  ;;  %v400_v5 = vadd.f32 %v170_v18, %v160_v48 }
  0xba   :  { %3934 = vmatmul.mubr.bf16.vlgmr.msra.gmra.mxu1 %v5965_v14  ;;  %v470_v0 = vadd.f32 %v190_v62, %v180_v58  ;;  %v141_v35 = vunpack.c.l.bf16 %v5976_v31  ;;  %v540_v33 = vadd.f32 %v210_v6, %v200_v20  ;;  %v610_v60 = vadd.f32 %v230_v23, %v220_v16  ;;  %v5238_v20 = vld [vmem:[#allocation5 + $0xb1c] ss:$20 sps:$4 sm:$0xff]  }
  0xbb   :  { %3984 = vmatpush1.bf16.msra.mxu1 %v5143_v49  ;;  %3969 = vmatpush2.bf16.msra.mxu0 %v5218_v57  ;;  %v5155_v49 = vld [vmem:[#allocation5 + $0x848] ss:$20 sps:$4 sm:$0xff]   ;;  %v5230_v57 = vld [vmem:[#allocation5 + $0x640] ss:$20 sps:$4 sm:$0xff]   ;;  %v680_v29 = vadd.f32 %v250_v30, %v240_v28  ;;  %v750_v27 = vadd.f32 %v270_v59, %v260_v34  ;;  %v331_v17 = vrot.slane %v330_v51, 4  ;;  %v401_v25 = vrot.slane %v400_v5, 4 }
  0xbc   :  { %3985 = vmatprep.subr.bf16.mxu1 %v5151_v12  ;;  %3970 = vmatprep.subr.bf16.mxu0 %v5226_v50  ;;  %v471_v21 = vrot.slane %v470_v0, 4  ;;  %v820_v12 = vadd.f32 %v290_v61, %v280_v2  ;;  %v541_v50 = vrot.slane %v540_v33, 4  ;;  %v611_v13 = vrot.slane %v610_v60, 4 }
  0xbd   :  { %v681_v9 = vrot.slane %v680_v29, 4  ;;  %v751_v43 = vrot.slane %v750_v27, 4  ;;  %v332_v48 = vadd.f32 %v331_v17, %v330_v51  ;;  %v402_v18 = vadd.f32 %v401_v25, %v400_v5  ;;  %v5169_v25 = vld [vmem:[#allocation5 + $0x7fc] ss:$20 sps:$4 sm:$0xff]  }
  0xbe   :  { %v472_v58 = vadd.f32 %v471_v21, %v470_v0  ;;  %v821_v62 = vrot.slane %v820_v12, 4  ;;  %v542_v6 = vadd.f32 %v541_v50, %v540_v33  ;;  %v612_v16 = vadd.f32 %v611_v13, %v610_v60 }
  0xbf   :  { %3986 = vmatpush1.bf16.msra.mxu1 %v5149_v24  ;;  %3971 = vmatpush2.bf16.msra.mxu0 %v5224_v26  ;;  %v682_v23 = vadd.f32 %v681_v9, %v680_v29  ;;  %v752_v28 = vadd.f32 %v751_v43, %v750_v27  ;;  %v333_v30 = vrot.slane %v332_v48, 2  ;;  %v403_v34 = vrot.slane %v402_v18, 2  ;;  %v5161_v26 = vld [vmem:[#allocation5 + $0x820] ss:$20 sps:$4 sm:$0xff]  }
  0xc0   :  { %3987 = vmatprep.subr.bf16.mxu1 %v5157_v52  ;;  %3972 = vmatprep.subr.bf16.mxu0 %v5232_v45  ;;  %v473_v59 = vrot.slane %v472_v58, 2  ;;  %v822_v24 = vadd.f32 %v821_v62, %v820_v12  ;;  %v543_v2 = vrot.slane %v542_v6, 2  ;;  %v613_v61 = vrot.slane %v612_v16, 2 }
  0xc1   :  { %v683_v52 = vrot.slane %v682_v23, 2  ;;  %v753_v45 = vrot.slane %v752_v28, 2  ;;  %v334_v21 = vadd.f32 %v333_v30, %v332_v48  ;;  %v404_v17 = vadd.f32 %v403_v34, %v402_v18  ;;  %v5175_v48 = vld [vmem:[#allocation5 + $0x7d4] ss:$20 sps:$4 sm:$0xff]   ;;  %v5173_v30 = vld [vmem:[#allocation5 + $0x7d0] ss:$20 sps:$4 sm:$0xff]  }
  0xc2   :  { %v474_v51 = vadd.f32 %v473_v59, %v472_v58  ;;  %v823_v33 = vrot.slane %v822_v24, 2  ;;  %v544_v13 = vadd.f32 %v543_v2, %v542_v6  ;;  %v614_v27 = vadd.f32 %v613_v61, %v612_v16 }
  0xc3   :  { %3988 = vmatpush1.bf16.msra.mxu1 %v5155_v49  ;;  %3973 = vmatpush2.bf16.msra.mxu0 %v5230_v57  ;;  %v684_v29 = vadd.f32 %v683_v52, %v682_v23  ;;  %v754_v60 = vadd.f32 %v753_v45, %v752_v28  ;;  %v335_v5 = vrot.slane %v334_v21, 1  ;;  %v405_v0 = vrot.slane %v404_v17, 1  ;;  %v5167_v57 = vld [vmem:[#allocation5 + $0x7f8] ss:$20 sps:$4 sm:$0xff]  }
  0xc4   :  { %3989 = vmatprep.subr.bf16.mxu1 %v5163_v19  ;;  %4024 = vmatprep.subr.bf16.mxu0 %v5238_v20  ;;  %v475_v49 = vrot.slane %v474_v51, 1  ;;  %v824_v12 = vadd.f32 %v823_v33, %v822_v24  ;;  %v545_v50 = vrot.slane %v544_v13, 1  ;;  %v615_v9 = vrot.slane %v614_v27, 1 }
  0xc5   :  { %v685_v43 = vrot.slane %v684_v29, 1  ;;  %v755_v19 = vrot.slane %v754_v60, 1  ;;  %v336_v18 = vadd.f32 %v335_v5, %v334_v21  ;;  %v406_v58 = vadd.f32 %v405_v0, %v404_v17 }
  0xc6   :  { %v476_v62 = vadd.f32 %v475_v49, %v474_v51  ;;  %v825_v20 = vrot.slane %v824_v12, 1  ;;  %v546_v6 = vadd.f32 %v545_v50, %v544_v13  ;;  %v616_v16 = vadd.f32 %v615_v9, %v614_v27  ;;  %v5179_v13 = vld [vmem:[#allocation5 + $0x7a8] ss:$20 sps:$4 sm:$0xff]  }
  0xc7   :  { %3990 = vmatpush1.bf16.msra.mxu1 %v5161_v26  ;;  %v686_v23 = vadd.f32 %v685_v43, %v684_v29  ;;  %v756_v28 = vadd.f32 %v755_v19, %v754_v60  ;;  %v861_v59 = vmul.f32 0.0625, %v336_v18  ;;  %v871_v24 = vmul.f32 0.0625, %v406_v58 }
  0xc8   :  { %3991 = vmatprep.subr.bf16.mxu1 %v5169_v25  ;;  %v826_v34 = vadd.f32 %v825_v20, %v824_v12  ;;  %v881_v26 = vmul.f32 0.0625, %v476_v62  ;;  %v891_v2 = vmul.f32 0.0625, %v546_v6  ;;  %v901_v61 = vmul.f32 0.0625, %v616_v16  ;;  %v5181_v25 = vld [vmem:[#allocation5 + $0x7ac] ss:$20 sps:$4 sm:$0xff]  }
  0xc9   :  { %v911_v52 = vmul.f32 0.0625, %v686_v23  ;;  %v921_v45 = vmul.f32 0.0625, %v756_v28  ;;  %v941_v17 = vpack.c.bf16 %v861_v59, %v861_v59  ;;  %v951_v51 = vpack.c.bf16 %v871_v24, %v871_v24  ;;  %v5185_v6 = vld [vmem:[#allocation5 + $0x780] ss:$20 sps:$4 sm:$0xff]  }
  0xca   :  { %v931_v21 = vmul.f32 0.0625, %v826_v34  ;;  %v961_v33 = vpack.c.bf16 %v881_v26, %v881_v26  ;;  %v971_v27 = vpack.c.bf16 %v891_v2, %v891_v2  ;;  %v981_v29 = vpack.c.bf16 %v901_v61, %v901_v61  ;;  %v5191_v26 = vld [vmem:[#allocation5 + $0x9d8] ss:$20 sps:$4 sm:$0xff]  }
  0xcb   :  { %3992 = vmatpush1.bf16.msra.mxu1 %v5167_v57  ;;  %v991_v60 = vpack.c.bf16 %v911_v52, %v911_v52  ;;  %v1001_v5 = vpack.c.bf16 %v921_v45, %v921_v45  ;;  %v1608_v49 = vunpack.c.l.b16 %v941_v17  ;;  %v1618_v12 = vunpack.c.l.b16 %v951_v51 }
  0xcc   :  { %3993 = vmatprep.subr.bf16.mxu1 %v5175_v48  ;;  %v1011_v0 = vpack.c.bf16 %v931_v21, %v931_v21  ;;  %v1628_v50 = vunpack.c.l.b16 %v961_v33  ;;  %v1638_v57 = vunpack.c.l.b16 %v971_v27  ;;  %v1648_v9 = vunpack.c.l.b16 %v981_v29  ;;  %v5187_v48 = vld [vmem:[#allocation5 + $0x784] ss:$20 sps:$4 sm:$0xff]   ;;  %v5199_v27 = vld [vmem:[#allocation5 + $0x9b4] ss:$20 sps:$4 sm:$0xff]  }
  0xcd   :  { %v1658_v43 = vunpack.c.l.b16 %v991_v60  ;;  %v1668_v19 = vunpack.c.l.b16 %v1001_v5  ;;  %v1725_v58 = vsel %vm1683_vm0, %v1618_v12, %v1608_v49  ;;  %v323_v62 = vadd.f32 %v149_v41, %v139_v38 }
  0xce   :  { %v1678_v18 = vunpack.c.l.b16 %v1011_v0  ;;  %v393_v20 = vadd.f32 %v169_v44, %v159_v40  ;;  %v1726_v16 = vsel %vm1685_vm1, %v1628_v50, %v1725_v58  ;;  %v463_v23 = vadd.f32 %v189_v47, %v179_v46  ;;  %v5197_v50 = vld [vmem:[#allocation5 + $0x9b0] ss:$20 sps:$4 sm:$0xff]  }
  0xcf   :  { %3994 = vmatpush1.bf16.msra.mxu1 %v5173_v30  ;;  %v6344_v28 = vunpack.c.l.bf16 %v5924_v37  ;;  %v6345_v7 = vunpack.c.l.bf16 %v5928_v3  ;;  %v6346_v8 = vunpack.c.l.bf16 %v5930_v4  ;;  %v6347_v22 = vunpack.c.l.bf16 %v5935_v42  ;;  %v5193_v4 = vld [vmem:[#allocation5 + $0x9dc] ss:$20 sps:$4 sm:$0xff]  }
  0xd0   :  { %3995 = vmatprep.subr.bf16.mxu1 %v5181_v25  ;;  %v1727_v32 = vsel %vm1687_vm2, %v1638_v57, %v1726_v16  ;;  %v324_v41 = vrot.slane %v323_v62, 4  ;;  %v394_v40 = vrot.slane %v393_v20, 4  ;;  %v6348_v44 = vunpack.c.l.bf16 %v5940_v10 }
  0xd1   :  { %v533_v30 = vadd.f32 %v6345_v7, %v6344_v28  ;;  %v603_v38 = vadd.f32 %v6347_v22, %v6346_v8  ;;  %v6349_v36 = vunpack.c.l.bf16 %v5946_v1  ;;  %v1728_v37 = vsel %vm1689_vm3, %v1648_v9, %v1727_v32  ;;  %v5205_v28 = vld [vmem:[#allocation5 + $0x98c] ss:$20 sps:$4 sm:$0xff]  }
  0xd2   :  { %v464_v46 = vrot.slane %v463_v23, 4  ;;  %v1729_v42 = vsel %vm1691_vm4, %v1658_v43, %v1728_v37  ;;  %v325_v34 = vadd.f32 %v324_v41, %v323_v62  ;;  %v395_v59 = vadd.f32 %v394_v40, %v393_v20 }
  0xd3   :  { %v673_v53 = vadd.f32 %v6349_v36, %v6348_v44  ;;  %3996 = vmatpush1.bf16.msra.mxu1 %v5179_v13  ;;  %v534_v3 = vrot.slane %v533_v30, 4  ;;  %v604_v47 = vrot.slane %v603_v38, 4  ;;  %v1730_v2 = vsel %vm1693_vm5, %v1668_v19, %v1729_v42 }
  0xd4   :  { %3997 = vmatprep.subr.bf16.mxu1 %v5187_v48  ;;  %v465_v10 = vadd.f32 %v464_v46, %v463_v23  ;;  %v1731_v52 = vsel %vm1695_vm6, %v1678_v18, %v1730_v2  ;;  %v326_v45 = vrot.slane %v325_v34, 2  ;;  %v396_v25 = vrot.slane %v395_v59, 2 }
  0xd5   :  { %v674_v24 = vrot.slane %v673_v53, 4  ;;  %v535_v61 = vadd.f32 %v534_v3, %v533_v30  ;;  %v605_v1 = vadd.f32 %v604_v47, %v603_v38  ;;  %v6021_v17 = vpack.c.b16 %v1731_v52, %v1731_v52  ;;  %v5203_v38 = vld [vmem:[#allocation5 + $0x988] ss:$20 sps:$4 sm:$0xff]   ;;  %v6032_v52 = vld [vmem:[#allocation2 + $0x40] sm:$0xff] }
  0xd6   :  { %v466_v51 = vrot.slane %v465_v10, 2  ;;  %v327_v29 = vadd.f32 %v326_v45, %v325_v34  ;;  %v397_v60 = vadd.f32 %v396_v25, %v395_v59  ;;  %v6350_v0 = vunpack.c.l.bf16 %v5948_v55  ;;  %v6034_v45 = vld [vmem:[#allocation2 + $0x68] sm:$0xff]  ;;  %v5217_v25 = vld [vmem:[#allocation5 + $0x93c] ss:$20 sps:$4 sm:$0xff]  }
  0xd7   :  { %v675_v21 = vadd.f32 %v674_v24, %v673_v53  ;;  %3998 = vmatpush1.bf16.msra.mxu1 %v5185_v6  ;;  %v536_v33 = vrot.slane %v535_v61, 2  ;;  %v606_v13 = vrot.slane %v605_v1, 2  ;;  %v6351_v49 = vunpack.c.l.bf16 %v5950_v56  ;;  %3974 = vmatprep.mubr.bf16.mxu0 %v6021_v17 }
  0xd8   :  { %3999 = vmatprep.subr.bf16.mxu1 %v5193_v4  ;;  %v467_v57 = vadd.f32 %v466_v51, %v465_v10  ;;  %v6352_v19 = vunpack.c.l.bf16 %v5956_v54  ;;  %v6353_v48 = vunpack.c.l.bf16 %v5967_v15  ;;  %v328_v58 = vrot.slane %v327_v29, 1  ;;  %v5211_v4 = vld [vmem:[#allocation5 + $0x964] ss:$20 sps:$4 sm:$0xff]  }
  0xd9   :  { %v676_v5 = vrot.slane %v675_v21, 2  ;;  %v743_v12 = vadd.f32 %v6351_v49, %v6350_v0  ;;  %v537_v9 = vadd.f32 %v536_v33, %v535_v61  ;;  %v607_v43 = vadd.f32 %v606_v13, %v605_v1 }
  0xda   :  { %v813_v18 = vadd.f32 %v6353_v48, %v6352_v19  ;;  %v398_v62 = vrot.slane %v397_v60, 1  ;;  %v468_v55 = vrot.slane %v467_v57, 1  ;;  %v329_v7 = vadd.f32 %v328_v58, %v327_v29  ;;  %v6045_v58 = vld [vmem:[#allocation2 + $0x108] sm:$0xff] }
  0xdb   :  { %v677_v20 = vadd.f32 %v676_v5, %v675_v21  ;;  %v744_v6 = vrot.slane %v743_v12, 4  ;;  %4000 = vmatpush2.bf16.msra.mxu1 %v5191_v26  ;;  %v538_v16 = vrot.slane %v537_v9, 1  ;;  %v608_v56 = vrot.slane %v607_v43, 1  ;;  %v5209_v26 = vld [vmem:[#allocation5 + $0x960] ss:$20 sps:$4 sm:$0xff]  }
  0xdc   :  { %v814_v23 = vrot.slane %v813_v18, 4  ;;  %4001 = vmatprep.subr.bf16.mxu1 %v5199_v27  ;;  %v399_v30 = vadd.f32 %v398_v62, %v397_v60  ;;  %v469_v54 = vadd.f32 %v468_v55, %v467_v57  ;;  %v860_v36 = vmul.f32 0.0625, %v329_v7  ;;  %v6036_v27 = vld [vmem:[#allocation2 + $0x90] sm:$0xff]  ;;  %v6039_v57 = vld [vmem:[#allocation2 + $0xb8] sm:$0xff] }
  0xdd   :  { %v678_v8 = vrot.slane %v677_v20, 1  ;;  %v745_v22 = vadd.f32 %v744_v6, %v743_v12  ;;  %v539_v32 = vadd.f32 %v538_v16, %v537_v9  ;;  %v609_v15 = vadd.f32 %v608_v56, %v607_v43  ;;  %v5215_v43 = vld [vmem:[#allocation5 + $0x938] ss:$20 sps:$4 sm:$0xff]   ;;  %v6047_v62 = vld [vmem:[#allocation2 + $0x130] sm:$0xff] }
  0xde   :  { %v815_v41 = vadd.f32 %v814_v23, %v813_v18  ;;  %v870_v53 = vmul.f32 0.0625, %v399_v30  ;;  %v880_v46 = vmul.f32 0.0625, %v469_v54  ;;  %v940_v59 = vpack.c.bf16 %v860_v36, %v860_v36  ;;  %v6043_v18 = vld [vmem:[#allocation2 + $0xe0] sm:$0xff]  ;;  %v5223_v55 = vld [vmem:[#allocation5 + $0x914] ss:$20 sps:$4 sm:$0xff]   ;;  %v6052_v23 = vld [vmem:[#allocation2 + $0x158] sm:$0xff] }
  0xdf   :  { %v679_v40 = vadd.f32 %v678_v8, %v677_v20  ;;  %v746_v44 = vrot.slane %v745_v22, 2  ;;  %4002 = vmatpush2.bf16.msra.mxu1 %v5197_v50  ;;  %v890_v3 = vmul.f32 0.0625, %v539_v32  ;;  %v900_v47 = vmul.f32 0.0625, %v609_v15  ;;  %v5221_v36 = vld [vmem:[#allocation5 + $0x910] ss:$20 sps:$4 sm:$0xff]  }
  0xe0   :  { %v816_v37 = vrot.slane %v815_v41, 2  ;;  %4003 = vmatprep.subr.bf16.mxu1 %v5205_v28  ;;  %v950_v24 = vpack.c.bf16 %v870_v53, %v870_v53  ;;  %v960_v10 = vpack.c.bf16 %v880_v46, %v880_v46  ;;  %v1607_v33 = vunpack.c.l.b16 %v940_v59  ;;  %v6054_v28 = vld [vmem:[#allocation2 + $0x180] sm:$0xff]  ;;  %v6068_v46 = vld [vmem:[#allocation2 + $0x1f8] sm:$0xff] }
  0xe1   :  { %v747_v42 = vadd.f32 %v746_v44, %v745_v22  ;;  %v910_v34 = vmul.f32 0.0625, %v679_v40  ;;  %v970_v61 = vpack.c.bf16 %v890_v3, %v890_v3  ;;  %v980_v1 = vpack.c.bf16 %v900_v47, %v900_v47  ;;  %v6070_v3 = vld [vmem:[#allocation2 + $0x220] sm:$0xff] }
  0xe2   :  { %v817_v2 = vadd.f32 %v816_v37, %v815_v41  ;;  %v1617_v13 = vunpack.c.l.b16 %v950_v24  ;;  %v1627_v60 = vunpack.c.l.b16 %v960_v10  ;;  %v142_v9 = vunpack.c.h.bf16 %v5976_v31  ;;  %v6062_v41 = vld [vmem:[#allocation2 + $0x1a8] sm:$0xff]  ;;  %v6066_v37 = vld [vmem:[#allocation2 + $0x1d0] sm:$0xff] }
  0xe3   :  { %v748_v21 = vrot.slane %v747_v42, 1  ;;  %v990_v51 = vpack.c.bf16 %v910_v34, %v910_v34  ;;  %4004 = vmatpush2.bf16.msra.mxu1 %v5203_v38  ;;  %v1637_v5 = vunpack.c.l.b16 %v970_v61  ;;  %v1647_v0 = vunpack.c.l.b16 %v980_v1  ;;  %v5229_v34 = vld [vmem:[#allocation5 + $0x8ec] ss:$20 sps:$4 sm:$0xff]  }
  0xe4   :  { %v818_v29 = vrot.slane %v817_v2, 1  ;;  %4005 = vmatprep.subr.bf16.mxu1 %v5211_v4  ;;  %v1718_v50 = vsel %vm1683_vm0, %v1617_v13, %v1607_v33  ;;  %v151_v20 = vunpack.c.l.bf16 %v6032_v52  ;;  %v152_v6 = vunpack.c.h.bf16 %v6032_v52  ;;  %v6075_v24 = vld [vmem:[#allocation2 + $0x248] sm:$0xff]  ;;  %v6084_v33 = vld [vmem:[#allocation2 + $0x270] sm:$0xff] }
  0xe5   :  { %v749_v49 = vadd.f32 %v748_v21, %v747_v42  ;;  %v1657_v12 = vunpack.c.l.b16 %v990_v51  ;;  %v1719_v48 = vsel %vm1685_vm1, %v1627_v60, %v1718_v50  ;;  %v161_v7 = vunpack.c.l.bf16 %v6034_v45 }
  0xe6   :  { %v819_v19 = vadd.f32 %v818_v29, %v817_v2  ;;  %v1720_v56 = vsel %vm1687_vm2, %v1637_v5, %v1719_v48  ;;  %v162_v30 = vunpack.c.h.bf16 %v6034_v45  ;;  %v171_v38 = vunpack.c.l.bf16 %v6036_v27  ;;  %v5227_v5 = vld [vmem:[#allocation5 + $0x8e8] ss:$20 sps:$4 sm:$0xff]   ;;  %v6093_v48 = vld [vmem:[#allocation2 + $0x20] sm:$0xff] }
  0xe7   :  { %v920_v16 = vmul.f32 0.0625, %v749_v49  ;;  %4006 = vmatpush2.bf16.msra.mxu1 %v5209_v26  ;;  %v1721_v22 = vsel %vm1689_vm3, %v1647_v0, %v1720_v56  ;;  %v172_v54 = vunpack.c.h.bf16 %v6036_v27  ;;  %v181_v40 = vunpack.c.l.bf16 %v6039_v57  ;;  %v5236_v49 = vld [vmem:[#allocation5 + $0xb18] ss:$20 sps:$4 sm:$0xff]   ;;  %v5242_v29 = vld [vmem:[#allocation5 + $0xaf0] ss:$20 sps:$4 sm:$0xff]  }
  0xe8   :  { %v930_v8 = vmul.f32 0.0625, %v819_v19  ;;  %4007 = vmatprep.subr.bf16.mxu1 %v5217_v25  ;;  %v1722_v15 = vsel %vm1691_vm4, %v1657_v12, %v1721_v22  ;;  %v182_v44 = vunpack.c.h.bf16 %v6039_v57  ;;  %v192_v4 = vunpack.c.h.bf16 %v6043_v18  ;;  %v5244_v19 = vld [vmem:[#allocation5 + $0xaf4] ss:$20 sps:$4 sm:$0xff]  }
  0xe9   :  { %v1000_v32 = vpack.c.bf16 %v920_v16, %v920_v16  ;;  %v202_v26 = vunpack.c.h.bf16 %v6045_v58  ;;  %v212_v10 = vunpack.c.h.bf16 %v6047_v62  ;;  %v222_v25 = vunpack.c.h.bf16 %v6052_v23  ;;  %v5233_v22 = vld [vmem:[#allocation5 + $0x8c0] ss:$20 sps:$4 sm:$0xff]   ;;  %v5272_v27 = vld [vmem:[#allocation5 + $0xa28] ss:$20 sps:$4 sm:$0xff]  }
  0xea   :  { %v1010_v53 = vpack.c.bf16 %v930_v8, %v930_v8  ;;  %v232_v13 = vunpack.c.h.bf16 %v6054_v28  ;;  %v242_v60 = vunpack.c.h.bf16 %v6062_v41  ;;  %v252_v50 = vunpack.c.h.bf16 %v6066_v37 }
  0xeb   :  { %v1667_v59 = vunpack.c.l.b16 %v1000_v32  ;;  %4008 = vmatpush2.bf16.msra.mxu1 %v5215_v43  ;;  %v262_v16 = vunpack.c.h.bf16 %v6068_v46  ;;  %v272_v8 = vunpack.c.h.bf16 %v6070_v3  ;;  %v282_v32 = vunpack.c.h.bf16 %v6075_v24 }
  0xec   :  { %v1677_v61 = vunpack.c.l.b16 %v1010_v53  ;;  %4009 = vmatprep.subr.bf16.mxu1 %v5223_v55  ;;  %v292_v53 = vunpack.c.h.bf16 %v6084_v33  ;;  %v554_v56 = vadd.f32 %v212_v10, %v202_v26  ;;  %v624_v43 = vadd.f32 %v232_v13, %v222_v25  ;;  %v5241_v10 = vld [vmem:[#allocation5 + $0x124] ss:$20 sps:$4 sm:$0xff]  }
  0xed   :  { %v1723_v51 = vsel %vm1693_vm5, %v1667_v59, %v1722_v15  ;;  %v5235_v59 = vld [vmem:[#allocation5 + $0x8c4] ss:$20 sps:$4 sm:$0xff]   ;;  %v694_v12 = vadd.f32 %v252_v50, %v242_v60  ;;  %v764_v15 = vadd.f32 %v272_v8, %v262_v16  ;;  %v5248_v50 = vld [vmem:[#allocation5 + $0xac8] ss:$20 sps:$4 sm:$0xff]   ;;  %v6357_v52 = vunpack.c.l.bf16 %v6052_v23 }
  0xee   :  { %v1724_v0 = vsel %vm1695_vm6, %v1677_v61, %v1723_v51  ;;  %v344_v61 = vadd.f32 %v152_v6, %v142_v9  ;;  %v414_v51 = vadd.f32 %v172_v54, %v162_v30  ;;  %v834_v42 = vadd.f32 %v292_v53, %v282_v32  ;;  %v5256_v16 = vld [vmem:[#allocation5 + $0xaa4] ss:$20 sps:$4 sm:$0xff]  }
  0xef   :  { %v6095_v55 = vpack.c.b16 %v1724_v0, %v1724_v0  ;;  %4010 = vmatpush2.bf16.msra.mxu1 %v5221_v36  ;;  %v484_v0 = vadd.f32 %v192_v4, %v182_v44  ;;  %v143_v36 = vunpack.c.l.bf16 %v6093_v48  ;;  %v555_v47 = vrot.slane %v554_v56, 4 }
  0xf0   :  { %4011 = vmatprep.subr.bf16.mxu1 %v5229_v34  ;;  %v5250_v34 = vld [vmem:[#allocation5 + $0xacc] ss:$20 sps:$4 sm:$0xff]   ;;  %v345_v21 = vrot.slane %v344_v61, 4  ;;  %v415_v1 = vrot.slane %v414_v51, 4  ;;  %v625_v9 = vrot.slane %v624_v43, 4  ;;  %v695_v6 = vrot.slane %v694_v12, 4 }
  0xf1   :  { %3975 = vmatmul.mubr.bf16.vlgmr.msra.gmra.mxu0 %v6095_v55  ;;  %v485_v2 = vrot.slane %v484_v0, 4  ;;  %v765_v30 = vrot.slane %v764_v15, 4  ;;  %v835_v26 = vrot.slane %v834_v42, 4  ;;  %v556_v25 = vadd.f32 %v555_v47, %v554_v56 }
  0xf2   :  { %4025 = vmatpush1.bf16.msra.mxu0 %v5236_v49  ;;  %v346_v54 = vadd.f32 %v345_v21, %v344_v61  ;;  %v416_v44 = vadd.f32 %v415_v1, %v414_v51  ;;  %v626_v13 = vadd.f32 %v625_v9, %v624_v43  ;;  %v696_v60 = vadd.f32 %v695_v6, %v694_v12 }
  0xf3   :  { %4026 = vmatprep.subr.bf16.mxu0 %v5244_v19  ;;  %4012 = vmatpush2.bf16.msra.mxu1 %v5227_v5  ;;  %v486_v4 = vadd.f32 %v485_v2, %v484_v0  ;;  %v766_v49 = vadd.f32 %v765_v30, %v764_v15  ;;  %v836_v32 = vadd.f32 %v835_v26, %v834_v42  ;;  %v557_v53 = vrot.slane %v556_v25, 2  ;;  %v5254_v15 = vld [vmem:[#allocation5 + $0xaa0] ss:$20 sps:$4 sm:$0xff]   ;;  %v5262_v0 = vld [vmem:[#allocation5 + $0xa7c] ss:$20 sps:$4 sm:$0xff]  }
  0xf4   :  { %4013 = vmatprep.subr.bf16.mxu1 %v5235_v59  ;;  %v347_v8 = vrot.slane %v346_v54, 2  ;;  %v417_v19 = vrot.slane %v416_v44, 2  ;;  %v627_v59 = vrot.slane %v626_v13, 2  ;;  %v697_v21 = vrot.slane %v696_v60, 2 }
  0xf5   :  { %v487_v5 = vrot.slane %v486_v4, 2  ;;  %v767_v1 = vrot.slane %v766_v49, 2  ;;  %v837_v47 = vrot.slane %v836_v32, 2  ;;  %v558_v12 = vadd.f32 %v557_v53, %v556_v25 }
  0xf6   :  { %4027 = vmatpush1.bf16.msra.mxu0 %v5242_v29  ;;  %v348_v2 = vadd.f32 %v347_v8, %v346_v54  ;;  %v418_v61 = vadd.f32 %v417_v19, %v416_v44  ;;  %v628_v43 = vadd.f32 %v627_v59, %v626_v13  ;;  %v698_v29 = vadd.f32 %v697_v21, %v696_v60  ;;  %v5268_v19 = vld [vmem:[#allocation5 + $0xa54] ss:$20 sps:$4 sm:$0xff]  }
  0xf7   :  { %4028 = vmatprep.subr.bf16.mxu0 %v5250_v34  ;;  %4014 = vmatpush2.bf16.msra.mxu1 %v5233_v22  ;;  %v488_v51 = vadd.f32 %v487_v5, %v486_v4  ;;  %v768_v56 = vadd.f32 %v767_v1, %v766_v49  ;;  %v838_v22 = vadd.f32 %v837_v47, %v836_v32  ;;  %v559_v6 = vrot.slane %v558_v12, 1 }
  0xf8   :  { %4065 = vmatprep.subr.bf16.mxu1 %v5241_v10  ;;  %v349_v9 = vrot.slane %v348_v2, 1  ;;  %v419_v42 = vrot.slane %v418_v61, 1  ;;  %v629_v30 = vrot.slane %v628_v43, 1  ;;  %v699_v26 = vrot.slane %v698_v29, 1 }
  0xf9   :  { %v489_v34 = vrot.slane %v488_v51, 1  ;;  %v769_v54 = vrot.slane %v768_v56, 1  ;;  %v839_v10 = vrot.slane %v838_v22, 1  ;;  %v560_v25 = vadd.f32 %v559_v6, %v558_v12 }
  0xfa   :  { %4029 = vmatpush1.bf16.msra.mxu0 %v5248_v50  ;;  %v350_v44 = vadd.f32 %v349_v9, %v348_v2  ;;  %v420_v4 = vadd.f32 %v419_v42, %v418_v61  ;;  %v630_v13 = vadd.f32 %v629_v30, %v628_v43  ;;  %v700_v60 = vadd.f32 %v699_v26, %v698_v29  ;;  %v5260_v50 = vld [vmem:[#allocation5 + $0xa78] ss:$20 sps:$4 sm:$0xff]  }
  0xfb   :  { %4030 = vmatprep.subr.bf16.mxu0 %v5256_v16  ;;  %v490_v8 = vadd.f32 %v489_v34, %v488_v51  ;;  %v770_v49 = vadd.f32 %v769_v54, %v768_v56  ;;  %v840_v5 = vadd.f32 %v839_v10, %v838_v22  ;;  %v893_v16 = vmul.f32 0.0625, %v560_v25  ;;  %v5274_v42 = vld [vmem:[#allocation5 + $0xa2c] ss:$20 sps:$4 sm:$0xff]  }
  0xfc   :  { %v863_v53 = vmul.f32 0.0625, %v350_v44  ;;  %v873_v59 = vmul.f32 0.0625, %v420_v4  ;;  %v903_v21 = vmul.f32 0.0625, %v630_v13  ;;  %v913_v1 = vmul.f32 0.0625, %v700_v60 }
  0xfd   :  { %v883_v32 = vmul.f32 0.0625, %v490_v8  ;;  %v923_v47 = vmul.f32 0.0625, %v770_v49  ;;  %v933_v2 = vmul.f32 0.0625, %v840_v5  ;;  %v973_v12 = vpack.c.bf16 %v893_v16, %v893_v16 }
  0xfe   :  { %4031 = vmatpush1.bf16.msra.mxu0 %v5254_v15  ;;  %v943_v61 = vpack.c.bf16 %v863_v53, %v863_v53  ;;  %v953_v51 = vpack.c.bf16 %v873_v59, %v873_v59  ;;  %v983_v43 = vpack.c.bf16 %v903_v21, %v903_v21  ;;  %v993_v29 = vpack.c.bf16 %v913_v1, %v913_v1  ;;  %v5266_v15 = vld [vmem:[#allocation5 + $0xa50] ss:$20 sps:$4 sm:$0xff]  }
  0xff   :  { %4032 = vmatprep.subr.bf16.mxu0 %v5262_v0  ;;  %v963_v9 = vpack.c.bf16 %v883_v32, %v883_v32  ;;  %v1003_v56 = vpack.c.bf16 %v923_v47, %v923_v47  ;;  %v1013_v34 = vpack.c.bf16 %v933_v2, %v933_v2  ;;  %v1640_v0 = vunpack.c.l.b16 %v973_v12 }
 0x100   :  { %v1610_v22 = vunpack.c.l.b16 %v943_v61  ;;  %v1620_v6 = vunpack.c.l.b16 %v953_v51  ;;  %v1650_v26 = vunpack.c.l.b16 %v983_v43  ;;  %v1660_v54 = vunpack.c.l.b16 %v993_v29 }
 0x101   :  { %v1630_v30 = vunpack.c.l.b16 %v963_v9  ;;  %v1670_v44 = vunpack.c.l.b16 %v1003_v56  ;;  %v1680_v4 = vunpack.c.l.b16 %v1013_v34  ;;  %v337_v10 = vadd.f32 %v151_v20, %v141_v35  ;;  %v5280_v20 = vld [vmem:[#allocation5 + $0xa04] ss:$20 sps:$4 sm:$0xff]  }
 0x102   :  { %4033 = vmatpush1.bf16.msra.mxu0 %v5260_v50  ;;  %v1739_v8 = vsel %vm1683_vm0, %v1620_v6, %v1610_v22  ;;  %v407_v25 = vadd.f32 %v171_v38, %v161_v7  ;;  %v6354_v60 = vunpack.c.l.bf16 %v6043_v18  ;;  %v6355_v50 = vunpack.c.l.bf16 %v6045_v58 }
 0x103   :  { %4034 = vmatprep.subr.bf16.mxu0 %v5268_v19  ;;  %v1740_v13 = vsel %vm1685_vm1, %v1630_v30, %v1739_v8  ;;  %v6356_v19 = vunpack.c.l.bf16 %v6047_v62  ;;  %v6358_v35 = vunpack.c.l.bf16 %v6054_v28  ;;  %v338_v38 = vrot.slane %v337_v10, 4 }
 0x104   :  { %v477_v49 = vadd.f32 %v6354_v60, %v181_v40  ;;  %v1741_v7 = vsel %vm1687_vm2, %v1640_v0, %v1740_v13  ;;  %v408_v57 = vrot.slane %v407_v25, 4  ;;  %v6359_v18 = vunpack.c.l.bf16 %v6062_v41  ;;  %v5278_v41 = vld [vmem:[#allocation5 + $0xa00] ss:$20 sps:$4 sm:$0xff]  }
 0x105   :  { %v547_v31 = vadd.f32 %v6356_v19, %v6355_v50  ;;  %v617_v45 = vadd.f32 %v6358_v35, %v6357_v52  ;;  %v6360_v40 = vunpack.c.l.bf16 %v6066_v37  ;;  %v1742_v62 = vsel %vm1689_vm3, %v1650_v26, %v1741_v7  ;;  %v5286_v37 = vld [vmem:[#allocation5 + $0xc5c] ss:$20 sps:$4 sm:$0xff]   ;;  %v5292_v13 = vld [vmem:[#allocation5 + $0xc34] ss:$20 sps:$4 sm:$0xff]  }
 0x106   :  { %4035 = vmatpush1.bf16.msra.mxu0 %v5266_v15  ;;  %v478_v5 = vrot.slane %v477_v49, 4  ;;  %v1743_v28 = vsel %vm1691_vm4, %v1660_v54, %v1742_v62  ;;  %v339_v59 = vadd.f32 %v338_v38, %v337_v10  ;;  %v409_v32 = vadd.f32 %v408_v57, %v407_v25  ;;  %v5284_v25 = vld [vmem:[#allocation5 + $0xc58] ss:$20 sps:$4 sm:$0xff]   ;;  %v5290_v57 = vld [vmem:[#allocation5 + $0xc30] ss:$20 sps:$4 sm:$0xff]  }
 0x107   :  { %v687_v58 = vadd.f32 %v6360_v40, %v6359_v18  ;;  %4036 = vmatprep.subr.bf16.mxu0 %v5274_v42  ;;  %v548_v23 = vrot.slane %v547_v31, 4  ;;  %v618_v53 = vrot.slane %v617_v45, 4  ;;  %v1744_v21 = vsel %vm1693_vm5, %v1670_v44, %v1743_v28  ;;  %v5298_v18 = vld [vmem:[#allocation5 + $0xc0c] ss:$20 sps:$4 sm:$0xff]  }
 0x108   :  { %v479_v1 = vadd.f32 %v478_v5, %v477_v49  ;;  %v1745_v61 = vsel %vm1695_vm6, %v1680_v4, %v1744_v21  ;;  %v340_v51 = vrot.slane %v339_v59, 2  ;;  %v410_v9 = vrot.slane %v409_v32, 2 }
 0x109   :  { %v688_v16 = vrot.slane %v687_v58, 4  ;;  %v549_v47 = vadd.f32 %v548_v23, %v547_v31  ;;  %v619_v2 = vadd.f32 %v618_v53, %v617_v45  ;;  %v6141_v43 = vpack.c.b16 %v1745_v61, %v1745_v61 }
 0x10a   :  { %4037 = vmatpush1.bf16.msra.mxu0 %v5272_v27  ;;  %v480_v29 = vrot.slane %v479_v1, 2  ;;  %v341_v42 = vadd.f32 %v340_v51, %v339_v59  ;;  %v411_v34 = vadd.f32 %v410_v9, %v409_v32  ;;  %v6361_v6 = vunpack.c.l.bf16 %v6068_v46  ;;  %v5296_v51 = vld [vmem:[#allocation5 + $0xc08] ss:$20 sps:$4 sm:$0xff]   ;;  %v5304_v9 = vld [vmem:[#allocation5 + $0xbe4] ss:$20 sps:$4 sm:$0xff]  }
 0x10b   :  { %v689_v12 = vadd.f32 %v688_v16, %v687_v58  ;;  %4038 = vmatprep.subr.bf16.mxu0 %v5280_v20  ;;  %v550_v56 = vrot.slane %v549_v47, 2  ;;  %v620_v15 = vrot.slane %v619_v2, 2  ;;  %v6362_v30 = vunpack.c.l.bf16 %v6070_v3  ;;  %4015 = vmatprep.mubr.bf16.mxu1 %v6141_v43 }
 0x10c   :  { %v481_v26 = vadd.f32 %v480_v29, %v479_v1  ;;  %v6363_v4 = vunpack.c.l.bf16 %v6075_v24  ;;  %v6364_v8 = vunpack.c.l.bf16 %v6084_v33  ;;  %v342_v60 = vrot.slane %v341_v42, 1 }
 0x10d   :  { %v690_v22 = vrot.slane %v689_v12, 2  ;;  %v757_v0 = vadd.f32 %v6362_v30, %v6361_v6  ;;  %v551_v54 = vadd.f32 %v550_v56, %v549_v47  ;;  %v621_v44 = vadd.f32 %v620_v15, %v619_v2  ;;  %v6152_v47 = vld [vmem:[#allocation2 + $0x48] sm:$0xff] }
 0x10e   :  { %v827_v10 = vadd.f32 %v6364_v8, %v6363_v4  ;;  %v412_v49 = vrot.slane %v411_v34, 1  ;;  %4039 = vmatpush1.bf16.msra.mxu0 %v5278_v41  ;;  %v482_v46 = vrot.slane %v481_v26, 1  ;;  %v343_v35 = vadd.f32 %v342_v60, %v341_v42  ;;  %v6161_v8 = vld [vmem:[#allocation2 + $0xe8] sm:$0xff] }
 0x10f   :  { %v691_v50 = vadd.f32 %v690_v22, %v689_v12  ;;  %v758_v19 = vrot.slane %v757_v0, 4  ;;  %v552_v3 = vrot.slane %v551_v54, 1  ;;  %v622_v31 = vrot.slane %v621_v44, 1  ;;  %4040 = vmatprep.subr.bf16.mxu0 %v5286_v37  ;;  %v6154_v12 = vld [vmem:[#allocation2 + $0x70] sm:$0xff] }
 0x110   :  { %v828_v52 = vrot.slane %v827_v10, 4  ;;  %v413_v45 = vadd.f32 %v412_v49, %v411_v34  ;;  %v483_v24 = vadd.f32 %v482_v46, %v481_v26  ;;  %v862_v62 = vmul.f32 0.0625, %v343_v35  ;;  %v6156_v34 = vld [vmem:[#allocation2 + $0x98] sm:$0xff]  ;;  %v6158_v26 = vld [vmem:[#allocation2 + $0xc0] sm:$0xff] }
 0x111   :  { %v692_v27 = vrot.slane %v691_v50, 1  ;;  %v759_v20 = vadd.f32 %v758_v19, %v757_v0  ;;  %v553_v7 = vadd.f32 %v552_v3, %v551_v54  ;;  %v623_v33 = vadd.f32 %v622_v31, %v621_v44  ;;  %v5302_v49 = vld [vmem:[#allocation5 + $0xbe0] ss:$20 sps:$4 sm:$0xff]   ;;  %v6167_v19 = vld [vmem:[#allocation2 + $0x138] sm:$0xff] }
 0x112   :  { %v829_v38 = vadd.f32 %v828_v52, %v827_v10  ;;  %v872_v5 = vmul.f32 0.0625, %v413_v45  ;;  %4041 = vmatpush2.bf16.msra.mxu0 %v5284_v25  ;;  %v882_v53 = vmul.f32 0.0625, %v483_v24  ;;  %v942_v21 = vpack.c.bf16 %v862_v62, %v862_v62  ;;  %v6163_v10 = vld [vmem:[#allocation2 + $0x110] sm:$0xff]  ;;  %v6172_v35 = vld [vmem:[#allocation2 + $0x160] sm:$0xff]  ;;  %v6174_v45 = vld [vmem:[#allocation2 + $0x188] sm:$0xff] }
 0x113   :  { %v693_v40 = vadd.f32 %v692_v27, %v691_v50  ;;  %v760_v58 = vrot.slane %v759_v20, 2  ;;  %v892_v28 = vmul.f32 0.0625, %v553_v7  ;;  %v902_v59 = vmul.f32 0.0625, %v623_v33  ;;  %4042 = vmatprep.subr.bf16.mxu0 %v5292_v13  ;;  %v5310_v50 = vld [vmem:[#allocation5 + $0xbbc] ss:$20 sps:$4 sm:$0xff]   ;;  %v6186_v62 = vld [vmem:[#allocation2 + $0x200] sm:$0xff] }
 0x114   :  { %v830_v23 = vrot.slane %v829_v38, 2  ;;  %v952_v1 = vpack.c.bf16 %v872_v5, %v872_v5  ;;  %v962_v41 = vpack.c.bf16 %v882_v53, %v882_v53  ;;  %v1609_v15 = vunpack.c.l.b16 %v942_v21  ;;  %v6179_v33 = vld [vmem:[#allocation2 + $0x1b0] sm:$0xff] }
 0x115   :  { %v761_v32 = vadd.f32 %v760_v58, %v759_v20  ;;  %v912_v16 = vmul.f32 0.0625, %v693_v40  ;;  %v972_v37 = vpack.c.bf16 %v892_v28, %v892_v28  ;;  %v982_v61 = vpack.c.bf16 %v902_v59, %v902_v59  ;;  %v6184_v58 = vld [vmem:[#allocation2 + $0x1d8] sm:$0xff]  ;;  %v5316_v59 = vld [vmem:[#allocation5 + $0xb94] ss:$20 sps:$4 sm:$0xff]  }
 0x116   :  { %v831_v2 = vadd.f32 %v830_v23, %v829_v38  ;;  %v1619_v42 = vunpack.c.l.b16 %v952_v1  ;;  %4043 = vmatpush2.bf16.msra.mxu0 %v5290_v57  ;;  %v1629_v6 = vunpack.c.l.b16 %v962_v41  ;;  %v144_v25 = vunpack.c.h.bf16 %v6093_v48  ;;  %v5308_v28 = vld [vmem:[#allocation5 + $0xbb8] ss:$20 sps:$4 sm:$0xff]   ;;  %v6195_v41 = vld [vmem:[#allocation2 + $0x250] sm:$0xff] }
 0x117   :  { %v762_v29 = vrot.slane %v761_v32, 1  ;;  %v992_v56 = vpack.c.bf16 %v912_v16, %v912_v16  ;;  %v1639_v30 = vunpack.c.l.b16 %v972_v37  ;;  %v1649_v0 = vunpack.c.l.b16 %v982_v61  ;;  %4044 = vmatprep.subr.bf16.mxu0 %v5298_v18 }
 0x118   :  { %v832_v22 = vrot.slane %v831_v2, 1  ;;  %v1732_v4 = vsel %vm1683_vm0, %v1619_v42, %v1609_v15  ;;  %v153_v46 = vunpack.c.l.bf16 %v6152_v47  ;;  %v154_v3 = vunpack.c.h.bf16 %v6152_v47 }
 0x119   :  { %v763_v54 = vadd.f32 %v762_v29, %v761_v32  ;;  %v1659_v44 = vunpack.c.l.b16 %v992_v56  ;;  %v1733_v60 = vsel %vm1685_vm1, %v1629_v6, %v1732_v4  ;;  %v163_v27 = vunpack.c.l.bf16 %v6154_v12  ;;  %v6190_v32 = vld [vmem:[#allocation2 + $0x228] sm:$0xff]  ;;  %v5247_v4 = vld [vmem:[#allocation5 + $0xfc] ss:$20 sps:$4 sm:$0xff]  }
 0x11a   :  { %v833_v13 = vadd.f32 %v832_v22, %v831_v2  ;;  %v1734_v52 = vsel %vm1687_vm2, %v1639_v30, %v1733_v60  ;;  %4045 = vmatpush2.bf16.msra.mxu0 %v5296_v51  ;;  %v164_v20 = vunpack.c.h.bf16 %v6154_v12  ;;  %v174_v57 = vunpack.c.h.bf16 %v6156_v34  ;;  %v6204_v22 = vld [vmem:[#allocation2 + $0x278] sm:$0xff] }
 0x11b   :  { %v922_v31 = vmul.f32 0.0625, %v763_v54  ;;  %v1735_v7 = vsel %vm1689_vm3, %v1649_v0, %v1734_v52  ;;  %4046 = vmatprep.subr.bf16.mxu0 %v5304_v9  ;;  %v184_v23 = vunpack.c.h.bf16 %v6158_v26  ;;  %v194_v21 = vunpack.c.h.bf16 %v6161_v8 }
 0x11c   :  { %v932_v24 = vmul.f32 0.0625, %v833_v13  ;;  %v1736_v40 = vsel %vm1691_vm4, %v1659_v44, %v1735_v7  ;;  %v204_v37 = vunpack.c.h.bf16 %v6163_v10  ;;  %v214_v51 = vunpack.c.h.bf16 %v6167_v19  ;;  %v5239_v44 = vld [vmem:[#allocation5 + $0x120] ss:$20 sps:$4 sm:$0xff]   ;;  %v5328_v13 = vld [vmem:[#allocation5 + $0xb44] ss:$20 sps:$4 sm:$0xff]  }
 0x11d   :  { %v1002_v18 = vpack.c.bf16 %v922_v31, %v922_v31  ;;  %v224_v56 = vunpack.c.h.bf16 %v6172_v35  ;;  %v234_v6 = vunpack.c.h.bf16 %v6174_v45  ;;  %v244_v0 = vunpack.c.h.bf16 %v6179_v33  ;;  %v5314_v31 = vld [vmem:[#allocation5 + $0xb90] ss:$20 sps:$4 sm:$0xff]  }
 0x11e   :  { %v1012_v53 = vpack.c.bf16 %v932_v24, %v932_v24  ;;  %4047 = vmatpush2.bf16.msra.mxu0 %v5302_v49  ;;  %v254_v60 = vunpack.c.h.bf16 %v6184_v58  ;;  %v264_v52 = vunpack.c.h.bf16 %v6186_v62  ;;  %v274_v7 = vunpack.c.h.bf16 %v6190_v32  ;;  %v5253_v49 = vld [vmem:[#allocation5 + $0xd4] ss:$20 sps:$4 sm:$0xff]  }
 0x11f   :  { %v1669_v2 = vunpack.c.l.b16 %v1002_v18  ;;  %4048 = vmatprep.subr.bf16.mxu0 %v5310_v50  ;;  %v5322_v18 = vld [vmem:[#allocation5 + $0xb6c] ss:$20 sps:$4 sm:$0xff]   ;;  %v498_v24 = vadd.f32 %v194_v21, %v184_v23  ;;  %v638_v30 = vadd.f32 %v234_v6, %v224_v56  ;;  %v6368_v48 = vunpack.c.l.bf16 %v6163_v10 }
 0x120   :  { %v1679_v9 = vunpack.c.l.b16 %v1012_v53  ;;  %v284_v53 = vunpack.c.h.bf16 %v6195_v41  ;;  %v708_v15 = vadd.f32 %v254_v60, %v244_v0  ;;  %v5259_v56 = vld [vmem:[#allocation5 + $0xac] ss:$20 sps:$4 sm:$0xff]   ;;  %v6369_v47 = vunpack.c.l.bf16 %v6167_v19 }
 0x121   :  { %v1737_v42 = vsel %vm1693_vm5, %v1669_v2, %v1736_v40  ;;  %v5320_v40 = vld [vmem:[#allocation5 + $0xb68] ss:$20 sps:$4 sm:$0xff]   ;;  %v778_v2 = vadd.f32 %v274_v7, %v264_v52  ;;  %v499_v16 = vrot.slane %v498_v24, 4  ;;  %v639_v38 = vrot.slane %v638_v30, 4  ;;  %v5326_v6 = vld [vmem:[#allocation5 + $0xb40] ss:$20 sps:$4 sm:$0xff]  }
 0x122   :  { %v1738_v54 = vsel %vm1695_vm6, %v1679_v9, %v1737_v42  ;;  %4049 = vmatpush2.bf16.msra.mxu0 %v5308_v28  ;;  %v294_v9 = vunpack.c.h.bf16 %v6204_v22  ;;  %v5245_v28 = vld [vmem:[#allocation5 + $0xf8] ss:$20 sps:$4 sm:$0xff]   ;;  %v358_v42 = vadd.f32 %v154_v3, %v144_v25  ;;  %v709_v25 = vrot.slane %v708_v15, 4 }
 0x123   :  { %v6213_v50 = vpack.c.b16 %v1738_v54, %v1738_v54  ;;  %4050 = vmatprep.subr.bf16.mxu0 %v5316_v59  ;;  %v428_v54 = vadd.f32 %v174_v57, %v164_v20  ;;  %v568_v59 = vadd.f32 %v214_v51, %v204_v37  ;;  %v779_v3 = vrot.slane %v778_v2, 4  ;;  %v5251_v57 = vld [vmem:[#allocation5 + $0xd0] ss:$20 sps:$4 sm:$0xff]  }
 0x124   :  { %v848_v29 = vadd.f32 %v294_v9, %v284_v53  ;;  %v359_v61 = vrot.slane %v358_v42, 4  ;;  %v500_v37 = vadd.f32 %v499_v16, %v498_v24  ;;  %v640_v0 = vadd.f32 %v639_v38, %v638_v30  ;;  %v5257_v38 = vld [vmem:[#allocation5 + $0xa8] ss:$20 sps:$4 sm:$0xff]  }
 0x125   :  { %4016 = vmatmul.mubr.bf16.vlgmr.msra.gmra.mxu1 %v6213_v50  ;;  %v429_v1 = vrot.slane %v428_v54, 4  ;;  %v569_v5 = vrot.slane %v568_v59, 4  ;;  %v6370_v12 = vunpack.c.l.bf16 %v6172_v35 }
 0x126   :  { %4066 = vmatpush1.bf16.msra.mxu1 %v5239_v44  ;;  %4051 = vmatpush2.bf16.msra.mxu0 %v5314_v31  ;;  %v849_v20 = vrot.slane %v848_v29, 4  ;;  %v360_v23 = vadd.f32 %v359_v61, %v358_v42  ;;  %v710_v44 = vadd.f32 %v709_v25, %v708_v15  ;;  %v5334_v31 = vld [vmem:[#allocation5 + $0x3a4] ss:$20 sps:$4 sm:$0xff]   ;;  %v641_v9 = vrot.slane %v640_v0, 2 }
 0x127   :  { %4067 = vmatprep.subr.bf16.mxu1 %v5247_v4  ;;  %4052 = vmatprep.subr.bf16.mxu0 %v5322_v18  ;;  %v430_v21 = vadd.f32 %v429_v1, %v428_v54  ;;  %v570_v51 = vadd.f32 %v569_v5, %v568_v59  ;;  %v780_v4 = vadd.f32 %v779_v3, %v778_v2  ;;  %v501_v18 = vrot.slane %v500_v37, 2  ;;  %v5265_v15 = vld [vmem:[#allocation5 + $0x84] ss:$20 sps:$4 sm:$0xff]  }
 0x128   :  { %4097 = vmatprep.mubr.bf16.mxu1 %v5824_v11  ;;  %v850_v60 = vadd.f32 %v849_v20, %v848_v29  ;;  %v361_v52 = vrot.slane %v360_v23, 2  ;;  %v711_v61 = vrot.slane %v710_v44, 2  ;;  %v642_v29 = vadd.f32 %v641_v9, %v640_v0  ;;  %v5263_v0 = vld [vmem:[#allocation5 + $0x80] ss:$20 sps:$4 sm:$0xff]  }
 0x129   :  { %v431_v7 = vrot.slane %v430_v21, 2  ;;  %v571_v53 = vrot.slane %v570_v51, 2  ;;  %v781_v1 = vrot.slane %v780_v4, 2 }
 0x12a   :  { %4068 = vmatpush1.bf16.msra.mxu1 %v5245_v28  ;;  %4053 = vmatpush2.bf16.msra.mxu0 %v5320_v40  ;;  %v851_v16 = vrot.slane %v850_v60, 2  ;;  %v362_v5 = vadd.f32 %v361_v52, %v360_v23  ;;  %v502_v28 = vadd.f32 %v501_v18, %v500_v37  ;;  %v712_v30 = vadd.f32 %v711_v61, %v710_v44  ;;  %v5271_v44 = vld [vmem:[#allocation5 + $0x5c] ss:$20 sps:$4 sm:$0xff]  }
 0x12b   :  { %4069 = vmatprep.subr.bf16.mxu1 %v5253_v49  ;;  %4054 = vmatprep.subr.bf16.mxu0 %v5328_v13  ;;  %v432_v24 = vadd.f32 %v431_v7, %v430_v21  ;;  %v572_v42 = vadd.f32 %v571_v53, %v570_v51  ;;  %v782_v49 = vadd.f32 %v781_v1, %v780_v4  ;;  %v643_v25 = vrot.slane %v642_v29, 1 }
 0x12c   :  { %v852_v40 = vadd.f32 %v851_v16, %v850_v60  ;;  %v363_v2 = vrot.slane %v362_v5, 1  ;;  %v503_v13 = vrot.slane %v502_v28, 1  ;;  %v713_v3 = vrot.slane %v712_v30, 1 }
 0x12d   :  { %v433_v54 = vrot.slane %v432_v24, 1  ;;  %v573_v59 = vrot.slane %v572_v42, 1  ;;  %v783_v20 = vrot.slane %v782_v49, 1  ;;  %v644_v4 = vadd.f32 %v643_v25, %v642_v29 }
 0x12e   :  { %4070 = vmatpush1.bf16.msra.mxu1 %v5251_v57  ;;  %4055 = vmatpush2.bf16.msra.mxu0 %v5326_v6  ;;  %v853_v23 = vrot.slane %v852_v40, 1  ;;  %v364_v21 = vadd.f32 %v363_v2, %v362_v5  ;;  %v504_v57 = vadd.f32 %v503_v13, %v502_v28  ;;  %v714_v60 = vadd.f32 %v713_v3, %v712_v30 }
 0x12f   :  { %4071 = vmatprep.subr.bf16.mxu1 %v5259_v56  ;;  %4106 = vmatprep.subr.bf16.mxu0 %v5334_v31  ;;  %v434_v37 = vadd.f32 %v433_v54, %v432_v24  ;;  %v574_v51 = vadd.f32 %v573_v59, %v572_v42  ;;  %v784_v56 = vadd.f32 %v783_v20, %v782_v49  ;;  %v905_v9 = vmul.f32 0.0625, %v644_v4  ;;  %v5269_v42 = vld [vmem:[#allocation5 + $0x58] ss:$20 sps:$4 sm:$0xff]   ;;  %v5275_v4 = vld [vmem:[#allocation5 + $0x30] ss:$20 sps:$4 sm:$0xff]  }
 0x130   :  { %v854_v6 = vadd.f32 %v853_v23, %v852_v40  ;;  %v865_v52 = vmul.f32 0.0625, %v364_v21  ;;  %v885_v18 = vmul.f32 0.0625, %v504_v57  ;;  %v915_v61 = vmul.f32 0.0625, %v714_v60  ;;  %v5283_v60 = vld [vmem:[#allocation5 + $0xc] ss:$20 sps:$4 sm:$0xff]  }
 0x131   :  { %v875_v7 = vmul.f32 0.0625, %v434_v37  ;;  %v895_v53 = vmul.f32 0.0625, %v574_v51  ;;  %v925_v1 = vmul.f32 0.0625, %v784_v56  ;;  %v985_v29 = vpack.c.bf16 %v905_v9, %v905_v9 }
 0x132   :  { %4072 = vmatpush1.bf16.msra.mxu1 %v5257_v38  ;;  %v935_v31 = vmul.f32 0.0625, %v854_v6  ;;  %v945_v16 = vpack.c.bf16 %v865_v52, %v865_v52  ;;  %v965_v24 = vpack.c.bf16 %v885_v18, %v885_v18  ;;  %v5277_v38 = vld [vmem:[#allocation5 + $0x34] ss:$20 sps:$4 sm:$0xff]   ;;  %v995_v30 = vpack.c.bf16 %v915_v61, %v915_v61 }
 0x133   :  { %4073 = vmatprep.subr.bf16.mxu1 %v5265_v15  ;;  %v955_v5 = vpack.c.bf16 %v875_v7, %v875_v7  ;;  %v975_v28 = vpack.c.bf16 %v895_v53, %v895_v53  ;;  %v1005_v49 = vpack.c.bf16 %v925_v1, %v925_v1  ;;  %v1652_v59 = vunpack.c.l.b16 %v985_v29 }
 0x134   :  { %v1015_v40 = vpack.c.bf16 %v935_v31, %v935_v31  ;;  %v1612_v15 = vunpack.c.l.b16 %v945_v16  ;;  %v1632_v54 = vunpack.c.l.b16 %v965_v24  ;;  %v1662_v25 = vunpack.c.l.b16 %v995_v30 }
 0x135   :  { %v1622_v2 = vunpack.c.l.b16 %v955_v5  ;;  %v1642_v13 = vunpack.c.l.b16 %v975_v28  ;;  %v1672_v3 = vunpack.c.l.b16 %v1005_v49  ;;  %v351_v21 = vadd.f32 %v153_v46, %v143_v36 }
 0x136   :  { %4074 = vmatpush1.bf16.msra.mxu1 %v5263_v0  ;;  %v1682_v20 = vunpack.c.l.b16 %v1015_v40  ;;  %v6365_v37 = vunpack.c.l.bf16 %v6156_v34  ;;  %v6366_v51 = vunpack.c.l.bf16 %v6158_v26  ;;  %v6367_v0 = vunpack.c.l.bf16 %v6161_v8 }
 0x137   :  { %4075 = vmatprep.subr.bf16.mxu1 %v5271_v44  ;;  %v1753_v23 = vsel %vm1683_vm0, %v1622_v2, %v1612_v15  ;;  %v561_v36 = vadd.f32 %v6369_v47, %v6368_v48  ;;  %v6371_v34 = vunpack.c.l.bf16 %v6174_v45  ;;  %v6372_v26 = vunpack.c.l.bf16 %v6179_v33  ;;  %v5281_v33 = vld [vmem:[#allocation5 + $0x8] ss:$20 sps:$4 sm:$0xff]  }
 0x138   :  { %v421_v57 = vadd.f32 %v6365_v37, %v163_v27  ;;  %v491_v44 = vadd.f32 %v6367_v0, %v6366_v51  ;;  %v1754_v56 = vsel %vm1685_vm1, %v1632_v54, %v1753_v23  ;;  %v6373_v8 = vunpack.c.l.bf16 %v6184_v58  ;;  %v5289_v58 = vld [vmem:[#allocation5 + $0x264] ss:$20 sps:$4 sm:$0xff]   ;;  %v5287_v23 = vld [vmem:[#allocation5 + $0x260] ss:$20 sps:$4 sm:$0xff]  }
 0x139   :  { %v631_v46 = vadd.f32 %v6371_v34, %v6370_v12  ;;  %v1755_v6 = vsel %vm1687_vm2, %v1642_v13, %v1754_v56  ;;  %v352_v52 = vrot.slane %v351_v21, 4  ;;  %v562_v19 = vrot.slane %v561_v36, 4 }
 0x13a   :  { %4076 = vmatpush1.bf16.msra.mxu1 %v5269_v42  ;;  %v701_v27 = vadd.f32 %v6373_v8, %v6372_v26  ;;  %v422_v7 = vrot.slane %v421_v57, 4  ;;  %v492_v18 = vrot.slane %v491_v44, 4  ;;  %v1756_v10 = vsel %vm1689_vm3, %v1652_v59, %v1755_v6  ;;  %v5293_v26 = vld [vmem:[#allocation5 + $0x238] ss:$20 sps:$4 sm:$0xff]  }
 0x13b   :  { %4077 = vmatprep.subr.bf16.mxu1 %v5277_v38  ;;  %v632_v53 = vrot.slane %v631_v46, 4  ;;  %v1757_v35 = vsel %vm1691_vm4, %v1662_v25, %v1756_v10  ;;  %v353_v45 = vadd.f32 %v352_v52, %v351_v21  ;;  %v563_v16 = vadd.f32 %v562_v19, %v561_v36  ;;  %v5295_v21 = vld [vmem:[#allocation5 + $0x23c] ss:$20 sps:$4 sm:$0xff]  }
 0x13c   :  { %v702_v9 = vrot.slane %v701_v27, 4  ;;  %v423_v61 = vadd.f32 %v422_v7, %v421_v57  ;;  %v493_v1 = vadd.f32 %v492_v18, %v491_v44  ;;  %v1758_v31 = vsel %vm1693_vm5, %v1672_v3, %v1757_v35  ;;  %v5301_v7 = vld [vmem:[#allocation5 + $0x214] ss:$20 sps:$4 sm:$0xff]  }
 0x13d   :  { %v633_v5 = vadd.f32 %v632_v53, %v631_v46  ;;  %v1759_v28 = vsel %vm1695_vm6, %v1682_v20, %v1758_v31  ;;  %v354_v42 = vrot.slane %v353_v45, 2  ;;  %v564_v49 = vrot.slane %v563_v16, 2 }
 0x13e   :  { %4078 = vmatpush1.bf16.msra.mxu1 %v5275_v4  ;;  %v703_v24 = vadd.f32 %v702_v9, %v701_v27  ;;  %v424_v38 = vrot.slane %v423_v61, 2  ;;  %v494_v29 = vrot.slane %v493_v1, 2  ;;  %v6259_v30 = vpack.c.b16 %v1759_v28, %v1759_v28 }
 0x13f   :  { %4079 = vmatprep.subr.bf16.mxu1 %v5283_v60  ;;  %v634_v40 = vrot.slane %v633_v5, 2  ;;  %v355_v2 = vadd.f32 %v354_v42, %v353_v45  ;;  %v6374_v59 = vunpack.c.l.bf16 %v6186_v62  ;;  %v6375_v25 = vunpack.c.l.bf16 %v6190_v32 }
 0x140   :  { %v704_v15 = vrot.slane %v703_v24, 2  ;;  %v425_v54 = vadd.f32 %v424_v38, %v423_v61  ;;  %v495_v13 = vadd.f32 %v494_v29, %v493_v1  ;;  %4056 = vmatprep.mubr.bf16.mxu0 %v6259_v30  ;;  %v565_v20 = vadd.f32 %v564_v49, %v563_v16  ;;  %v5299_v16 = vld [vmem:[#allocation5 + $0x210] ss:$20 sps:$4 sm:$0xff]   ;;  %v5307_v38 = vld [vmem:[#allocation5 + $0x1ec] ss:$20 sps:$4 sm:$0xff]  }
 0x141   :  { %v771_v3 = vadd.f32 %v6375_v25, %v6374_v59  ;;  %v635_v37 = vadd.f32 %v634_v40, %v633_v5  ;;  %v356_v51 = vrot.slane %v355_v2, 1  ;;  %v6376_v62 = vunpack.c.l.bf16 %v6195_v41 }
 0x142   :  { %4080 = vmatpush1.bf16.msra.mxu1 %v5281_v33  ;;  %v705_v57 = vadd.f32 %v704_v15, %v703_v24  ;;  %v426_v0 = vrot.slane %v425_v54, 1  ;;  %v496_v44 = vrot.slane %v495_v13, 1  ;;  %v566_v60 = vrot.slane %v565_v20, 1 }
 0x143   :  { %4081 = vmatprep.subr.bf16.mxu1 %v5289_v58  ;;  %v772_v4 = vrot.slane %v771_v3, 4  ;;  %v636_v56 = vrot.slane %v635_v37, 1  ;;  %v6377_v32 = vunpack.c.l.bf16 %v6204_v22  ;;  %v357_v36 = vadd.f32 %v356_v51, %v355_v2  ;;  %v5313_v51 = vld [vmem:[#allocation5 + $0x1c4] ss:$20 sps:$4 sm:$0xff]  }
 0x144   :  { %v706_v48 = vrot.slane %v705_v57, 1  ;;  %v427_v12 = vadd.f32 %v426_v0, %v425_v54  ;;  %v497_v34 = vadd.f32 %v496_v44, %v495_v13  ;;  %v567_v8 = vadd.f32 %v566_v60, %v565_v20 }
 0x145   :  { %v841_v47 = vadd.f32 %v6377_v32, %v6376_v62  ;;  %v773_v46 = vadd.f32 %v772_v4, %v771_v3  ;;  %v637_v27 = vadd.f32 %v636_v56, %v635_v37  ;;  %v864_v10 = vmul.f32 0.0625, %v357_v36 }
 0x146   :  { %4082 = vmatpush2.bf16.msra.mxu1 %v5287_v23  ;;  %v707_v6 = vadd.f32 %v706_v48, %v705_v57  ;;  %v874_v19 = vmul.f32 0.0625, %v427_v12  ;;  %v884_v53 = vmul.f32 0.0625, %v497_v34  ;;  %v6270_v41 = vpop.f32.mrf.mxu0  ;;  %v894_v9 = vmul.f32 0.0625, %v567_v8  ;;  %v5311_v48 = vld [vmem:[#allocation5 + $0x1c0] ss:$20 sps:$4 sm:$0xff]  }
 0x147   :  { %v842_v52 = vrot.slane %v841_v47, 4  ;;  %4083 = vmatprep.subr.bf16.mxu1 %v5295_v21  ;;  %v774_v18 = vrot.slane %v773_v46, 2  ;;  %v904_v35 = vmul.f32 0.0625, %v637_v27  ;;  %v944_v1 = vpack.c.bf16 %v864_v10, %v864_v10  ;;  %v5305_v21 = vld [vmem:[#allocation5 + $0x1e8] ss:$20 sps:$4 sm:$0xff]  }
 0x148   :  { %v914_v45 = vmul.f32 0.0625, %v707_v6  ;;  %v954_v33 = vpack.c.bf16 %v874_v19, %v874_v19  ;;  %v964_v58 = vpack.c.bf16 %v884_v53, %v884_v53  ;;  %v6272_v31 = vpop.f32.mrf.mxu0  ;;  %v974_v24 = vpack.c.bf16 %v894_v9, %v894_v9  ;;  %v5332_v27 = vld [vmem:[#allocation5 + $0x3a0] ss:$20 sps:$4 sm:$0xff]   ;;  %v5338_v19 = vld [vmem:[#allocation5 + $0x378] ss:$20 sps:$4 sm:$0xff]  }
 0x149   :  { %v843_v22 = vadd.f32 %v842_v52, %v841_v47  ;;  %v775_v61 = vadd.f32 %v774_v18, %v773_v46  ;;  %v984_v28 = vpack.c.bf16 %v904_v35, %v904_v35  ;;  %v1611_v49 = vunpack.c.l.b16 %v944_v1  ;;  %v5319_v47 = vld [vmem:[#allocation5 + $0x19c] ss:$20 sps:$4 sm:$0xff]   ;;  %v5317_v46 = vld [vmem:[#allocation5 + $0x198] ss:$20 sps:$4 sm:$0xff]   ;;  %v5346_v53 = vld [vmem:[#allocation5 + $0x354] ss:$20 sps:$4 sm:$0xff]  }
 0x14a   :  { %4084 = vmatpush2.bf16.msra.mxu1 %v5293_v26  ;;  %v994_v42 = vpack.c.bf16 %v914_v45, %v914_v45  ;;  %v1621_v40 = vunpack.c.l.b16 %v954_v33  ;;  %v1631_v15 = vunpack.c.l.b16 %v964_v58  ;;  %v3898_v2 = vpop.f32.mrf.mxu0  ;;  %v1641_v13 = vunpack.c.l.b16 %v974_v24  ;;  %v5325_v26 = vld [vmem:[#allocation5 + $0x174] ss:$20 sps:$4 sm:$0xff]   ;;  %v5323_v18 = vld [vmem:[#allocation5 + $0x170] ss:$20 sps:$4 sm:$0xff]   ;;  %v5331_v10 = vld [vmem:[#allocation5 + $0x14c] ss:$20 sps:$4 sm:$0xff]  }
 0x14b   :  { %v844_v5 = vrot.slane %v843_v22, 2  ;;  %4085 = vmatprep.subr.bf16.mxu1 %v5301_v7  ;;  %v776_v29 = vrot.slane %v775_v61, 1  ;;  %v1651_v59 = vunpack.c.l.b16 %v984_v28  ;;  %v5340_v7 = vld [vmem:[#allocation5 + $0x37c] ss:$20 sps:$4 sm:$0xff]   ;;  %v5337_v9 = vld [vmem:[#allocation5 + $0x624] ss:$20 sps:$4 sm:$0xff]   ;;  %v1498_v24 = vlaneseq }
 0x14c   :  { %v1746_v3 = vsel %vm1683_vm0, %v1621_v40, %v1611_v49  ;;  %v3899_v23 = vpop.f32.mrf.mxu0  ;;  %v1661_v37 = vunpack.c.l.b16 %v994_v42  ;;  %v5344_v35 = vld [vmem:[#allocation5 + $0x350] ss:$20 sps:$4 sm:$0xff]   ;;  %v5352_v45 = vld [vmem:[#allocation5 + $0x32c] ss:$20 sps:$4 sm:$0xff]   ;;  %v5350_v33 = vld [vmem:[#allocation5 + $0x328] ss:$20 sps:$4 sm:$0xff]  }
 0x14d   :  { %v845_v54 = vadd.f32 %v844_v5, %v843_v22  ;;  %v777_v25 = vadd.f32 %v776_v29, %v775_v61  ;;  %v1747_v57 = vsel %vm1685_vm1, %v1631_v15, %v1746_v3  ;;  %v5329_v22 = vld [vmem:[#allocation5 + $0x148] ss:$20 sps:$4 sm:$0xff]   ;;  %v5335_v61 = vld [vmem:[#allocation5 + $0x620] ss:$20 sps:$4 sm:$0xff]   ;;  %v5358_v58 = vld [vmem:[#allocation5 + $0x304] ss:$20 sps:$4 sm:$0xff]  }
 0x14e   :  { %4086 = vmatpush2.bf16.msra.mxu1 %v5299_v16  ;;  %v1748_v44 = vsel %vm1687_vm2, %v1641_v13, %v1747_v57  ;;  %v5343_v1 = vld [vmem:[#allocation5 + $0x5fc] ss:$20 sps:$4 sm:$0xff]   ;;  %v5341_v16 = vld [vmem:[#allocation5 + $0x5f8] ss:$20 sps:$4 sm:$0xff]   ;;  %v5349_v5 = vld [vmem:[#allocation5 + $0x5d4] ss:$20 sps:$4 sm:$0xff]  }
 0x14f   :  { %v846_v20 = vrot.slane %v845_v54, 1  ;;  %4087 = vmatprep.subr.bf16.mxu1 %v5307_v38  ;;  %v924_v0 = vmul.f32 0.0625, %v777_v25  ;;  %v1749_v60 = vsel %vm1689_vm3, %v1651_v59, %v1748_v44  ;;  %v5347_v28 = vld [vmem:[#allocation5 + $0x5d0] ss:$20 sps:$4 sm:$0xff]   ;;  %v5356_v42 = vld [vmem:[#allocation5 + $0x300] ss:$20 sps:$4 sm:$0xff]  }
 0x150   :  { %v1750_v32 = vsel %vm1691_vm4, %v1661_v37, %v1749_v60  ;;  %v5364_v38 = vld [vmem:[#allocation5 + $0x2dc] ss:$20 sps:$4 sm:$0xff]   ;;  %v5355_v29 = vld [vmem:[#allocation5 + $0x5ac] ss:$20 sps:$4 sm:$0xff]   ;;  %v6287_v40 = vshrl.u32 %v1498_v24, 7 }
 0x151   :  { %v847_v4 = vadd.f32 %v846_v20, %v845_v54  ;;  %v1004_v56 = vpack.c.bf16 %v924_v0, %v924_v0  ;;  %v5362_v49 = vld [vmem:[#allocation5 + $0x2d8] ss:$20 sps:$4 sm:$0xff]   ;;  %v5370_v15 = vld [vmem:[#allocation5 + $0x2b4] ss:$20 sps:$4 sm:$0xff]   ;;  %v5368_v13 = vld [vmem:[#allocation5 + $0x2b0] ss:$20 sps:$4 sm:$0xff]  }
 0x152   :  { %4088 = vmatpush2.bf16.msra.mxu1 %v5305_v21  ;;  %v5353_v2 = vld [vmem:[#allocation5 + $0x5a8] ss:$20 sps:$4 sm:$0xff]   ;;  %v5361_v54 = vld [vmem:[#allocation5 + $0x584] ss:$20 sps:$4 sm:$0xff]   ;;  %v1500_v59 = vsub.s32 0, %v6287_v40  ;;  %v1504_v21 = vsub.s32 1, %v6287_v40 }
 0x153   :  { %v934_v62 = vmul.f32 0.0625, %v847_v4  ;;  %4089 = vmatprep.subr.bf16.mxu1 %v5313_v51  ;;  %v1671_v36 = vunpack.c.l.b16 %v1004_v56  ;;  %v5376_v25 = vld [vmem:[#allocation5 + $0x28c] ss:$20 sps:$4 sm:$0xff]   ;;  %v5367_v20 = vld [vmem:[#allocation5 + $0x55c] ss:$20 sps:$4 sm:$0xff]  }
 0x154   :  { %v6290_v3 = vld [vmem:[#allocation7] sm:$0x1f]  ;;  %v5374_v37 = vld [vmem:[#allocation5 + $0x288] ss:$20 sps:$4 sm:$0xff]   ;;  %v5365_v0 = vld [vmem:[#allocation5 + $0x558] ss:$20 sps:$4 sm:$0xff]  }
 0x155   :  { %v1014_v12 = vpack.c.bf16 %v934_v62, %v934_v62  ;;  %v1751_v34 = vsel %vm1693_vm5, %v1671_v36, %v1750_v32  ;;  %v5359_v23 = vld [vmem:[#allocation5 + $0x580] ss:$20 sps:$4 sm:$0xff]   ;;  %v1501_v57 = vrot.slane %v6290_v3, %v1500_v59  ;;  %v5382_v51 = vld [vmem:[#allocation5 + $0x4e4] ss:$20 sps:$4 sm:$0xff]   ;;  %v1505_v44 = vrot.slane %v6290_v3, %v1504_v21  ;;  %v5436_v59 = vld [vmem:[#allocation5 + $0x87c] ss:$20 sps:$4 sm:$0xff]  }
 0x156   :  { %4090 = vmatpush2.bf16.msra.mxu1 %v5311_v48  ;;  %v5373_v4 = vld [vmem:[#allocation5 + $0x534] ss:$20 sps:$4 sm:$0xff]   ;;  %v5388_v48 = vld [vmem:[#allocation5 + $0x4bc] ss:$20 sps:$4 sm:$0xff]   ;;  %v5409_v24 = vld [vmem:[#allocation5 + $0x6c4] ss:$20 sps:$4 sm:$0xff]  }
 0x157   :  { %v1681_v8 = vunpack.c.l.b16 %v1014_v12  ;;  %4091 = vmatprep.subr.bf16.mxu1 %v5319_v47  ;;  %v5380_v60 = vld [vmem:[#allocation5 + $0x4e0] ss:$20 sps:$4 sm:$0xff]   ;;  %v3895_v56 = vadd.f32 %v6270_v41, %v1501_v57  ;;  %v5371_v62 = vld [vmem:[#allocation5 + $0x530] ss:$20 sps:$4 sm:$0xff]   ;;  %v3897_v32 = vadd.f32 %v6272_v31, %v1505_v44  ;;  %v5386_v12 = vld [vmem:[#allocation5 + $0x4b8] ss:$20 sps:$4 sm:$0xff]  }
 0x158   :  { %v5379_v47 = vld [vmem:[#allocation5 + $0x50c] ss:$20 sps:$4 sm:$0xff]   ;;  %v5385_v41 = vld [vmem:[#allocation5 + $0x764] ss:$20 sps:$4 sm:$0xff]  }
 0x159   :  { %v1752_v6 = vsel %vm1695_vm6, %v1681_v8, %v1751_v34  ;;  %v5377_v8 = vld [vmem:[#allocation5 + $0x508] ss:$20 sps:$4 sm:$0xff]   ;;  %v5400_v31 = vld [vmem:[#allocation5 + $0x46c] ss:$20 sps:$4 sm:$0xff]   ;;  %v5433_v57 = vld [vmem:[#allocation5 + $0xb24] ss:$20 sps:$4 sm:$0xff]  }
 0x15a   :  { %v6281_v52 = vpack.c.b16 %v1752_v6, %v1752_v6  ;;  %4092 = vmatpush2.bf16.msra.mxu1 %v5317_v46  ;;  %v5394_v46 = vld [vmem:[#allocation5 + $0x494] ss:$20 sps:$4 sm:$0xff]   ;;  %v5434_v21 = vld [vmem:[#allocation5 + $0x878] ss:$20 sps:$4 sm:$0xff]  }
 0x15b   :  { %4093 = vmatprep.subr.bf16.mxu1 %v5325_v26  ;;  %v5431_v44 = vld [vmem:[#allocation5 + $0xb20] ss:$20 sps:$4 sm:$0xff]  }
 0x15c   :  { %4057 = vmatmul.mubr.bf16.vlgmr.msra.gmra.mxu0 %v6281_v52 }
 0x15d   :  { %4107 = vmatpush1.bf16.msra.mxu0 %v5332_v27  ;;  %4138 = vmatprep.mubr.bf16.mxu0 %v5908_v63 }
 0x15e   :  { %4108 = vmatprep.subr.bf16.mxu0 %v5340_v7  ;;  %4094 = vmatpush2.bf16.msra.mxu1 %v5323_v18  ;;  %v5392_v7 = vld [vmem:[#allocation5 + $0x490] ss:$20 sps:$4 sm:$0xff]  }
 0x15f   :  { %4095 = vmatprep.subr.bf16.mxu1 %v5331_v10  ;;  %v5383_v10 = vld [vmem:[#allocation5 + $0x760] ss:$20 sps:$4 sm:$0xff]  }
 0x161   :  { %4109 = vmatpush1.bf16.msra.mxu0 %v5338_v19  ;;  %v5391_v19 = vld [vmem:[#allocation5 + $0x73c] ss:$20 sps:$4 sm:$0xff]  }
 0x162   :  { %4110 = vmatprep.subr.bf16.mxu0 %v5346_v53  ;;  %4096 = vmatpush2.bf16.msra.mxu1 %v5329_v22  ;;  %v5398_v53 = vld [vmem:[#allocation5 + $0x468] ss:$20 sps:$4 sm:$0xff]   ;;  %v5406_v22 = vld [vmem:[#allocation5 + $0x444] ss:$20 sps:$4 sm:$0xff]  }
 0x163   :  { %4147 = vmatprep.subr.bf16.mxu1 %v5337_v9  ;;  %v5389_v9 = vld [vmem:[#allocation5 + $0x738] ss:$20 sps:$4 sm:$0xff]  }
 0x165   :  { %4111 = vmatpush1.bf16.msra.mxu0 %v5344_v35  ;;  %4098 = vmatmul.mubr.bf16.vlgmr.msra.gmra.mxu1 %v5882_v39  ;;  %v5397_v35 = vld [vmem:[#allocation5 + $0x714] ss:$20 sps:$4 sm:$0xff]  }
 0x166   :  { %4112 = vmatprep.subr.bf16.mxu0 %v5352_v45  ;;  %4148 = vmatpush1.bf16.msra.mxu1 %v5335_v61  ;;  %v5404_v45 = vld [vmem:[#allocation5 + $0x440] ss:$20 sps:$4 sm:$0xff]   ;;  %v5412_v61 = vld [vmem:[#allocation5 + $0x41c] ss:$20 sps:$4 sm:$0xff]  }
 0x167   :  { %4179 = vmatprep.mubr.bf16.mxu1 %v6021_v17  ;;  %4149 = vmatprep.subr.bf16.mxu1 %v5343_v1  ;;  %v5395_v1 = vld [vmem:[#allocation5 + $0x710] ss:$20 sps:$4 sm:$0xff]  }
 0x169   :  { %4113 = vmatpush1.bf16.msra.mxu0 %v5350_v33  ;;  %v5403_v33 = vld [vmem:[#allocation5 + $0x6ec] ss:$20 sps:$4 sm:$0xff]  }
 0x16a   :  { %4114 = vmatprep.subr.bf16.mxu0 %v5358_v58  ;;  %4150 = vmatpush1.bf16.msra.mxu1 %v5341_v16  ;;  %v5410_v58 = vld [vmem:[#allocation5 + $0x418] ss:$20 sps:$4 sm:$0xff]   ;;  %v5418_v16 = vld [vmem:[#allocation5 + $0x3f4] ss:$20 sps:$4 sm:$0xff]  }
 0x16b   :  { %4151 = vmatprep.subr.bf16.mxu1 %v5349_v5  ;;  %v5401_v5 = vld [vmem:[#allocation5 + $0x6e8] ss:$20 sps:$4 sm:$0xff]  }
 0x16d   :  { %4115 = vmatpush1.bf16.msra.mxu0 %v5356_v42  ;;  %v5424_v42 = vld [vmem:[#allocation5 + $0x3cc] ss:$20 sps:$4 sm:$0xff]  }
 0x16e   :  { %4116 = vmatprep.subr.bf16.mxu0 %v5364_v38  ;;  %4152 = vmatpush1.bf16.msra.mxu1 %v5347_v28  ;;  %v5416_v28 = vld [vmem:[#allocation5 + $0x3f0] ss:$20 sps:$4 sm:$0xff]   ;;  %v5407_v38 = vld [vmem:[#allocation5 + $0x6c0] ss:$20 sps:$4 sm:$0xff]  }
 0x16f   :  { %4153 = vmatprep.subr.bf16.mxu1 %v5355_v29  ;;  %v5415_v29 = vld [vmem:[#allocation5 + $0x69c] ss:$20 sps:$4 sm:$0xff]  }
 0x171   :  { %4117 = vmatpush1.bf16.msra.mxu0 %v5362_v49  ;;  %v5422_v49 = vld [vmem:[#allocation5 + $0x3c8] ss:$20 sps:$4 sm:$0xff]  }
 0x172   :  { %4118 = vmatprep.subr.bf16.mxu0 %v5370_v15  ;;  %4154 = vmatpush1.bf16.msra.mxu1 %v5353_v2  ;;  %v5430_v15 = vld [vmem:[#allocation5 + $0x8a4] ss:$20 sps:$4 sm:$0xff]  }
 0x173   :  { %4155 = vmatprep.subr.bf16.mxu1 %v5361_v54  ;;  %v5413_v2 = vld [vmem:[#allocation5 + $0x698] ss:$20 sps:$4 sm:$0xff]   ;;  %v5421_v54 = vld [vmem:[#allocation5 + $0x674] ss:$20 sps:$4 sm:$0xff]  }
 0x175   :  { %4119 = vmatpush1.bf16.msra.mxu0 %v5368_v13  ;;  %v5428_v13 = vld [vmem:[#allocation5 + $0x8a0] ss:$20 sps:$4 sm:$0xff]  }
 0x176   :  { %4120 = vmatprep.subr.bf16.mxu0 %v5376_v25  ;;  %4156 = vmatpush1.bf16.msra.mxu1 %v5359_v23  ;;  %v5419_v25 = vld [vmem:[#allocation5 + $0x670] ss:$20 sps:$4 sm:$0xff]   ;;  %v5427_v23 = vld [vmem:[#allocation5 + $0x64c] ss:$20 sps:$4 sm:$0xff]  }
 0x177   :  { %4157 = vmatprep.subr.bf16.mxu1 %v5367_v20  ;;  %v5442_v20 = vld [vmem:[#allocation5 + $0x854] ss:$20 sps:$4 sm:$0xff]  }
 0x179   :  { %4121 = vmatpush1.bf16.msra.mxu0 %v5374_v37  ;;  %v5425_v37 = vld [vmem:[#allocation5 + $0x648] ss:$20 sps:$4 sm:$0xff]  }
 0x17a   :  { %4122 = vmatprep.subr.bf16.mxu0 %v5382_v51  ;;  %4158 = vmatpush1.bf16.msra.mxu1 %v5365_v0  ;;  %v3935_v36 = vpop.f32.mrf.mxu1  ;;  %v5440_v51 = vld [vmem:[#allocation5 + $0x850] ss:$20 sps:$4 sm:$0xff]   ;;  %v5448_v0 = vld [vmem:[#allocation5 + $0x82c] ss:$20 sps:$4 sm:$0xff]  }
 0x17b   :  { %4159 = vmatprep.subr.bf16.mxu1 %v5373_v4  ;;  %v6297_v34 = vadd.f32 %v3935_v36, %v3895_v56  ;;  %v5439_v4 = vld [vmem:[#allocation5 + $0xafc] ss:$20 sps:$4 sm:$0xff]   ;;  %v5454_v56 = vld [vmem:[#allocation5 + $0x804] ss:$20 sps:$4 sm:$0xff]  }
 0x17c   :  { %v3937_v26 = vpop.f32.mrf.mxu1  ;;  %v5443_v36 = vld [vmem:[#allocation5 + $0xad0] ss:$20 sps:$4 sm:$0xff]  }
 0x17d   :  { %4123 = vmatpush2.bf16.msra.mxu0 %v5380_v60  ;;  %v6299_v27 = vadd.f32 %v3937_v26, %v3897_v32  ;;  %v5446_v60 = vld [vmem:[#allocation5 + $0x828] ss:$20 sps:$4 sm:$0xff]   ;;  %v5452_v32 = vld [vmem:[#allocation5 + $0x800] ss:$20 sps:$4 sm:$0xff]  }
 0x17e   :  { %4124 = vmatprep.subr.bf16.mxu0 %v5388_v48  ;;  %4160 = vmatpush1.bf16.msra.mxu1 %v5371_v62  ;;  %v3939_v6 = vpop.f32.mrf.mxu1  ;;  %v5437_v48 = vld [vmem:[#allocation5 + $0xaf8] ss:$20 sps:$4 sm:$0xff]   ;;  %v5445_v62 = vld [vmem:[#allocation5 + $0xad4] ss:$20 sps:$4 sm:$0xff]  }
 0x17f   :  { %4161 = vmatprep.subr.bf16.mxu1 %v5379_v47  ;;  %v5460_v47 = vld [vmem:[#allocation5 + $0x7dc] ss:$20 sps:$4 sm:$0xff]   ;;  %v5466_v26 = vld [vmem:[#allocation5 + $0x7b4] ss:$20 sps:$4 sm:$0xff]  }
 0x180   :  { %v3940_v18 = vpop.f32.mrf.mxu1  ;;  %v5464_v6 = vld [vmem:[#allocation5 + $0x7b0] ss:$20 sps:$4 sm:$0xff]  }
 0x181   :  { %4125 = vmatpush2.bf16.msra.mxu0 %v5386_v12  ;;  %v5451_v12 = vld [vmem:[#allocation5 + $0xaac] ss:$20 sps:$4 sm:$0xff]  }
 0x182   :  { %4126 = vmatprep.subr.bf16.mxu0 %v5394_v46  ;;  %4162 = vmatpush1.bf16.msra.mxu1 %v5377_v8  ;;  %v5458_v46 = vld [vmem:[#allocation5 + $0x7d8] ss:$20 sps:$4 sm:$0xff]   ;;  %v5449_v8 = vld [vmem:[#allocation5 + $0xaa8] ss:$20 sps:$4 sm:$0xff]   ;;  %v5455_v18 = vld [vmem:[#allocation5 + $0xa80] ss:$20 sps:$4 sm:$0xff]  }
 0x183   :  { %4163 = vmatprep.subr.bf16.mxu1 %v5385_v41  ;;  %v5457_v41 = vld [vmem:[#allocation5 + $0xa84] ss:$20 sps:$4 sm:$0xff]  }
 0x185   :  { %4127 = vmatpush2.bf16.msra.mxu0 %v5392_v7  ;;  %v5472_v7 = vld [vmem:[#allocation5 + $0x78c] ss:$20 sps:$4 sm:$0xff]  }
 0x186   :  { %4128 = vmatprep.subr.bf16.mxu0 %v5400_v31  ;;  %4164 = vmatpush2.bf16.msra.mxu1 %v5383_v10 }
 0x187   :  { %4165 = vmatprep.subr.bf16.mxu1 %v5391_v19  ;;  %v5463_v19 = vld [vmem:[#allocation5 + $0xa5c] ss:$20 sps:$4 sm:$0xff]  }
 0x189   :  { %4129 = vmatpush2.bf16.msra.mxu0 %v5398_v53 }
 0x18a   :  { %4130 = vmatprep.subr.bf16.mxu0 %v5406_v22  ;;  %4166 = vmatpush2.bf16.msra.mxu1 %v5389_v9  ;;  %v5470_v22 = vld [vmem:[#allocation5 + $0x788] ss:$20 sps:$4 sm:$0xff]  }
 0x18b   :  { %4167 = vmatprep.subr.bf16.mxu1 %v5397_v35  ;;  %v5478_v35 = vld [vmem:[#allocation5 + $0x9e4] ss:$20 sps:$4 sm:$0xff]  }
 0x18d   :  { %4131 = vmatpush2.bf16.msra.mxu0 %v5404_v45 }
 0x18e   :  { %4132 = vmatprep.subr.bf16.mxu0 %v5412_v61  ;;  %4168 = vmatpush2.bf16.msra.mxu1 %v5395_v1  ;;  %v5461_v61 = vld [vmem:[#allocation5 + $0xa58] ss:$20 sps:$4 sm:$0xff]   ;;  %v5469_v1 = vld [vmem:[#allocation5 + $0xa34] ss:$20 sps:$4 sm:$0xff]  }
 0x18f   :  { %4169 = vmatprep.subr.bf16.mxu1 %v5403_v33 }
 0x191   :  { %4133 = vmatpush2.bf16.msra.mxu0 %v5410_v58  ;;  %v5476_v58 = vld [vmem:[#allocation5 + $0x9e0] ss:$20 sps:$4 sm:$0xff]  }
 0x192   :  { %4134 = vmatprep.subr.bf16.mxu0 %v5418_v16  ;;  %4170 = vmatpush2.bf16.msra.mxu1 %v5401_v5  ;;  %v5467_v16 = vld [vmem:[#allocation5 + $0xa30] ss:$20 sps:$4 sm:$0xff]   ;;  %v5475_v5 = vld [vmem:[#allocation5 + $0xa0c] ss:$20 sps:$4 sm:$0xff]  }
 0x193   :  { %4171 = vmatprep.subr.bf16.mxu1 %v5409_v24  ;;  %v5482_v24 = vld [vmem:[#allocation5 + $0x9b8] ss:$20 sps:$4 sm:$0xff]  }
 0x195   :  { %4135 = vmatpush2.bf16.msra.mxu0 %v5416_v28  ;;  %v5473_v28 = vld [vmem:[#allocation5 + $0xa08] ss:$20 sps:$4 sm:$0xff]  }
 0x196   :  { %4136 = vmatprep.subr.bf16.mxu0 %v5424_v42  ;;  %4172 = vmatpush2.bf16.msra.mxu1 %v5407_v38  ;;  %v5481_v42 = vld [vmem:[#allocation5 + $0xc64] ss:$20 sps:$4 sm:$0xff]  }
 0x197   :  { %4173 = vmatprep.subr.bf16.mxu1 %v5415_v29  ;;  %v5488_v38 = vld [vmem:[#allocation5 + $0x990] ss:$20 sps:$4 sm:$0xff]   ;;  %v5496_v29 = vld [vmem:[#allocation5 + $0x96c] ss:$20 sps:$4 sm:$0xff]  }
 0x199   :  { %4137 = vmatpush2.bf16.msra.mxu0 %v5422_v49  ;;  %v5479_v49 = vld [vmem:[#allocation5 + $0xc60] ss:$20 sps:$4 sm:$0xff]  }
 0x19a   :  { %4188 = vmatprep.subr.bf16.mxu0 %v5430_v15  ;;  %4174 = vmatpush2.bf16.msra.mxu1 %v5413_v2  ;;  %v5487_v15 = vld [vmem:[#allocation5 + $0xc3c] ss:$20 sps:$4 sm:$0xff]  }
 0x19b   :  { %4175 = vmatprep.subr.bf16.mxu1 %v5421_v54  ;;  %v5494_v2 = vld [vmem:[#allocation5 + $0x968] ss:$20 sps:$4 sm:$0xff]   ;;  %v5502_v54 = vld [vmem:[#allocation5 + $0x944] ss:$20 sps:$4 sm:$0xff]  }
 0x19c   :  { %4139 = vmatmul.mubr.bf16.vlgmr.msra.gmra.mxu0 %v5965_v14 }
 0x19d   :  { %4189 = vmatpush1.bf16.msra.mxu0 %v5428_v13  ;;  %4220 = vmatprep.mubr.bf16.mxu0 %v6141_v43  ;;  %v5485_v13 = vld [vmem:[#allocation5 + $0xc38] ss:$20 sps:$4 sm:$0xff]  }
 0x19e   :  { %4190 = vmatprep.subr.bf16.mxu0 %v5436_v59  ;;  %4176 = vmatpush2.bf16.msra.mxu1 %v5419_v25  ;;  %v5493_v59 = vld [vmem:[#allocation5 + $0xc14] ss:$20 sps:$4 sm:$0xff]  }
 0x19f   :  { %4177 = vmatprep.subr.bf16.mxu1 %v5427_v23  ;;  %v5500_v25 = vld [vmem:[#allocation5 + $0x940] ss:$20 sps:$4 sm:$0xff]   ;;  %v5508_v23 = vld [vmem:[#allocation5 + $0x91c] ss:$20 sps:$4 sm:$0xff]  }
 0x1a1   :  { %4191 = vmatpush1.bf16.msra.mxu0 %v5434_v21  ;;  %v5491_v21 = vld [vmem:[#allocation5 + $0xc10] ss:$20 sps:$4 sm:$0xff]  }
 0x1a2   :  { %4192 = vmatprep.subr.bf16.mxu0 %v5442_v20  ;;  %4178 = vmatpush2.bf16.msra.mxu1 %v5425_v37  ;;  %v5499_v20 = vld [vmem:[#allocation5 + $0xbec] ss:$20 sps:$4 sm:$0xff]  }
 0x1a3   :  { %4229 = vmatprep.subr.bf16.mxu1 %v5433_v57  ;;  %v5506_v37 = vld [vmem:[#allocation5 + $0x918] ss:$20 sps:$4 sm:$0xff]   ;;  %v5514_v57 = vld [vmem:[#allocation5 + $0x8f4] ss:$20 sps:$4 sm:$0xff]  }
 0x1a5   :  { %4193 = vmatpush1.bf16.msra.mxu0 %v5440_v51  ;;  %4180 = vmatmul.mubr.bf16.vlgmr.msra.gmra.mxu1 %v6095_v55  ;;  %v5497_v51 = vld [vmem:[#allocation5 + $0xbe8] ss:$20 sps:$4 sm:$0xff]  }
 0x1a6   :  { %4194 = vmatprep.subr.bf16.mxu0 %v5448_v0  ;;  %4230 = vmatpush1.bf16.msra.mxu1 %v5431_v44  ;;  %v5505_v0 = vld [vmem:[#allocation5 + $0xbc4] ss:$20 sps:$4 sm:$0xff]  }
 0x1a7   :  { %4261 = vmatprep.mubr.bf16.mxu1 %v6259_v30  ;;  %4231 = vmatprep.subr.bf16.mxu1 %v5439_v4  ;;  %v5512_v44 = vld [vmem:[#allocation5 + $0x8f0] ss:$20 sps:$4 sm:$0xff]   ;;  %v5520_v4 = vld [vmem:[#allocation5 + $0x8cc] ss:$20 sps:$4 sm:$0xff]  }
 0x1a9   :  { %4195 = vmatpush1.bf16.msra.mxu0 %v5446_v60  ;;  %v5503_v60 = vld [vmem:[#allocation5 + $0xbc0] ss:$20 sps:$4 sm:$0xff]  }
 0x1aa   :  { %4196 = vmatprep.subr.bf16.mxu0 %v5454_v56  ;;  %4232 = vmatpush1.bf16.msra.mxu1 %v5437_v48  ;;  %v5511_v56 = vld [vmem:[#allocation5 + $0xb9c] ss:$20 sps:$4 sm:$0xff]  }
 0x1ab   :  { %4233 = vmatprep.subr.bf16.mxu1 %v5445_v62  ;;  %v5518_v48 = vld [vmem:[#allocation5 + $0x8c8] ss:$20 sps:$4 sm:$0xff]  }
 0x1ac   :  { %v5524_v62 = vld [vmem:[#allocation5 + $0x268] ss:$20 sps:$4 sm:$0xff]  }
 0x1ad   :  { %4197 = vmatpush1.bf16.msra.mxu0 %v5452_v32  ;;  %v5509_v32 = vld [vmem:[#allocation5 + $0xb98] ss:$20 sps:$4 sm:$0xff]  }
 0x1ae   :  { %4198 = vmatprep.subr.bf16.mxu0 %v5460_v47  ;;  %4234 = vmatpush1.bf16.msra.mxu1 %v5443_v36  ;;  %v5517_v47 = vld [vmem:[#allocation5 + $0xb74] ss:$20 sps:$4 sm:$0xff]  }
 0x1af   :  { %4235 = vmatprep.subr.bf16.mxu1 %v5451_v12  ;;  %v5525_v36 = vld [vmem:[#allocation5 + $0x128] ss:$20 sps:$4 sm:$0xff]   ;;  %v5528_v12 = vld [vmem:[#allocation5 + $0x240] ss:$20 sps:$4 sm:$0xff]  }
 0x1b1   :  { %4199 = vmatpush1.bf16.msra.mxu0 %v5458_v46  ;;  %v3976_v31 = vpop.f32.mrf.mxu0  ;;  %v5515_v46 = vld [vmem:[#allocation5 + $0xb70] ss:$20 sps:$4 sm:$0xff]  }
 0x1b2   :  { %4200 = vmatprep.subr.bf16.mxu0 %v5466_v26  ;;  %4236 = vmatpush1.bf16.msra.mxu1 %v5449_v8  ;;  %v6306_v10 = vadd.f32 %v3976_v31, %v6297_v34  ;;  %v5484_v34 = vld [vmem:[#allocation5 + $0x9bc] ss:$20 sps:$4 sm:$0xff]   ;;  %v5523_v26 = vld [vmem:[#allocation5 + $0xb4c] ss:$20 sps:$4 sm:$0xff]  }
 0x1b3   :  { %4237 = vmatprep.subr.bf16.mxu1 %v5457_v41  ;;  %v3978_v53 = vpop.f32.mrf.mxu0  ;;  %v5529_v8 = vld [vmem:[#allocation5 + $0x100] ss:$20 sps:$4 sm:$0xff]   ;;  %v5532_v41 = vld [vmem:[#allocation5 + $0x218] ss:$20 sps:$4 sm:$0xff]  }
 0x1b4   :  { %v6309_v9 = vadd.f32 %v3978_v53, %v6299_v27  ;;  %v5490_v27 = vld [vmem:[#allocation5 + $0x994] ss:$20 sps:$4 sm:$0xff]   ;;  %v5533_v31 = vld [vmem:[#allocation5 + $0xd8] ss:$20 sps:$4 sm:$0xff]  }
 0x1b5   :  { %4201 = vmatpush1.bf16.msra.mxu0 %v5464_v6  ;;  %v3980_v45 = vpop.f32.mrf.mxu0  ;;  %v5521_v6 = vld [vmem:[#allocation5 + $0xb48] ss:$20 sps:$4 sm:$0xff]   ;;  %v5530_v53 = vld [vmem:[#allocation5 + $0x4c0] ss:$20 sps:$4 sm:$0xff]  }
 0x1b6   :  { %4202 = vmatprep.subr.bf16.mxu0 %v5472_v7  ;;  %4238 = vmatpush1.bf16.msra.mxu1 %v5455_v18  ;;  %v5526_v7 = vld [vmem:[#allocation5 + $0x4e8] ss:$20 sps:$4 sm:$0xff]   ;;  %v5536_v18 = vld [vmem:[#allocation5 + $0x1f0] ss:$20 sps:$4 sm:$0xff]   ;;  %v5531_v45 = vld [vmem:[#allocation5 + $0x380] ss:$20 sps:$4 sm:$0xff]  }
 0x1b7   :  { %4239 = vmatprep.subr.bf16.mxu1 %v5463_v19  ;;  %v3981_v33 = vpop.f32.mrf.mxu0  ;;  %v5527_v19 = vld [vmem:[#allocation5 + $0x3a8] ss:$20 sps:$4 sm:$0xff]  }
 0x1b8   :  { %v5541_v33 = vld [vmem:[#allocation5 + $0x88] ss:$20 sps:$4 sm:$0xff]  }
 0x1b9   :  { %4203 = vmatpush1.bf16.msra.mxu0 %v5470_v22  ;;  %v5537_v22 = vld [vmem:[#allocation5 + $0xb0] ss:$20 sps:$4 sm:$0xff]  }
 0x1ba   :  { %4204 = vmatprep.subr.bf16.mxu0 %v5478_v35  ;;  %4240 = vmatpush1.bf16.msra.mxu1 %v5461_v61 }
 0x1bb   :  { %4241 = vmatprep.subr.bf16.mxu1 %v5469_v1  ;;  %v5534_v1 = vld [vmem:[#allocation5 + $0x498] ss:$20 sps:$4 sm:$0xff]  }
 0x1bd   :  { %4205 = vmatpush2.bf16.msra.mxu0 %v5476_v58  ;;  %v5544_v58 = vld [vmem:[#allocation5 + $0x1a0] ss:$20 sps:$4 sm:$0xff]  }
 0x1be   :  { %4206 = vmatprep.subr.bf16.mxu0 %v5484_v34  ;;  %4242 = vmatpush1.bf16.msra.mxu1 %v5467_v16  ;;  %v5535_v16 = vld [vmem:[#allocation5 + $0x358] ss:$20 sps:$4 sm:$0xff]  }
 0x1bf   :  { %4243 = vmatprep.subr.bf16.mxu1 %v5475_v5  ;;  %v5538_v5 = vld [vmem:[#allocation5 + $0x470] ss:$20 sps:$4 sm:$0xff]  }
 0x1c1   :  { %4207 = vmatpush2.bf16.msra.mxu0 %v5482_v24 }
 0x1c2   :  { %4208 = vmatprep.subr.bf16.mxu0 %v5490_v27  ;;  %4244 = vmatpush1.bf16.msra.mxu1 %v5473_v28  ;;  %v5545_v27 = vld [vmem:[#allocation5 + $0x60] ss:$20 sps:$4 sm:$0xff]   ;;  %v5548_v28 = vld [vmem:[#allocation5 + $0x178] ss:$20 sps:$4 sm:$0xff]  }
 0x1c3   :  { %4245 = vmatprep.subr.bf16.mxu1 %v5481_v42  ;;  %v5542_v42 = vld [vmem:[#allocation5 + $0x448] ss:$20 sps:$4 sm:$0xff]  }
 0x1c5   :  { %4209 = vmatpush2.bf16.msra.mxu0 %v5488_v38  ;;  %v5549_v38 = vld [vmem:[#allocation5 + $0x38] ss:$20 sps:$4 sm:$0xff]  }
 0x1c6   :  { %4210 = vmatprep.subr.bf16.mxu0 %v5496_v29  ;;  %4246 = vmatpush2.bf16.msra.mxu1 %v5479_v49  ;;  %v5552_v29 = vld [vmem:[#allocation5 + $0x150] ss:$20 sps:$4 sm:$0xff]   ;;  %v5543_v49 = vld [vmem:[#allocation5 + $0x308] ss:$20 sps:$4 sm:$0xff]  }
 0x1c7   :  { %4247 = vmatprep.subr.bf16.mxu1 %v5487_v15  ;;  %v5546_v15 = vld [vmem:[#allocation5 + $0x420] ss:$20 sps:$4 sm:$0xff]  }
 0x1c9   :  { %4211 = vmatpush2.bf16.msra.mxu0 %v5494_v2  ;;  %v5553_v2 = vld [vmem:[#allocation5 + $0x10] ss:$20 sps:$4 sm:$0xff]  }
 0x1ca   :  { %4212 = vmatprep.subr.bf16.mxu0 %v5502_v54  ;;  %4248 = vmatpush2.bf16.msra.mxu1 %v5485_v13  ;;  %v5556_v54 = vld [vmem:[#allocation5 + $0x768] ss:$20 sps:$4 sm:$0xff]   ;;  %v5547_v13 = vld [vmem:[#allocation5 + $0x2e0] ss:$20 sps:$4 sm:$0xff]  }
 0x1cb   :  { %4249 = vmatprep.subr.bf16.mxu1 %v5493_v59  ;;  %v5550_v59 = vld [vmem:[#allocation5 + $0x3f8] ss:$20 sps:$4 sm:$0xff]  }
 0x1cd   :  { %4213 = vmatpush2.bf16.msra.mxu0 %v5500_v25  ;;  %v5557_v25 = vld [vmem:[#allocation5 + $0x628] ss:$20 sps:$4 sm:$0xff]  }
 0x1ce   :  { %4214 = vmatprep.subr.bf16.mxu0 %v5508_v23  ;;  %4250 = vmatpush2.bf16.msra.mxu1 %v5491_v21  ;;  %v5560_v23 = vld [vmem:[#allocation5 + $0x740] ss:$20 sps:$4 sm:$0xff]   ;;  %v5551_v21 = vld [vmem:[#allocation5 + $0x2b8] ss:$20 sps:$4 sm:$0xff]  }
 0x1cf   :  { %4251 = vmatprep.subr.bf16.mxu1 %v5499_v20  ;;  %v5554_v20 = vld [vmem:[#allocation5 + $0x3d0] ss:$20 sps:$4 sm:$0xff]  }
 0x1d1   :  { %4215 = vmatpush2.bf16.msra.mxu0 %v5506_v37  ;;  %v5561_v37 = vld [vmem:[#allocation5 + $0x600] ss:$20 sps:$4 sm:$0xff]  }
 0x1d2   :  { %4216 = vmatprep.subr.bf16.mxu0 %v5514_v57  ;;  %4252 = vmatpush2.bf16.msra.mxu1 %v5497_v51  ;;  %v5564_v57 = vld [vmem:[#allocation5 + $0x718] ss:$20 sps:$4 sm:$0xff]   ;;  %v5555_v51 = vld [vmem:[#allocation5 + $0x290] ss:$20 sps:$4 sm:$0xff]  }
 0x1d3   :  { %4253 = vmatprep.subr.bf16.mxu1 %v5505_v0  ;;  %v5558_v0 = vld [vmem:[#allocation5 + $0x9e8] ss:$20 sps:$4 sm:$0xff]  }
 0x1d5   :  { %4217 = vmatpush2.bf16.msra.mxu0 %v5512_v44  ;;  %v5565_v44 = vld [vmem:[#allocation5 + $0x5d8] ss:$20 sps:$4 sm:$0xff]  }
 0x1d6   :  { %4218 = vmatprep.subr.bf16.mxu0 %v5520_v4  ;;  %4254 = vmatpush2.bf16.msra.mxu1 %v5503_v60  ;;  %v5568_v4 = vld [vmem:[#allocation5 + $0x6f0] ss:$20 sps:$4 sm:$0xff]   ;;  %v5559_v60 = vld [vmem:[#allocation5 + $0x8a8] ss:$20 sps:$4 sm:$0xff]  }
 0x1d7   :  { %4255 = vmatprep.subr.bf16.mxu1 %v5511_v56  ;;  %v5562_v56 = vld [vmem:[#allocation5 + $0x9c0] ss:$20 sps:$4 sm:$0xff]  }
 0x1d9   :  { %4219 = vmatpush2.bf16.msra.mxu0 %v5518_v48  ;;  %v5563_v48 = vld [vmem:[#allocation5 + $0x880] ss:$20 sps:$4 sm:$0xff]  }
 0x1da   :  { %4926 = vmatprep.subr.bf16.mxu0 %v5524_v62  ;;  %4256 = vmatpush2.bf16.msra.mxu1 %v5509_v32  ;;  %v5566_v62 = vld [vmem:[#allocation5 + $0x998] ss:$20 sps:$4 sm:$0xff]   ;;  %v5573_v32 = vld [vmem:[#allocation5 + $0x588] ss:$20 sps:$4 sm:$0xff]  }
 0x1db   :  { %4257 = vmatprep.subr.bf16.mxu1 %v5517_v47  ;;  %v5576_v47 = vld [vmem:[#allocation5 + $0x6a0] ss:$20 sps:$4 sm:$0xff]  }
 0x1dc   :  { %4221 = vmatmul.mubr.bf16.vlgmr.msra.gmra.mxu0 %v6213_v50 }
 0x1dd   :  { %4927 = vmatpush3.bf16.msra.mxu0 %v5525_v36  ;;  %4302 = vmatprep.mubr.bf16.mxu0 %v5824_v11  ;;  %v5540_v11 = vld [vmem:[#allocation5 + $0x1c8] ss:$20 sps:$4 sm:$0xff]   ;;  %v5567_v36 = vld [vmem:[#allocation5 + $0x858] ss:$20 sps:$4 sm:$0xff]  }
 0x1de   :  { %4928 = vmatprep.subr.bf16.mxu0 %v5528_v12  ;;  %4258 = vmatpush2.bf16.msra.mxu1 %v5515_v46  ;;  %v5570_v12 = vld [vmem:[#allocation5 + $0x970] ss:$20 sps:$4 sm:$0xff]   ;;  %v5577_v46 = vld [vmem:[#allocation5 + $0x560] ss:$20 sps:$4 sm:$0xff]  }
 0x1df   :  { %4259 = vmatprep.subr.bf16.mxu1 %v5523_v26  ;;  %v5571_v26 = vld [vmem:[#allocation5 + $0x830] ss:$20 sps:$4 sm:$0xff]  }
 0x1e1   :  { %4929 = vmatpush3.bf16.msra.mxu0 %v5529_v8  ;;  %v5574_v8 = vld [vmem:[#allocation5 + $0x948] ss:$20 sps:$4 sm:$0xff]  }
 0x1e2   :  { %4930 = vmatprep.subr.bf16.mxu0 %v5532_v41  ;;  %4260 = vmatpush2.bf16.msra.mxu1 %v5521_v6  ;;  %v5584_v41 = vld [vmem:[#allocation5 + $0x650] ss:$20 sps:$4 sm:$0xff]   ;;  %v5575_v6 = vld [vmem:[#allocation5 + $0x808] ss:$20 sps:$4 sm:$0xff]  }
 0x1e3   :  { %4948 = vmatprep.subr.bf16.mxu1 %v5526_v7  ;;  %v5578_v7 = vld [vmem:[#allocation5 + $0x920] ss:$20 sps:$4 sm:$0xff]  }
 0x1e5   :  { %4931 = vmatpush3.bf16.msra.mxu0 %v5533_v31  ;;  %v6313_v35 = vpop.f32.mrf.mxu1  ;;  %4262 = vmatmul.mubr.bf16.vlgmr.msra.gmra.mxu1 %v6281_v52  ;;  %v5585_v31 = vld [vmem:[#allocation5 + $0x510] ss:$20 sps:$4 sm:$0xff]  }
 0x1e6   :  { %4932 = vmatprep.subr.bf16.mxu0 %v5536_v18  ;;  %4949 = vmatpush3.bf16.msra.mxu1 %v5527_v19  ;;  %v5588_v18 = vld [vmem:[#allocation5 + $0xc68] ss:$20 sps:$4 sm:$0xff]   ;;  %v5579_v19 = vld [vmem:[#allocation5 + $0x7e0] ss:$20 sps:$4 sm:$0xff]  }
 0x1e7   :  { %4342 = vmatprep.mubr.bf16.mxu1 %v5908_v63  ;;  %v6317_v61 = vpop.f32.mrf.mxu1  ;;  %4950 = vmatprep.subr.bf16.mxu1 %v5530_v53  ;;  %v5539_v63 = vld [vmem:[#allocation5 + $0x330] ss:$20 sps:$4 sm:$0xff]   ;;  %v5582_v53 = vld [vmem:[#allocation5 + $0x8f8] ss:$20 sps:$4 sm:$0xff]  }
 0x1e9   :  { %4933 = vmatpush3.bf16.msra.mxu0 %v5537_v22  ;;  %v4021_v34 = vpop.f32.mrf.mxu1  ;;  %v5589_v22 = vld [vmem:[#allocation5 + $0xb28] ss:$20 sps:$4 sm:$0xff]  }
 0x1ea   :  { %4934 = vmatprep.subr.bf16.mxu0 %v5540_v11  ;;  %4951 = vmatpush3.bf16.msra.mxu1 %v5531_v45  ;;  %v5590_v11 = vld [vmem:[#allocation5 + $0xc40] ss:$20 sps:$4 sm:$0xff]   ;;  %v4018_v45 = vadd.f32 %v6313_v35, %v6306_v10  ;;  %v4020_v34 = vadd.f32 %v6317_v61, %v6309_v9  ;;  %v5587_v10 = vld [vmem:[#allocation5 + $0x790] ss:$20 sps:$4 sm:$0xff]   ;;  %v5596_v61 = vld [vmem:[#allocation5 + $0xbc8] ss:$20 sps:$4 sm:$0xff]  }
 0x1eb   :  { %4952 = vmatprep.subr.bf16.mxu1 %v5534_v1  ;;  %v4022_v24 = vpop.f32.mrf.mxu1  ;;  %v5583_v1 = vld [vmem:[#allocation5 + $0x7b8] ss:$20 sps:$4 sm:$0xff]   ;;  %v5594_v9 = vld [vmem:[#allocation5 + $0xbf0] ss:$20 sps:$4 sm:$0xff]  }
 0x1ed   :  { %4935 = vmatpush3.bf16.msra.mxu0 %v5541_v33  ;;  %v5586_v33 = vld [vmem:[#allocation5 + $0x8d0] ss:$20 sps:$4 sm:$0xff]  }
 0x1ee   :  { %4936 = vmatprep.subr.bf16.mxu0 %v5544_v58  ;;  %4953 = vmatpush3.bf16.msra.mxu1 %v5535_v16 }
 0x1ef   :  { %4954 = vmatprep.subr.bf16.mxu1 %v5538_v5  ;;  %v5591_v5 = vld [vmem:[#allocation5 + $0xb00] ss:$20 sps:$4 sm:$0xff]  }
 0x1f1   :  { %4937 = vmatpush3.bf16.msra.mxu0 %v5545_v27  ;;  %v5592_v27 = vld [vmem:[#allocation5 + $0xc18] ss:$20 sps:$4 sm:$0xff]  }
 0x1f2   :  { %4938 = vmatprep.subr.bf16.mxu0 %v5548_v28  ;;  %4955 = vmatpush3.bf16.msra.mxu1 %v5539_v63 }
 0x1f3   :  { %4956 = vmatprep.subr.bf16.mxu1 %v5542_v42 }
 0x1f5   :  { %4939 = vmatpush3.bf16.msra.mxu0 %v5549_v38 }
 0x1f6   :  { %4940 = vmatprep.subr.bf16.mxu0 %v5552_v29  ;;  %4957 = vmatpush3.bf16.msra.mxu1 %v5543_v49 }
 0x1f7   :  { %4958 = vmatprep.subr.bf16.mxu1 %v5546_v15  ;;  %v5597_v15 = vld [vmem:[#allocation5 + $0xa88] ss:$20 sps:$4 sm:$0xff]  }
 0x1f9   :  { %4941 = vmatpush3.bf16.msra.mxu0 %v5553_v2  ;;  %v5598_v2 = vld [vmem:[#allocation5 + $0xba0] ss:$20 sps:$4 sm:$0xff]  }
 0x1fa   :  { %4970 = vmatprep.subr.bf16.mxu0 %v5556_v54  ;;  %4959 = vmatpush3.bf16.msra.mxu1 %v5547_v13 }
 0x1fb   :  { %4960 = vmatprep.subr.bf16.mxu1 %v5550_v59  ;;  %v5599_v59 = vld [vmem:[#allocation5 + $0xa60] ss:$20 sps:$4 sm:$0xff]  }
 0x1fc   :  { %4303 = vmatmul.mubr.bf16.vlgmr.msra.gmra.mxu0 %v5882_v39  ;;  %v5569_v39 = vld [vmem:[#allocation5 + $0x5b0] ss:$20 sps:$4 sm:$0xff]  }
 0x1fd   :  { %4971 = vmatpush3.bf16.msra.mxu0 %v5557_v25  ;;  %4382 = vmatprep.mubr.bf16.mxu0 %v6021_v17  ;;  %v5572_v17 = vld [vmem:[#allocation5 + $0x6c8] ss:$20 sps:$4 sm:$0xff]  }
 0x1fe   :  { %4972 = vmatprep.subr.bf16.mxu0 %v5560_v23  ;;  %4961 = vmatpush3.bf16.msra.mxu1 %v5551_v21  ;;  %v5600_v23 = vld [vmem:[#allocation5 + $0xb78] ss:$20 sps:$4 sm:$0xff]  }
 0x1ff   :  { %4962 = vmatprep.subr.bf16.mxu1 %v5554_v20 }
 0x201   :  { %4973 = vmatpush3.bf16.msra.mxu0 %v5561_v37 }
 0x202   :  { %4974 = vmatprep.subr.bf16.mxu0 %v5564_v57  ;;  %4963 = vmatpush3.bf16.msra.mxu1 %v5555_v51  ;;  %v5602_v57 = vld [vmem:[#allocation5 + $0xb50] ss:$20 sps:$4 sm:$0xff]  }
 0x203   :  { %4992 = vmatprep.subr.bf16.mxu1 %v5558_v0  ;;  %v5603_v51 = vld [vmem:[#allocation5 + $0xa10] ss:$20 sps:$4 sm:$0xff]  }
 0x205   :  { %4975 = vmatpush3.bf16.msra.mxu0 %v5565_v44  ;;  %4343 = vmatmul.mubr.bf16.vlgmr.msra.gmra.mxu1 %v5965_v14  ;;  %v5580_v14 = vld [vmem:[#allocation5 + $0x678] ss:$20 sps:$4 sm:$0xff]  }
 0x206   :  { %4976 = vmatprep.subr.bf16.mxu0 %v5568_v4  ;;  %4993 = vmatpush3.bf16.msra.mxu1 %v5559_v60  ;;  %v1508_v4 = vsub.s32 2, %v6287_v40  ;;  %v1512_v60 = vsub.s32 3, %v6287_v40 }
 0x207   :  { %4422 = vmatprep.mubr.bf16.mxu1 %v6141_v43  ;;  %4994 = vmatprep.subr.bf16.mxu1 %v5562_v56  ;;  %v5581_v43 = vld [vmem:[#allocation5 + $0x538] ss:$20 sps:$4 sm:$0xff]  }
 0x208   :  { %v1509_v56 = vrot.slane %v6290_v3, %v1508_v4 }
 0x209   :  { %4977 = vmatpush3.bf16.msra.mxu0 %v5569_v39  ;;  %v1513_v39 = vrot.slane %v6290_v3, %v1512_v60 }
 0x20a   :  { %4978 = vmatprep.subr.bf16.mxu0 %v5572_v17  ;;  %4995 = vmatpush3.bf16.msra.mxu1 %v5563_v48 }
 0x20b   :  { %4996 = vmatprep.subr.bf16.mxu1 %v5566_v62 }
 0x20d   :  { %4979 = vmatpush3.bf16.msra.mxu0 %v5573_v32 }
 0x20e   :  { %4980 = vmatprep.subr.bf16.mxu0 %v5576_v47  ;;  %4997 = vmatpush3.bf16.msra.mxu1 %v5567_v36 }
 0x20f   :  { %4998 = vmatprep.subr.bf16.mxu1 %v5570_v12 }
 0x211   :  { %4981 = vmatpush3.bf16.msra.mxu0 %v5577_v46 }
 0x212   :  { %4982 = vmatprep.subr.bf16.mxu0 %v5580_v14  ;;  %4999 = vmatpush3.bf16.msra.mxu1 %v5571_v26 }
 0x213   :  { %5000 = vmatprep.subr.bf16.mxu1 %v5574_v8 }
 0x215   :  { %4983 = vmatpush3.bf16.msra.mxu0 %v5581_v43 }
 0x216   :  { %4984 = vmatprep.subr.bf16.mxu0 %v5584_v41  ;;  %5001 = vmatpush3.bf16.msra.mxu1 %v5575_v6 }
 0x217   :  { %5002 = vmatprep.subr.bf16.mxu1 %v5578_v7 }
 0x219   :  { %4985 = vmatpush3.bf16.msra.mxu0 %v5585_v31 }
 0x21a   :  { %5014 = vmatprep.subr.bf16.mxu0 %v5588_v18  ;;  %5003 = vmatpush3.bf16.msra.mxu1 %v5579_v19 }
 0x21b   :  { %5004 = vmatprep.subr.bf16.mxu1 %v5582_v53 }
 0x21c   :  { %v4058_v58 = vpop.f32.mrf.mxu0  ;;  %4383 = vmatmul.mubr.bf16.vlgmr.msra.gmra.mxu0 %v6095_v55  ;;  %v5593_v55 = vld [vmem:[#allocation5 + $0xad8] ss:$20 sps:$4 sm:$0xff]  }
 0x21d   :  { %v4059_v16 = vadd.f32 %v4058_v58, %v4018_v45  ;;  %5015 = vmatpush3.bf16.msra.mxu0 %v5589_v22  ;;  %4462 = vmatprep.mubr.bf16.mxu0 %v6259_v30  ;;  %v5595_v30 = vld [vmem:[#allocation5 + $0xab0] ss:$20 sps:$4 sm:$0xff]  }
 0x21e   :  { %v4060_v24 = vpop.f32.mrf.mxu0  ;;  %5016 = vmatprep.subr.bf16.mxu0 %v5590_v11  ;;  %5005 = vmatpush3.bf16.msra.mxu1 %v5583_v1 }
 0x21f   :  { %v4921_v35 = vmul.f32 -1.442695, %v4059_v16  ;;  %v4061_v28 = vadd.f32 %v4060_v24, %v4020_v34  ;;  %5006 = vmatprep.subr.bf16.mxu1 %v5586_v33 }
 0x220   :  { %v4062_v63 = vpop.f32.mrf.mxu0 }
 0x221   :  { %5604 = vpow2.f32 %v4921_v35  ;;  %v4922_v42 = vmul.f32 -1.442695, %v4061_v28  ;;  %5017 = vmatpush3.bf16.msra.mxu0 %v5591_v5 }
 0x222   :  { %v4063_v38 = vpop.f32.mrf.mxu0  ;;  %5018 = vmatprep.subr.bf16.mxu0 %v5592_v27  ;;  %5007 = vmatpush3.bf16.msra.mxu1 %v5587_v10 }
 0x223   :  { %5606 = vpow2.f32 %v4922_v42 }
 0x225   :  { %5019 = vmatpush3.bf16.msra.mxu0 %v5593_v55  ;;  %4423 = vmatmul.mubr.bf16.vlgmr.msra.gmra.mxu1 %v6213_v50  ;;  %v4099_v29 = vpop.f32.mrf.mxu1  ;;  %v5601_v50 = vld [vmem:[#allocation5 + $0xa38] ss:$20 sps:$4 sm:$0xff]  }
 0x226   :  { %5020 = vmatprep.subr.bf16.mxu0 %v5594_v9  ;;  %v4100_v17 = vadd.f32 %v4099_v29, %v1509_v56 }
 0x227   :  { %v4101_v49 = vpop.f32.mrf.mxu1 }
 0x228   :  { %v4102_v62 = vadd.f32 %v4101_v49, %v1513_v39 }
 0x229   :  { %5021 = vmatpush3.bf16.msra.mxu0 %v5595_v30  ;;  %v4103_v54 = vpop.f32.mrf.mxu1 }
 0x22a   :  { %5022 = vmatprep.subr.bf16.mxu0 %v5596_v61 }
 0x22b   :  { %v4104_v13 = vpop.f32.mrf.mxu1 }
 0x22d   :  { %5023 = vmatpush3.bf16.msra.mxu0 %v5597_v15 }
 0x22e   :  { %v5605_v25 = vpop.eup %5604  ;;  %5024 = vmatprep.subr.bf16.mxu0 %v5598_v2 }
 0x22f   :  { %v4485_v21 = vadd.f32 1.0, %v5605_v25 }
 0x230   :  { %v5607_v20 = vpop.eup %5606 }
 0x231   :  { %5608 = vrcp.f32 %v4485_v21  ;;  %v4486_v37 = vadd.f32 1.0, %v5607_v20  ;;  %5025 = vmatpush3.bf16.msra.mxu0 %v5599_v59  ;;  %v1516_v21 = vsub.s32 4, %v6287_v40 }
 0x232   :  { %5026 = vmatprep.subr.bf16.mxu0 %v5600_v23 }
 0x233   :  { %5610 = vrcp.f32 %v4486_v37  ;;  %v1517_v20 = vrot.slane %v6290_v3, %v1516_v21 }
 0x235   :  { %5027 = vmatpush3.bf16.msra.mxu0 %v5601_v50 }
 0x236   :  { %5028 = vmatprep.subr.bf16.mxu0 %v5602_v57 }
 0x239   :  { %5029 = vmatpush3.bf16.msra.mxu0 %v5603_v51 }
 0x23c   :  { %4463 = vmatmul.mubr.bf16.vlgmr.msra.gmra.mxu0 %v6281_v52 }
 0x23e   :  { %v5609_v0 = vpop.eup %5608 }
 0x23f   :  { %4500 = vst [vmem:[#allocation8] sm:$0xff] %v5609_v0 }
 0x240   :  { %v5611_v44 = vpop.eup %5610 }
 0x241   :  { %4501 = vst [vmem:[#allocation8 + $0x8] sm:$0xff] %v5611_v44 }
 0x25c   :  { %v4140_v48 = vpop.f32.mrf.mxu0 }
 0x25d   :  { %v4141_v32 = vadd.f32 %v4140_v48, %v4100_v17 }
 0x25e   :  { %v4142_v47 = vpop.f32.mrf.mxu0 }
 0x25f   :  { %v4143_v36 = vadd.f32 %v4142_v47, %v4102_v62 }
 0x260   :  { %v4144_v12 = vpop.f32.mrf.mxu0 }
 0x262   :  { %v4145_v52 = vpop.f32.mrf.mxu0 }
 0x265   :  { %v4181_v46 = vpop.f32.mrf.mxu1 }
 0x266   :  { %v4182_v7 = vadd.f32 %v4181_v46, %v4141_v32 }
 0x267   :  { %v4183_v14 = vpop.f32.mrf.mxu1 }
 0x268   :  { %v4184_v18 = vadd.f32 %v4183_v14, %v4143_v36 }
 0x269   :  { %v4185_v26 = vpop.f32.mrf.mxu1 }
 0x26b   :  { %v4186_v8 = vpop.f32.mrf.mxu1 }
 0x29c   :  { %v4222_v43 = vpop.f32.mrf.mxu0 }
 0x29d   :  { %v4223_v19 = vadd.f32 %v4222_v43, %v4182_v7 }
 0x29e   :  { %v4224_v41 = vpop.f32.mrf.mxu0 }
 0x29f   :  { %v4225_v53 = vadd.f32 %v4224_v41, %v4184_v18 }
 0x2a0   :  { %v4226_v6 = vpop.f32.mrf.mxu0 }
 0x2a2   :  { %v4227_v31 = vpop.f32.mrf.mxu0 }
 0x2a5   :  { %v4263_v22 = vpop.f32.mrf.mxu1 }
 0x2a6   :  { %v4264_v11 = vadd.f32 %v4263_v22, %v4223_v19 }
 0x2a7   :  { %v4265_v45 = vpop.f32.mrf.mxu1 }
 0x2a8   :  { %v4923_v1 = vmul.f32 -1.442695, %v4264_v11  ;;  %v4266_v33 = vadd.f32 %v4265_v45, %v4225_v53 }
 0x2a9   :  { %v4267_v58 = vpop.f32.mrf.mxu1 }
 0x2aa   :  { %5612 = vpow2.f32 %v4923_v1  ;;  %v4924_v34 = vmul.f32 -1.442695, %v4266_v33 }
 0x2ab   :  { %v4268_v16 = vpop.f32.mrf.mxu1 }
 0x2ac   :  { %5614 = vpow2.f32 %v4924_v34 }
 0x2b7   :  { %v5613_v5 = vpop.eup %5612 }
 0x2b8   :  { %v4487_v24 = vadd.f32 1.0, %v5613_v5 }
 0x2b9   :  { %v5615_v27 = vpop.eup %5614 }
 0x2ba   :  { %5616 = vrcp.f32 %v4487_v24  ;;  %v4488_v10 = vadd.f32 1.0, %v5615_v27 }
 0x2bc   :  { %v4942_v35 = vpop.f32.mrf.mxu0  ;;  %5618 = vrcp.f32 %v4488_v10 }
 0x2be   :  { %v4943_v28 = vpop.f32.mrf.mxu0 }
 0x2bf   :  { %v4944_v37 = vadd.f32 %v4943_v28, %v4942_v35 }
 0x2c0   :  { %v4945_v63 = vpop.f32.mrf.mxu0 }
 0x2c1   :  { %v4305_v50 = vadd.f32 %v4944_v37, %v1517_v20 }
 0x2c2   :  { %v4946_v42 = vpop.f32.mrf.mxu0 }
 0x2c5   :  { %v4964_v55 = vpop.f32.mrf.mxu1 }
 0x2c7   :  { %v5617_v38 = vpop.eup %5616  ;;  %v4965_v9 = vpop.f32.mrf.mxu1 }
 0x2c8   :  { %4502 = vst [vmem:[#allocation8 + $0x10] sm:$0xff] %v5617_v38  ;;  %v4966_v57 = vadd.f32 %v4965_v9, %v4964_v55 }
 0x2c9   :  { %v5619_v30 = vpop.eup %5618  ;;  %v4967_v61 = vpop.f32.mrf.mxu1 }
 0x2ca   :  { %4503 = vst [vmem:[#allocation8 + $0x18] sm:$0xff] %v5619_v30  ;;  %v4345_v0 = vadd.f32 %v4966_v57, %v4305_v50 }
 0x2cb   :  { %v4968_v29 = vpop.f32.mrf.mxu1 }
 0x2dc   :  { %v4986_v49 = vpop.f32.mrf.mxu0 }
 0x2de   :  { %v4987_v15 = vpop.f32.mrf.mxu0 }
 0x2df   :  { %v4988_v51 = vadd.f32 %v4987_v15, %v4986_v49 }
 0x2e0   :  { %v4989_v2 = vpop.f32.mrf.mxu0 }
 0x2e1   :  { %v4385_v44 = vadd.f32 %v4988_v51, %v4345_v0 }
 0x2e2   :  { %v4990_v54 = vpop.f32.mrf.mxu0 }
 0x2e5   :  { %v5008_v13 = vpop.f32.mrf.mxu1 }
 0x2e7   :  { %v5009_v59 = vpop.f32.mrf.mxu1 }
 0x2e8   :  { %v5010_v4 = vadd.f32 %v5009_v59, %v5008_v13 }
 0x2e9   :  { %v5011_v25 = vpop.f32.mrf.mxu1 }
 0x2ea   :  { %v4425_v39 = vadd.f32 %v5010_v4, %v4385_v44 }
 0x2eb   :  { %v5012_v23 = vpop.f32.mrf.mxu1 }
 0x2fc   :  { %v5030_v60 = vpop.f32.mrf.mxu0 }
 0x2fe   :  { %v5031_v56 = vpop.f32.mrf.mxu0 }
 0x2ff   :  { %v5032_v17 = vadd.f32 %v5031_v56, %v5030_v60 }
 0x300   :  { %v5033_v48 = vpop.f32.mrf.mxu0 }
 0x301   :  { %v4465_v62 = vadd.f32 %v5032_v17, %v4425_v39 }
 0x302   :  { %v5034_v32 = vpop.f32.mrf.mxu0 }
 0x303   :  { %v4925_v47 = vmul.f32 -1.442695, %v4465_v62 }
 0x305   :  { %5620 = vpow2.f32 %v4925_v47 }
 0x312   :  { %v5621_v36 = vpop.eup %5620 }
 0x313   :  { %v4489_v40 = vadd.f32 1.0, %v5621_v36 }
 0x315   :  { %5622 = vrcp.f32 %v4489_v40 }
 0x322   :  { %v5623_v3 = vpop.eup %5622 }
 0x323   :  { %4504 = vst [vmem:[#allocation8 + $0x20] sm:$0xff] %v5623_v3 }
 0x324   :  { %5695 = shalt.err (!%p5692_p5)
}
 0x325   :  { %4514 = dma.vmem_to_hbm [thread:$0]  %s4512_s2, 640, %s6343_s3, [#allocation4]  }
 0x326   :  { %5708 = dma.done.wait [#allocation4], 640  }
 0x327   :  { %5709 = vsyncadd [#allocation4], 4294966656 }
 0x328   :  { %4518 = vsyncpa [#allocation3], 1 }
 0x329   :  { %4519 = vsyncpa [#allocation6], 1 }
 0x32a   :  { %4520 = vsyncpa [#allocation4], 1 }

</bundles_post_ra>
